<compile_context>
chip_gen: v5e
topology: v5e:2x2
jax: 0.10.0
libtpu: 0.0.40
codegen_flags: <defaults>
</compile_context>

<pallas_src>
import functools

import numpy as np
import jax
import jax.numpy as jnp
from jax.experimental import pallas as pl
from jax.experimental.pallas import tpu as pltpu

LEAKY_SLOPE = 0.2


def _round_up(x, m):
    return ((x + m - 1) // m) * m


# ---------------------------------------------------------------------------
# Single fused Pallas kernel: conv1 (im2col GEMM) + conv2 (dense GEMM) +
# conv3 head folded with the spatial mean + hinge reduction.
# ---------------------------------------------------------------------------
def fused_disc_hinge_kernel(patches_ref, w1_ref, b1_ref, g2_ref, b2_ref,
                            g3_ref, b3_ref, out_ref, *, n_real, n_fake,
                            rows_per_pos, n_pos, pos_chunk, slope):
    c1 = w1_ref.shape[1]          # conv1 output channels (16)
    d2 = g2_ref.shape[1]          # conv2 flattened output size (512)

    w1 = w1_ref[...]              # (96, c1) bf16
    b1 = b1_ref[...]              # (1,  c1) f32

    acc = jnp.zeros((rows_per_pos, d2), jnp.float32)

    # conv1 GEMM against the raw 96x16 weight, fused with the conv2 dense
    # GEMM, accumulated per chunk of conv1 output positions.  All slice
    # offsets are static and sublane-aligned; no in-kernel relayouts.
    for q in range(n_pos // pos_chunk):
        rows = patches_ref[pl.ds(q * pos_chunk * rows_per_pos,
                                 pos_chunk * rows_per_pos), :]
        h1 = jnp.dot(rows, w1, preferred_element_type=jnp.float32)
        h1 = h1 + b1
        h1 = jnp.where(h1 > 0, h1, slope * h1)   # (pos_chunk*rows_per_pos, c1)
        for j in range(pos_chunk):
            p = q * pos_chunk + j
            lhs = h1[j * rows_per_pos:(j + 1) * rows_per_pos, :].astype(
                jnp.bfloat16)                                   # (8, c1)
            rhs = g2_ref[pl.ds(p * c1, c1), :]                  # (c1, d2)
            acc = acc + jnp.dot(lhs, rhs,
                                preferred_element_type=jnp.float32)

    # conv2 bias + LeakyReLU.
    h2 = acc + b2_ref[...]
    h2 = jnp.where(h2 > 0, h2, slope * h2)       # (rows_per_pos, d2)

    # conv3 head folded with its spatial mean: one f32 row vector.
    score = jnp.sum(h2 * g3_ref[...], axis=1, keepdims=True)  # (rows_per_pos,1)

    b3 = b3_ref[0, 0]
    mean_real = jnp.sum(score[0:n_real]) * (1.0 / float(n_real)) + b3
    mean_fake = (jnp.sum(score[n_real:n_real + n_fake])
                 * (1.0 / float(n_fake)) + b3)

    d_loss = (jnp.maximum(1.0 - mean_real, 0.0) +
              jnp.maximum(1.0 + mean_fake, 0.0))
    g_loss = -mean_fake

    # Lane-dense (1, 128) output row: lane 0 = D_loss_c, lane 1 = D_all_c_.
    col = jax.lax.broadcasted_iota(jnp.int32, out_ref.shape, 1)
    out_ref[...] = jnp.where(col == 0, d_loss,
                             jnp.where(col == 1, g_loss, 0.0))


# ---------------------------------------------------------------------------
# One-time (init) preparation: dense-unroll conv2, fold conv3 + spatial mean
# ---------------------------------------------------------------------------
def _conv_as_dense_matrix(weight, *, stride, pad, h_in, w_in, row_order="chw"):
    """Unroll a Conv2d (OIHW weight, zero padding) into a dense GEMM matrix.

    Rows index the flattened input feature map ('chw' = (c, y, x) order or
    'hwc' = (y, x, c)); columns index the flattened output in (c_out, y, x)
    order, so (x_flat @ G) equals the conv output flattened.
    """
    w = np.asarray(weight, np.float32)
    o_ch, c_ch, kh, kw = w.shape
    oh = (h_in + 2 * pad - kh) // stride + 1
    ow = (w_in + 2 * pad - kw) // stride + 1
    g = np.zeros((c_ch * h_in * w_in, o_ch * oh * ow), np.float32)
    cin = np.arange(c_ch)
    cols_o = np.arange(o_ch) * (oh * ow)
    for oy in range(oh):
        for ox in range(ow):
            col = cols_o + oy * ow + ox
            for i in range(kh):
                iy = stride * oy + i - pad
                if iy < 0 or iy >= h_in:
                    continue
                for j in range(kw):
                    ix = stride * ox + j - pad
                    if ix < 0 or ix >= w_in:
                        continue  # zero padding contributes nothing
                    if row_order == "chw":
                        row = cin * (h_in * w_in) + iy * w_in + ix
                    else:  # "hwc"
                        row = (iy * w_in + ix) * c_ch + cin
                    g[np.ix_(row, col)] += w[:, :, i, j].T  # (Cin, Cout)
    return g, oh, ow


def prepare_discriminator(params, in_hw=(16, 16)):
    """Build the fused-kernel operands once (outside the hot path)."""
    hin, win = in_hw
    w1 = np.asarray(params["w1"], np.float32)         # (16, 6, 4, 4)
    o1, c0, kh, kw = w1.shape
    oh1 = (hin + 2 - kh) // 2 + 1
    ow1 = (win + 2 - kw) // 2 + 1

    # conv1 stays a raw (Cin*Kh*Kw, Cout) GEMM weight; the wrapper im2cols x.
    w1_mat = w1.reshape(o1, c0 * kh * kw).T            # (96, 16)
    b1_row = np.asarray(params["b1"], np.float32)[None, :]

    # conv2 dense-unrolled GEMM with rows permuted to the (y, x, c) order the
    # in-kernel conv1 produces (folds the NHWC->CHW relayout into weights).
    g2, oh2, ow2 = _conv_as_dense_matrix(params["w2"], stride=2, pad=1,
                                         h_in=oh1, w_in=ow1, row_order="hwc")
    b2_row = np.repeat(np.asarray(params["b2"], np.float32), oh2 * ow2)[None, :]

    # conv3 head folded with the mean over all of its outputs.
    g3, _, _ = _conv_as_dense_matrix(params["w3"], stride=1, pad=1,
                                     h_in=oh2, w_in=ow2, row_order="chw")
    g3_row = (g3.sum(axis=1) / float(g3.shape[1]))[None, :]   # (1, 512)
    b3_mean = np.asarray(params["b3"], np.float32).mean()

    return {
        "w1m": jnp.asarray(w1_mat, jnp.bfloat16),
        "b1": jnp.asarray(b1_row, jnp.float32),
        "g2": jnp.asarray(g2, jnp.bfloat16),
        "b2": jnp.asarray(b2_row, jnp.float32),
        "g3": jnp.asarray(g3_row, jnp.float32),
        "b3": jnp.asarray(b3_mean, jnp.float32).reshape(1, 1),
    }


# ---------------------------------------------------------------------------
# Runtime wrapper: im2col (bf16) + one pallas_call for the whole loss
# ---------------------------------------------------------------------------
def _im2col_nchw(x, kh, kw, stride, pad):
    n, c, h, w = x.shape
    oh = (h + 2 * pad - kh) // stride + 1
    ow = (w + 2 * pad - kw) // stride + 1
    xp = jnp.pad(x, ((0, 0), (0, 0), (pad, pad), (pad, pad)))
    pieces = []
    for i in range(kh):
        for j in range(kw):
            pieces.append(xp[:, :, i:i + stride * (oh - 1) + 1:stride,
                             j:j + stride * (ow - 1) + 1:stride])
    pat = jnp.stack(pieces, axis=2)          # (n, c, kh*kw, oh, ow)
    pat = pat.transpose(3, 4, 0, 1, 2)       # (oh, ow, n, c, kh*kw)
    return pat.reshape(oh * ow * n, c * kh * kw), oh, ow


def loss_doc_forward(disc, x_fake, x_real, *, slope=LEAKY_SLOPE):
    n_real = x_real.shape[0]
    n_fake = x_fake.shape[0]
    n = n_real + n_fake
    rows_per_pos = max(_round_up(n, 8), 8)

    # Real + fake batched into one discriminator pass; batch padded to a
    # multiple of 8 so every in-kernel slice is sublane aligned (padded rows
    # are never read by the reduction).  bf16 halves the activation DMA.
    x_all = jnp.concatenate([x_real, x_fake], axis=0).astype(jnp.bfloat16)
    if rows_per_pos != n:
        pad = jnp.zeros((rows_per_pos - n,) + x_all.shape[1:], x_all.dtype)
        x_all = jnp.concatenate([x_all, pad], axis=0)

    patches, oh1, ow1 = _im2col_nchw(x_all, 4, 4, 2, 1)  # rows = (y, x, batch)
    n_pos = oh1 * ow1
    pos_chunk = 8 if n_pos % 8 == 0 else 1

    c1 = disc["w1m"].shape[1]
    d2 = disc["g2"].shape[1]
    flops = (2 * patches.shape[0] * patches.shape[1] * c1
             + 2 * n_pos * rows_per_pos * c1 * d2
             + 4 * rows_per_pos * d2)
    bytes_accessed = (patches.size * 2 + disc["w1m"].size * 2
                      + disc["g2"].size * 2
                      + (disc["b1"].size + disc["b2"].size
                         + disc["g3"].size + 1) * 4 + 128 * 4)

    kernel = functools.partial(
        fused_disc_hinge_kernel,
        n_real=n_real, n_fake=n_fake, rows_per_pos=rows_per_pos,
        n_pos=n_pos, pos_chunk=pos_chunk, slope=slope)

    out = pl.pallas_call(
        kernel,
        out_shape=jax.ShapeDtypeStruct((1, 128), jnp.float32),
        in_specs=[pl.BlockSpec(memory_space=pltpu.MemorySpace.VMEM)] * 6
                 + [pl.BlockSpec(memory_space=pltpu.MemorySpace.SMEM)],
        out_specs=pl.BlockSpec(memory_space=pltpu.MemorySpace.VMEM),
        cost_estimate=pl.CostEstimate(flops=int(flops), transcendentals=0,
                                      bytes_accessed=int(bytes_accessed)),
    )(patches, disc["w1m"], disc["b1"], disc["g2"], disc["b2"],
      disc["g3"], disc["b3"])

    # TODO(synk): Adam discriminator update skipped; D_all_c_ uses pre-update
    # weights.
    return out[0, 0], out[0, 1]


# ---------------------------------------------------------------------------
# Synthetic discriminator params + pure-JAX f32 reference (sanity check)
# ---------------------------------------------------------------------------
def init_params(key):
    k1, k2, k3 = jax.random.split(key, 3)

    def he(k, shape):
        fan_in = shape[1] * shape[2] * shape[3]
        return (jax.random.normal(k, shape, jnp.float32)
                * jnp.sqrt(2.0 / fan_in))

    return {
        "w1": he(k1, (16, 6, 4, 4)), "b1": jnp.zeros((16,), jnp.float32),
        "w2": he(k2, (32, 16, 4, 4)), "b2": jnp.zeros((32,), jnp.float32),
        "w3": he(k3, (1, 32, 4, 4)), "b3": jnp.zeros((1,), jnp.float32),
    }


def reference_loss(params, x_fake, x_real, slope=LEAKY_SLOPE):
    def conv(x, w, b, stride):
        y = jax.lax.conv_general_dilated(
            x, w, window_strides=(stride, stride), padding=((1, 1), (1, 1)),
            dimension_numbers=("NCHW", "OIHW", "NCHW"))
        return y + b[None, :, None, None]

    def disc_fwd(x):
        h = conv(x, params["w1"], params["b1"], 2)
        h = jnp.where(h > 0, h, slope * h)
        h = conv(h, params["w2"], params["b2"], 2)
        h = jnp.where(h > 0, h, slope * h)
        return conv(h, params["w3"], params["b3"], 1)

    m_real = jnp.mean(disc_fwd(x_real))
    m_fake = jnp.mean(disc_fwd(x_fake))
    d_loss = jnp.maximum(1.0 - m_real, 0.0) + jnp.maximum(1.0 + m_fake, 0.0)
    return d_loss, -m_fake


if __name__ == "__main__":
    key = jax.random.PRNGKey(0)
    kp, kf, kr = jax.random.split(key, 3)
    params = init_params(kp)
    disc = prepare_discriminator(params, in_hw=(16, 16))

    # Discriminator(6) -> 6-channel inputs.
    x_fake = jax.random.normal(kf, (2, 6, 16, 16), jnp.float32)
    x_real = jax.random.normal(kr, (2, 6, 16, 16), jnp.float32)

    loss_fn = jax.jit(loss_doc_forward)
    d_loss, d_all = loss_fn(disc, x_fake, x_real)
    jax.block_until_ready((d_loss, d_all))

    d_loss_ref, d_all_ref = reference_loss(params, x_fake, x_real)
    print("D_loss_c =", float(d_loss), " (f32 ref:", float(d_loss_ref), ")")
    print("D_all_c_ =", float(d_all), " (f32 ref:", float(d_all_ref), ")")
    assert np.isfinite(float(d_loss)) and np.isfinite(float(d_all))
    assert abs(float(d_loss) - float(d_loss_ref)) < 1e-1
    assert abs(float(d_all) - float(d_all_ref)) < 1e-1
    print("KERNEL_OK")
</pallas_src>

<mosaic_0001>
module attributes {stable_mosaic.version = 11 : i64} {
  func.func @fused_disc_hinge_kernel(%arg0: memref<512x96xbf16, #tpu.memory_space<vmem>>, %arg1: memref<96x16xbf16, #tpu.memory_space<vmem>>, %arg2: memref<1x16xf32, #tpu.memory_space<vmem>>, %arg3: memref<1024x512xbf16, #tpu.memory_space<vmem>>, %arg4: memref<1x512xf32, #tpu.memory_space<vmem>>, %arg5: memref<1x512xf32, #tpu.memory_space<vmem>>, %arg6: memref<1x1xf32, #tpu.memory_space<smem>>, %arg7: memref<1x128xf32, #tpu.memory_space<vmem>>) attributes {dimension_semantics = [], scalar_prefetch = 0 : i64, scratch_operands = 0 : i64, tpu.core_type = #tpu.core_type<tc>} {
    %c0 = arith.constant 0 : index
    %c0_0 = arith.constant 0 : index
    %0 = vector.load %arg1[%c0, %c0_0] : memref<96x16xbf16, #tpu.memory_space<vmem>>, vector<96x16xbf16>
    %c0_1 = arith.constant 0 : index
    %c0_2 = arith.constant 0 : index
    %1 = vector.load %arg2[%c0_1, %c0_2] : memref<1x16xf32, #tpu.memory_space<vmem>>, vector<1x16xf32>
    %cst = arith.constant 0.000000e+00 : f32
    %2 = vector.broadcast %cst : f32 to vector<8x512xf32>
    %c0_3 = arith.constant 0 : index
    %c0_4 = arith.constant 0 : index
    %3 = vector.load %arg0[%c0_3, %c0_4] : memref<512x96xbf16, #tpu.memory_space<vmem>>, vector<64x96xbf16>
    %cst_5 = arith.constant dense<0.000000e+00> : vector<64x16xf32>
    %4 = tpu.matmul %3, %0, %cst_5 {dimension_numbers = #tpu.dot_dimension_numbers<[1], [0], [0], [1], [0, 0, 1, 1], [], []>} : vector<64x96xbf16>, vector<96x16xbf16>, vector<64x16xf32> -> vector<64x16xf32>
    %5 = vector.broadcast %1 : vector<1x16xf32> to vector<64x16xf32>
    %6 = arith.addf %4, %5 : vector<64x16xf32>
    %cst_6 = arith.constant 0.000000e+00 : f32
    %7 = vector.broadcast %cst_6 : f32 to vector<64x16xf32>
    %8 = arith.cmpf ogt, %6, %7 : vector<64x16xf32>
    %cst_7 = arith.constant 2.000000e-01 : f32
    %9 = vector.broadcast %cst_7 : f32 to vector<64x16xf32>
    %10 = arith.mulf %9, %6 : vector<64x16xf32>
    %11 = arith.select %8, %6, %10 : vector<64x16xi1>, vector<64x16xf32>
    %12 = vector.extract_strided_slice %11 {offsets = [0, 0], sizes = [8, 16], strides = [1, 1]} : vector<64x16xf32> to vector<8x16xf32>
    %13 = arith.truncf %12 : vector<8x16xf32> to vector<8x16xbf16>
    %c0_8 = arith.constant 0 : index
    %c0_9 = arith.constant 0 : index
    %14 = vector.load %arg3[%c0_8, %c0_9] : memref<1024x512xbf16, #tpu.memory_space<vmem>>, vector<16x512xbf16>
    %cst_10 = arith.constant dense<0.000000e+00> : vector<8x512xf32>
    %15 = tpu.matmul %13, %14, %cst_10 {dimension_numbers = #tpu.dot_dimension_numbers<[1], [0], [0], [1], [0, 0, 1, 1], [], []>} : vector<8x16xbf16>, vector<16x512xbf16>, vector<8x512xf32> -> vector<8x512xf32>
    %16 = arith.addf %2, %15 : vector<8x512xf32>
    %17 = vector.extract_strided_slice %11 {offsets = [8, 0], sizes = [8, 16], strides = [1, 1]} : vector<64x16xf32> to vector<8x16xf32>
    %18 = arith.truncf %17 : vector<8x16xf32> to vector<8x16xbf16>
    %c16 = arith.constant 16 : index
    %c0_11 = arith.constant 0 : index
    %19 = vector.load %arg3[%c16, %c0_11] : memref<1024x512xbf16, #tpu.memory_space<vmem>>, vector<16x512xbf16>
    %cst_12 = arith.constant dense<0.000000e+00> : vector<8x512xf32>
    %20 = tpu.matmul %18, %19, %cst_12 {dimension_numbers = #tpu.dot_dimension_numbers<[1], [0], [0], [1], [0, 0, 1, 1], [], []>} : vector<8x16xbf16>, vector<16x512xbf16>, vector<8x512xf32> -> vector<8x512xf32>
    %21 = arith.addf %16, %20 : vector<8x512xf32>
    %22 = vector.extract_strided_slice %11 {offsets = [16, 0], sizes = [8, 16], strides = [1, 1]} : vector<64x16xf32> to vector<8x16xf32>
    %23 = arith.truncf %22 : vector<8x16xf32> to vector<8x16xbf16>
    %c32 = arith.constant 32 : index
    %c0_13 = arith.constant 0 : index
    %24 = vector.load %arg3[%c32, %c0_13] : memref<1024x512xbf16, #tpu.memory_space<vmem>>, vector<16x512xbf16>
    %cst_14 = arith.constant dense<0.000000e+00> : vector<8x512xf32>
    %25 = tpu.matmul %23, %24, %cst_14 {dimension_numbers = #tpu.dot_dimension_numbers<[1], [0], [0], [1], [0, 0, 1, 1], [], []>} : vector<8x16xbf16>, vector<16x512xbf16>, vector<8x512xf32> -> vector<8x512xf32>
    %26 = arith.addf %21, %25 : vector<8x512xf32>
    %27 = vector.extract_strided_slice %11 {offsets = [24, 0], sizes = [8, 16], strides = [1, 1]} : vector<64x16xf32> to vector<8x16xf32>
    %28 = arith.truncf %27 : vector<8x16xf32> to vector<8x16xbf16>
    %c48 = arith.constant 48 : index
    %c0_15 = arith.constant 0 : index
    %29 = vector.load %arg3[%c48, %c0_15] : memref<1024x512xbf16, #tpu.memory_space<vmem>>, vector<16x512xbf16>
    %cst_16 = arith.constant dense<0.000000e+00> : vector<8x512xf32>
    %30 = tpu.matmul %28, %29, %cst_16 {dimension_numbers = #tpu.dot_dimension_numbers<[1], [0], [0], [1], [0, 0, 1, 1], [], []>} : vector<8x16xbf16>, vector<16x512xbf16>, vector<8x512xf32> -> vector<8x512xf32>
    %31 = arith.addf %26, %30 : vector<8x512xf32>
    %32 = vector.extract_strided_slice %11 {offsets = [32, 0], sizes = [8, 16], strides = [1, 1]} : vector<64x16xf32> to vector<8x16xf32>
    %33 = arith.truncf %32 : vector<8x16xf32> to vector<8x16xbf16>
    %c64 = arith.constant 64 : index
    %c0_17 = arith.constant 0 : index
    %34 = vector.load %arg3[%c64, %c0_17] : memref<1024x512xbf16, #tpu.memory_space<vmem>>, vector<16x512xbf16>
    %cst_18 = arith.constant dense<0.000000e+00> : vector<8x512xf32>
    %35 = tpu.matmul %33, %34, %cst_18 {dimension_numbers = #tpu.dot_dimension_numbers<[1], [0], [0], [1], [0, 0, 1, 1], [], []>} : vector<8x16xbf16>, vector<16x512xbf16>, vector<8x512xf32> -> vector<8x512xf32>
    %36 = arith.addf %31, %35 : vector<8x512xf32>
    %37 = vector.extract_strided_slice %11 {offsets = [40, 0], sizes = [8, 16], strides = [1, 1]} : vector<64x16xf32> to vector<8x16xf32>
    %38 = arith.truncf %37 : vector<8x16xf32> to vector<8x16xbf16>
    %c80 = arith.constant 80 : index
    %c0_19 = arith.constant 0 : index
    %39 = vector.load %arg3[%c80, %c0_19] : memref<1024x512xbf16, #tpu.memory_space<vmem>>, vector<16x512xbf16>
    %cst_20 = arith.constant dense<0.000000e+00> : vector<8x512xf32>
    %40 = tpu.matmul %38, %39, %cst_20 {dimension_numbers = #tpu.dot_dimension_numbers<[1], [0], [0], [1], [0, 0, 1, 1], [], []>} : vector<8x16xbf16>, vector<16x512xbf16>, vector<8x512xf32> -> vector<8x512xf32>
    %41 = arith.addf %36, %40 : vector<8x512xf32>
    %42 = vector.extract_strided_slice %11 {offsets = [48, 0], sizes = [8, 16], strides = [1, 1]} : vector<64x16xf32> to vector<8x16xf32>
    %43 = arith.truncf %42 : vector<8x16xf32> to vector<8x16xbf16>
    %c96 = arith.constant 96 : index
    %c0_21 = arith.constant 0 : index
    %44 = vector.load %arg3[%c96, %c0_21] : memref<1024x512xbf16, #tpu.memory_space<vmem>>, vector<16x512xbf16>
    %cst_22 = arith.constant dense<0.000000e+00> : vector<8x512xf32>
    %45 = tpu.matmul %43, %44, %cst_22 {dimension_numbers = #tpu.dot_dimension_numbers<[1], [0], [0], [1], [0, 0, 1, 1], [], []>} : vector<8x16xbf16>, vector<16x512xbf16>, vector<8x512xf32> -> vector<8x512xf32>
    %46 = arith.addf %41, %45 : vector<8x512xf32>
    %47 = vector.extract_strided_slice %11 {offsets = [56, 0], sizes = [8, 16], strides = [1, 1]} : vector<64x16xf32> to vector<8x16xf32>
    %48 = arith.truncf %47 : vector<8x16xf32> to vector<8x16xbf16>
    %c112 = arith.constant 112 : index
    %c0_23 = arith.constant 0 : index
    %49 = vector.load %arg3[%c112, %c0_23] : memref<1024x512xbf16, #tpu.memory_space<vmem>>, vector<16x512xbf16>
    %cst_24 = arith.constant dense<0.000000e+00> : vector<8x512xf32>
    %50 = tpu.matmul %48, %49, %cst_24 {dimension_numbers = #tpu.dot_dimension_numbers<[1], [0], [0], [1], [0, 0, 1, 1], [], []>} : vector<8x16xbf16>, vector<16x512xbf16>, vector<8x512xf32> -> vector<8x512xf32>
    %51 = arith.addf %46, %50 : vector<8x512xf32>
    %c64_25 = arith.constant 64 : index
    %c0_26 = arith.constant 0 : index
    %52 = vector.load %arg0[%c64_25, %c0_26] : memref<512x96xbf16, #tpu.memory_space<vmem>>, vector<64x96xbf16>
    %cst_27 = arith.constant dense<0.000000e+00> : vector<64x16xf32>
    %53 = tpu.matmul %52, %0, %cst_27 {dimension_numbers = #tpu.dot_dimension_numbers<[1], [0], [0], [1], [0, 0, 1, 1], [], []>} : vector<64x96xbf16>, vector<96x16xbf16>, vector<64x16xf32> -> vector<64x16xf32>
    %54 = vector.broadcast %1 : vector<1x16xf32> to vector<64x16xf32>
    %55 = arith.addf %53, %54 : vector<64x16xf32>
    %cst_28 = arith.constant 0.000000e+00 : f32
    %56 = vector.broadcast %cst_28 : f32 to vector<64x16xf32>
    %57 = arith.cmpf ogt, %55, %56 : vector<64x16xf32>
    %cst_29 = arith.constant 2.000000e-01 : f32
    %58 = vector.broadcast %cst_29 : f32 to vector<64x16xf32>
    %59 = arith.mulf %58, %55 : vector<64x16xf32>
    %60 = arith.select %57, %55, %59 : vector<64x16xi1>, vector<64x16xf32>
    %61 = vector.extract_strided_slice %60 {offsets = [0, 0], sizes = [8, 16], strides = [1, 1]} : vector<64x16xf32> to vector<8x16xf32>
    %62 = arith.truncf %61 : vector<8x16xf32> to vector<8x16xbf16>
    %c128 = arith.constant 128 : index
    %c0_30 = arith.constant 0 : index
    %63 = vector.load %arg3[%c128, %c0_30] : memref<1024x512xbf16, #tpu.memory_space<vmem>>, vector<16x512xbf16>
    %cst_31 = arith.constant dense<0.000000e+00> : vector<8x512xf32>
    %64 = tpu.matmul %62, %63, %cst_31 {dimension_numbers = #tpu.dot_dimension_numbers<[1], [0], [0], [1], [0, 0, 1, 1], [], []>} : vector<8x16xbf16>, vector<16x512xbf16>, vector<8x512xf32> -> vector<8x512xf32>
    %65 = arith.addf %51, %64 : vector<8x512xf32>
    %66 = vector.extract_strided_slice %60 {offsets = [8, 0], sizes = [8, 16], strides = [1, 1]} : vector<64x16xf32> to vector<8x16xf32>
    %67 = arith.truncf %66 : vector<8x16xf32> to vector<8x16xbf16>
    %c144 = arith.constant 144 : index
    %c0_32 = arith.constant 0 : index
    %68 = vector.load %arg3[%c144, %c0_32] : memref<1024x512xbf16, #tpu.memory_space<vmem>>, vector<16x512xbf16>
    %cst_33 = arith.constant dense<0.000000e+00> : vector<8x512xf32>
    %69 = tpu.matmul %67, %68, %cst_33 {dimension_numbers = #tpu.dot_dimension_numbers<[1], [0], [0], [1], [0, 0, 1, 1], [], []>} : vector<8x16xbf16>, vector<16x512xbf16>, vector<8x512xf32> -> vector<8x512xf32>
    %70 = arith.addf %65, %69 : vector<8x512xf32>
    %71 = vector.extract_strided_slice %60 {offsets = [16, 0], sizes = [8, 16], strides = [1, 1]} : vector<64x16xf32> to vector<8x16xf32>
    %72 = arith.truncf %71 : vector<8x16xf32> to vector<8x16xbf16>
    %c160 = arith.constant 160 : index
    %c0_34 = arith.constant 0 : index
    %73 = vector.load %arg3[%c160, %c0_34] : memref<1024x512xbf16, #tpu.memory_space<vmem>>, vector<16x512xbf16>
    %cst_35 = arith.constant dense<0.000000e+00> : vector<8x512xf32>
    %74 = tpu.matmul %72, %73, %cst_35 {dimension_numbers = #tpu.dot_dimension_numbers<[1], [0], [0], [1], [0, 0, 1, 1], [], []>} : vector<8x16xbf16>, vector<16x512xbf16>, vector<8x512xf32> -> vector<8x512xf32>
    %75 = arith.addf %70, %74 : vector<8x512xf32>
    %76 = vector.extract_strided_slice %60 {offsets = [24, 0], sizes = [8, 16], strides = [1, 1]} : vector<64x16xf32> to vector<8x16xf32>
    %77 = arith.truncf %76 : vector<8x16xf32> to vector<8x16xbf16>
    %c176 = arith.constant 176 : index
    %c0_36 = arith.constant 0 : index
    %78 = vector.load %arg3[%c176, %c0_36] : memref<1024x512xbf16, #tpu.memory_space<vmem>>, vector<16x512xbf16>
    %cst_37 = arith.constant dense<0.000000e+00> : vector<8x512xf32>
    %79 = tpu.matmul %77, %78, %cst_37 {dimension_numbers = #tpu.dot_dimension_numbers<[1], [0], [0], [1], [0, 0, 1, 1], [], []>} : vector<8x16xbf16>, vector<16x512xbf16>, vector<8x512xf32> -> vector<8x512xf32>
    %80 = arith.addf %75, %79 : vector<8x512xf32>
    %81 = vector.extract_strided_slice %60 {offsets = [32, 0], sizes = [8, 16], strides = [1, 1]} : vector<64x16xf32> to vector<8x16xf32>
    %82 = arith.truncf %81 : vector<8x16xf32> to vector<8x16xbf16>
    %c192 = arith.constant 192 : index
    %c0_38 = arith.constant 0 : index
    %83 = vector.load %arg3[%c192, %c0_38] : memref<1024x512xbf16, #tpu.memory_space<vmem>>, vector<16x512xbf16>
    %cst_39 = arith.constant dense<0.000000e+00> : vector<8x512xf32>
    %84 = tpu.matmul %82, %83, %cst_39 {dimension_numbers = #tpu.dot_dimension_numbers<[1], [0], [0], [1], [0, 0, 1, 1], [], []>} : vector<8x16xbf16>, vector<16x512xbf16>, vector<8x512xf32> -> vector<8x512xf32>
    %85 = arith.addf %80, %84 : vector<8x512xf32>
    %86 = vector.extract_strided_slice %60 {offsets = [40, 0], sizes = [8, 16], strides = [1, 1]} : vector<64x16xf32> to vector<8x16xf32>
    %87 = arith.truncf %86 : vector<8x16xf32> to vector<8x16xbf16>
    %c208 = arith.constant 208 : index
    %c0_40 = arith.constant 0 : index
    %88 = vector.load %arg3[%c208, %c0_40] : memref<1024x512xbf16, #tpu.memory_space<vmem>>, vector<16x512xbf16>
    %cst_41 = arith.constant dense<0.000000e+00> : vector<8x512xf32>
    %89 = tpu.matmul %87, %88, %cst_41 {dimension_numbers = #tpu.dot_dimension_numbers<[1], [0], [0], [1], [0, 0, 1, 1], [], []>} : vector<8x16xbf16>, vector<16x512xbf16>, vector<8x512xf32> -> vector<8x512xf32>
    %90 = arith.addf %85, %89 : vector<8x512xf32>
    %91 = vector.extract_strided_slice %60 {offsets = [48, 0], sizes = [8, 16], strides = [1, 1]} : vector<64x16xf32> to vector<8x16xf32>
    %92 = arith.truncf %91 : vector<8x16xf32> to vector<8x16xbf16>
    %c224 = arith.constant 224 : index
    %c0_42 = arith.constant 0 : index
    %93 = vector.load %arg3[%c224, %c0_42] : memref<1024x512xbf16, #tpu.memory_space<vmem>>, vector<16x512xbf16>
    %cst_43 = arith.constant dense<0.000000e+00> : vector<8x512xf32>
    %94 = tpu.matmul %92, %93, %cst_43 {dimension_numbers = #tpu.dot_dimension_numbers<[1], [0], [0], [1], [0, 0, 1, 1], [], []>} : vector<8x16xbf16>, vector<16x512xbf16>, vector<8x512xf32> -> vector<8x512xf32>
    %95 = arith.addf %90, %94 : vector<8x512xf32>
    %96 = vector.extract_strided_slice %60 {offsets = [56, 0], sizes = [8, 16], strides = [1, 1]} : vector<64x16xf32> to vector<8x16xf32>
    %97 = arith.truncf %96 : vector<8x16xf32> to vector<8x16xbf16>
    %c240 = arith.constant 240 : index
    %c0_44 = arith.constant 0 : index
    %98 = vector.load %arg3[%c240, %c0_44] : memref<1024x512xbf16, #tpu.memory_space<vmem>>, vector<16x512xbf16>
    %cst_45 = arith.constant dense<0.000000e+00> : vector<8x512xf32>
    %99 = tpu.matmul %97, %98, %cst_45 {dimension_numbers = #tpu.dot_dimension_numbers<[1], [0], [0], [1], [0, 0, 1, 1], [], []>} : vector<8x16xbf16>, vector<16x512xbf16>, vector<8x512xf32> -> vector<8x512xf32>
    %100 = arith.addf %95, %99 : vector<8x512xf32>
    %c128_46 = arith.constant 128 : index
    %c0_47 = arith.constant 0 : index
    %101 = vector.load %arg0[%c128_46, %c0_47] : memref<512x96xbf16, #tpu.memory_space<vmem>>, vector<64x96xbf16>
    %cst_48 = arith.constant dense<0.000000e+00> : vector<64x16xf32>
    %102 = tpu.matmul %101, %0, %cst_48 {dimension_numbers = #tpu.dot_dimension_numbers<[1], [0], [0], [1], [0, 0, 1, 1], [], []>} : vector<64x96xbf16>, vector<96x16xbf16>, vector<64x16xf32> -> vector<64x16xf32>
    %103 = vector.broadcast %1 : vector<1x16xf32> to vector<64x16xf32>
    %104 = arith.addf %102, %103 : vector<64x16xf32>
    %cst_49 = arith.constant 0.000000e+00 : f32
    %105 = vector.broadcast %cst_49 : f32 to vector<64x16xf32>
    %106 = arith.cmpf ogt, %104, %105 : vector<64x16xf32>
    %cst_50 = arith.constant 2.000000e-01 : f32
    %107 = vector.broadcast %cst_50 : f32 to vector<64x16xf32>
    %108 = arith.mulf %107, %104 : vector<64x16xf32>
    %109 = arith.select %106, %104, %108 : vector<64x16xi1>, vector<64x16xf32>
    %110 = vector.extract_strided_slice %109 {offsets = [0, 0], sizes = [8, 16], strides = [1, 1]} : vector<64x16xf32> to vector<8x16xf32>
    %111 = arith.truncf %110 : vector<8x16xf32> to vector<8x16xbf16>
    %c256 = arith.constant 256 : index
    %c0_51 = arith.constant 0 : index
    %112 = vector.load %arg3[%c256, %c0_51] : memref<1024x512xbf16, #tpu.memory_space<vmem>>, vector<16x512xbf16>
    %cst_52 = arith.constant dense<0.000000e+00> : vector<8x512xf32>
    %113 = tpu.matmul %111, %112, %cst_52 {dimension_numbers = #tpu.dot_dimension_numbers<[1], [0], [0], [1], [0, 0, 1, 1], [], []>} : vector<8x16xbf16>, vector<16x512xbf16>, vector<8x512xf32> -> vector<8x512xf32>
    %114 = arith.addf %100, %113 : vector<8x512xf32>
    %115 = vector.extract_strided_slice %109 {offsets = [8, 0], sizes = [8, 16], strides = [1, 1]} : vector<64x16xf32> to vector<8x16xf32>
    %116 = arith.truncf %115 : vector<8x16xf32> to vector<8x16xbf16>
    %c272 = arith.constant 272 : index
    %c0_53 = arith.constant 0 : index
    %117 = vector.load %arg3[%c272, %c0_53] : memref<1024x512xbf16, #tpu.memory_space<vmem>>, vector<16x512xbf16>
    %cst_54 = arith.constant dense<0.000000e+00> : vector<8x512xf32>
    %118 = tpu.matmul %116, %117, %cst_54 {dimension_numbers = #tpu.dot_dimension_numbers<[1], [0], [0], [1], [0, 0, 1, 1], [], []>} : vector<8x16xbf16>, vector<16x512xbf16>, vector<8x512xf32> -> vector<8x512xf32>
    %119 = arith.addf %114, %118 : vector<8x512xf32>
    %120 = vector.extract_strided_slice %109 {offsets = [16, 0], sizes = [8, 16], strides = [1, 1]} : vector<64x16xf32> to vector<8x16xf32>
    %121 = arith.truncf %120 : vector<8x16xf32> to vector<8x16xbf16>
    %c288 = arith.constant 288 : index
    %c0_55 = arith.constant 0 : index
    %122 = vector.load %arg3[%c288, %c0_55] : memref<1024x512xbf16, #tpu.memory_space<vmem>>, vector<16x512xbf16>
    %cst_56 = arith.constant dense<0.000000e+00> : vector<8x512xf32>
    %123 = tpu.matmul %121, %122, %cst_56 {dimension_numbers = #tpu.dot_dimension_numbers<[1], [0], [0], [1], [0, 0, 1, 1], [], []>} : vector<8x16xbf16>, vector<16x512xbf16>, vector<8x512xf32> -> vector<8x512xf32>
    %124 = arith.addf %119, %123 : vector<8x512xf32>
    %125 = vector.extract_strided_slice %109 {offsets = [24, 0], sizes = [8, 16], strides = [1, 1]} : vector<64x16xf32> to vector<8x16xf32>
    %126 = arith.truncf %125 : vector<8x16xf32> to vector<8x16xbf16>
    %c304 = arith.constant 304 : index
    %c0_57 = arith.constant 0 : index
    %127 = vector.load %arg3[%c304, %c0_57] : memref<1024x512xbf16, #tpu.memory_space<vmem>>, vector<16x512xbf16>
    %cst_58 = arith.constant dense<0.000000e+00> : vector<8x512xf32>
    %128 = tpu.matmul %126, %127, %cst_58 {dimension_numbers = #tpu.dot_dimension_numbers<[1], [0], [0], [1], [0, 0, 1, 1], [], []>} : vector<8x16xbf16>, vector<16x512xbf16>, vector<8x512xf32> -> vector<8x512xf32>
    %129 = arith.addf %124, %128 : vector<8x512xf32>
    %130 = vector.extract_strided_slice %109 {offsets = [32, 0], sizes = [8, 16], strides = [1, 1]} : vector<64x16xf32> to vector<8x16xf32>
    %131 = arith.truncf %130 : vector<8x16xf32> to vector<8x16xbf16>
    %c320 = arith.constant 320 : index
    %c0_59 = arith.constant 0 : index
    %132 = vector.load %arg3[%c320, %c0_59] : memref<1024x512xbf16, #tpu.memory_space<vmem>>, vector<16x512xbf16>
    %cst_60 = arith.constant dense<0.000000e+00> : vector<8x512xf32>
    %133 = tpu.matmul %131, %132, %cst_60 {dimension_numbers = #tpu.dot_dimension_numbers<[1], [0], [0], [1], [0, 0, 1, 1], [], []>} : vector<8x16xbf16>, vector<16x512xbf16>, vector<8x512xf32> -> vector<8x512xf32>
    %134 = arith.addf %129, %133 : vector<8x512xf32>
    %135 = vector.extract_strided_slice %109 {offsets = [40, 0], sizes = [8, 16], strides = [1, 1]} : vector<64x16xf32> to vector<8x16xf32>
    %136 = arith.truncf %135 : vector<8x16xf32> to vector<8x16xbf16>
    %c336 = arith.constant 336 : index
    %c0_61 = arith.constant 0 : index
    %137 = vector.load %arg3[%c336, %c0_61] : memref<1024x512xbf16, #tpu.memory_space<vmem>>, vector<16x512xbf16>
    %cst_62 = arith.constant dense<0.000000e+00> : vector<8x512xf32>
    %138 = tpu.matmul %136, %137, %cst_62 {dimension_numbers = #tpu.dot_dimension_numbers<[1], [0], [0], [1], [0, 0, 1, 1], [], []>} : vector<8x16xbf16>, vector<16x512xbf16>, vector<8x512xf32> -> vector<8x512xf32>
    %139 = arith.addf %134, %138 : vector<8x512xf32>
    %140 = vector.extract_strided_slice %109 {offsets = [48, 0], sizes = [8, 16], strides = [1, 1]} : vector<64x16xf32> to vector<8x16xf32>
    %141 = arith.truncf %140 : vector<8x16xf32> to vector<8x16xbf16>
    %c352 = arith.constant 352 : index
    %c0_63 = arith.constant 0 : index
    %142 = vector.load %arg3[%c352, %c0_63] : memref<1024x512xbf16, #tpu.memory_space<vmem>>, vector<16x512xbf16>
    %cst_64 = arith.constant dense<0.000000e+00> : vector<8x512xf32>
    %143 = tpu.matmul %141, %142, %cst_64 {dimension_numbers = #tpu.dot_dimension_numbers<[1], [0], [0], [1], [0, 0, 1, 1], [], []>} : vector<8x16xbf16>, vector<16x512xbf16>, vector<8x512xf32> -> vector<8x512xf32>
    %144 = arith.addf %139, %143 : vector<8x512xf32>
    %145 = vector.extract_strided_slice %109 {offsets = [56, 0], sizes = [8, 16], strides = [1, 1]} : vector<64x16xf32> to vector<8x16xf32>
    %146 = arith.truncf %145 : vector<8x16xf32> to vector<8x16xbf16>
    %c368 = arith.constant 368 : index
    %c0_65 = arith.constant 0 : index
    %147 = vector.load %arg3[%c368, %c0_65] : memref<1024x512xbf16, #tpu.memory_space<vmem>>, vector<16x512xbf16>
    %cst_66 = arith.constant dense<0.000000e+00> : vector<8x512xf32>
    %148 = tpu.matmul %146, %147, %cst_66 {dimension_numbers = #tpu.dot_dimension_numbers<[1], [0], [0], [1], [0, 0, 1, 1], [], []>} : vector<8x16xbf16>, vector<16x512xbf16>, vector<8x512xf32> -> vector<8x512xf32>
    %149 = arith.addf %144, %148 : vector<8x512xf32>
    %c192_67 = arith.constant 192 : index
    %c0_68 = arith.constant 0 : index
    %150 = vector.load %arg0[%c192_67, %c0_68] : memref<512x96xbf16, #tpu.memory_space<vmem>>, vector<64x96xbf16>
    %cst_69 = arith.constant dense<0.000000e+00> : vector<64x16xf32>
    %151 = tpu.matmul %150, %0, %cst_69 {dimension_numbers = #tpu.dot_dimension_numbers<[1], [0], [0], [1], [0, 0, 1, 1], [], []>} : vector<64x96xbf16>, vector<96x16xbf16>, vector<64x16xf32> -> vector<64x16xf32>
    %152 = vector.broadcast %1 : vector<1x16xf32> to vector<64x16xf32>
    %153 = arith.addf %151, %152 : vector<64x16xf32>
    %cst_70 = arith.constant 0.000000e+00 : f32
    %154 = vector.broadcast %cst_70 : f32 to vector<64x16xf32>
    %155 = arith.cmpf ogt, %153, %154 : vector<64x16xf32>
    %cst_71 = arith.constant 2.000000e-01 : f32
    %156 = vector.broadcast %cst_71 : f32 to vector<64x16xf32>
    %157 = arith.mulf %156, %153 : vector<64x16xf32>
    %158 = arith.select %155, %153, %157 : vector<64x16xi1>, vector<64x16xf32>
    %159 = vector.extract_strided_slice %158 {offsets = [0, 0], sizes = [8, 16], strides = [1, 1]} : vector<64x16xf32> to vector<8x16xf32>
    %160 = arith.truncf %159 : vector<8x16xf32> to vector<8x16xbf16>
    %c384 = arith.constant 384 : index
    %c0_72 = arith.constant 0 : index
    %161 = vector.load %arg3[%c384, %c0_72] : memref<1024x512xbf16, #tpu.memory_space<vmem>>, vector<16x512xbf16>
    %cst_73 = arith.constant dense<0.000000e+00> : vector<8x512xf32>
    %162 = tpu.matmul %160, %161, %cst_73 {dimension_numbers = #tpu.dot_dimension_numbers<[1], [0], [0], [1], [0, 0, 1, 1], [], []>} : vector<8x16xbf16>, vector<16x512xbf16>, vector<8x512xf32> -> vector<8x512xf32>
    %163 = arith.addf %149, %162 : vector<8x512xf32>
    %164 = vector.extract_strided_slice %158 {offsets = [8, 0], sizes = [8, 16], strides = [1, 1]} : vector<64x16xf32> to vector<8x16xf32>
    %165 = arith.truncf %164 : vector<8x16xf32> to vector<8x16xbf16>
    %c400 = arith.constant 400 : index
    %c0_74 = arith.constant 0 : index
    %166 = vector.load %arg3[%c400, %c0_74] : memref<1024x512xbf16, #tpu.memory_space<vmem>>, vector<16x512xbf16>
    %cst_75 = arith.constant dense<0.000000e+00> : vector<8x512xf32>
    %167 = tpu.matmul %165, %166, %cst_75 {dimension_numbers = #tpu.dot_dimension_numbers<[1], [0], [0], [1], [0, 0, 1, 1], [], []>} : vector<8x16xbf16>, vector<16x512xbf16>, vector<8x512xf32> -> vector<8x512xf32>
    %168 = arith.addf %163, %167 : vector<8x512xf32>
    %169 = vector.extract_strided_slice %158 {offsets = [16, 0], sizes = [8, 16], strides = [1, 1]} : vector<64x16xf32> to vector<8x16xf32>
    %170 = arith.truncf %169 : vector<8x16xf32> to vector<8x16xbf16>
    %c416 = arith.constant 416 : index
    %c0_76 = arith.constant 0 : index
    %171 = vector.load %arg3[%c416, %c0_76] : memref<1024x512xbf16, #tpu.memory_space<vmem>>, vector<16x512xbf16>
    %cst_77 = arith.constant dense<0.000000e+00> : vector<8x512xf32>
    %172 = tpu.matmul %170, %171, %cst_77 {dimension_numbers = #tpu.dot_dimension_numbers<[1], [0], [0], [1], [0, 0, 1, 1], [], []>} : vector<8x16xbf16>, vector<16x512xbf16>, vector<8x512xf32> -> vector<8x512xf32>
    %173 = arith.addf %168, %172 : vector<8x512xf32>
    %174 = vector.extract_strided_slice %158 {offsets = [24, 0], sizes = [8, 16], strides = [1, 1]} : vector<64x16xf32> to vector<8x16xf32>
    %175 = arith.truncf %174 : vector<8x16xf32> to vector<8x16xbf16>
    %c432 = arith.constant 432 : index
    %c0_78 = arith.constant 0 : index
    %176 = vector.load %arg3[%c432, %c0_78] : memref<1024x512xbf16, #tpu.memory_space<vmem>>, vector<16x512xbf16>
    %cst_79 = arith.constant dense<0.000000e+00> : vector<8x512xf32>
    %177 = tpu.matmul %175, %176, %cst_79 {dimension_numbers = #tpu.dot_dimension_numbers<[1], [0], [0], [1], [0, 0, 1, 1], [], []>} : vector<8x16xbf16>, vector<16x512xbf16>, vector<8x512xf32> -> vector<8x512xf32>
    %178 = arith.addf %173, %177 : vector<8x512xf32>
    %179 = vector.extract_strided_slice %158 {offsets = [32, 0], sizes = [8, 16], strides = [1, 1]} : vector<64x16xf32> to vector<8x16xf32>
    %180 = arith.truncf %179 : vector<8x16xf32> to vector<8x16xbf16>
    %c448 = arith.constant 448 : index
    %c0_80 = arith.constant 0 : index
    %181 = vector.load %arg3[%c448, %c0_80] : memref<1024x512xbf16, #tpu.memory_space<vmem>>, vector<16x512xbf16>
    %cst_81 = arith.constant dense<0.000000e+00> : vector<8x512xf32>
    %182 = tpu.matmul %180, %181, %cst_81 {dimension_numbers = #tpu.dot_dimension_numbers<[1], [0], [0], [1], [0, 0, 1, 1], [], []>} : vector<8x16xbf16>, vector<16x512xbf16>, vector<8x512xf32> -> vector<8x512xf32>
    %183 = arith.addf %178, %182 : vector<8x512xf32>
    %184 = vector.extract_strided_slice %158 {offsets = [40, 0], sizes = [8, 16], strides = [1, 1]} : vector<64x16xf32> to vector<8x16xf32>
    %185 = arith.truncf %184 : vector<8x16xf32> to vector<8x16xbf16>
    %c464 = arith.constant 464 : index
    %c0_82 = arith.constant 0 : index
    %186 = vector.load %arg3[%c464, %c0_82] : memref<1024x512xbf16, #tpu.memory_space<vmem>>, vector<16x512xbf16>
    %cst_83 = arith.constant dense<0.000000e+00> : vector<8x512xf32>
    %187 = tpu.matmul %185, %186, %cst_83 {dimension_numbers = #tpu.dot_dimension_numbers<[1], [0], [0], [1], [0, 0, 1, 1], [], []>} : vector<8x16xbf16>, vector<16x512xbf16>, vector<8x512xf32> -> vector<8x512xf32>
    %188 = arith.addf %183, %187 : vector<8x512xf32>
    %189 = vector.extract_strided_slice %158 {offsets = [48, 0], sizes = [8, 16], strides = [1, 1]} : vector<64x16xf32> to vector<8x16xf32>
    %190 = arith.truncf %189 : vector<8x16xf32> to vector<8x16xbf16>
    %c480 = arith.constant 480 : index
    %c0_84 = arith.constant 0 : index
    %191 = vector.load %arg3[%c480, %c0_84] : memref<1024x512xbf16, #tpu.memory_space<vmem>>, vector<16x512xbf16>
    %cst_85 = arith.constant dense<0.000000e+00> : vector<8x512xf32>
    %192 = tpu.matmul %190, %191, %cst_85 {dimension_numbers = #tpu.dot_dimension_numbers<[1], [0], [0], [1], [0, 0, 1, 1], [], []>} : vector<8x16xbf16>, vector<16x512xbf16>, vector<8x512xf32> -> vector<8x512xf32>
    %193 = arith.addf %188, %192 : vector<8x512xf32>
    %194 = vector.extract_strided_slice %158 {offsets = [56, 0], sizes = [8, 16], strides = [1, 1]} : vector<64x16xf32> to vector<8x16xf32>
    %195 = arith.truncf %194 : vector<8x16xf32> to vector<8x16xbf16>
    %c496 = arith.constant 496 : index
    %c0_86 = arith.constant 0 : index
    %196 = vector.load %arg3[%c496, %c0_86] : memref<1024x512xbf16, #tpu.memory_space<vmem>>, vector<16x512xbf16>
    %cst_87 = arith.constant dense<0.000000e+00> : vector<8x512xf32>
    %197 = tpu.matmul %195, %196, %cst_87 {dimension_numbers = #tpu.dot_dimension_numbers<[1], [0], [0], [1], [0, 0, 1, 1], [], []>} : vector<8x16xbf16>, vector<16x512xbf16>, vector<8x512xf32> -> vector<8x512xf32>
    %198 = arith.addf %193, %197 : vector<8x512xf32>
    %c256_88 = arith.constant 256 : index
    %c0_89 = arith.constant 0 : index
    %199 = vector.load %arg0[%c256_88, %c0_89] : memref<512x96xbf16, #tpu.memory_space<vmem>>, vector<64x96xbf16>
    %cst_90 = arith.constant dense<0.000000e+00> : vector<64x16xf32>
    %200 = tpu.matmul %199, %0, %cst_90 {dimension_numbers = #tpu.dot_dimension_numbers<[1], [0], [0], [1], [0, 0, 1, 1], [], []>} : vector<64x96xbf16>, vector<96x16xbf16>, vector<64x16xf32> -> vector<64x16xf32>
    %201 = vector.broadcast %1 : vector<1x16xf32> to vector<64x16xf32>
    %202 = arith.addf %200, %201 : vector<64x16xf32>
    %cst_91 = arith.constant 0.000000e+00 : f32
    %203 = vector.broadcast %cst_91 : f32 to vector<64x16xf32>
    %204 = arith.cmpf ogt, %202, %203 : vector<64x16xf32>
    %cst_92 = arith.constant 2.000000e-01 : f32
    %205 = vector.broadcast %cst_92 : f32 to vector<64x16xf32>
    %206 = arith.mulf %205, %202 : vector<64x16xf32>
    %207 = arith.select %204, %202, %206 : vector<64x16xi1>, vector<64x16xf32>
    %208 = vector.extract_strided_slice %207 {offsets = [0, 0], sizes = [8, 16], strides = [1, 1]} : vector<64x16xf32> to vector<8x16xf32>
    %209 = arith.truncf %208 : vector<8x16xf32> to vector<8x16xbf16>
    %c512 = arith.constant 512 : index
    %c0_93 = arith.constant 0 : index
    %210 = vector.load %arg3[%c512, %c0_93] : memref<1024x512xbf16, #tpu.memory_space<vmem>>, vector<16x512xbf16>
    %cst_94 = arith.constant dense<0.000000e+00> : vector<8x512xf32>
    %211 = tpu.matmul %209, %210, %cst_94 {dimension_numbers = #tpu.dot_dimension_numbers<[1], [0], [0], [1], [0, 0, 1, 1], [], []>} : vector<8x16xbf16>, vector<16x512xbf16>, vector<8x512xf32> -> vector<8x512xf32>
    %212 = arith.addf %198, %211 : vector<8x512xf32>
    %213 = vector.extract_strided_slice %207 {offsets = [8, 0], sizes = [8, 16], strides = [1, 1]} : vector<64x16xf32> to vector<8x16xf32>
    %214 = arith.truncf %213 : vector<8x16xf32> to vector<8x16xbf16>
    %c528 = arith.constant 528 : index
    %c0_95 = arith.constant 0 : index
    %215 = vector.load %arg3[%c528, %c0_95] : memref<1024x512xbf16, #tpu.memory_space<vmem>>, vector<16x512xbf16>
    %cst_96 = arith.constant dense<0.000000e+00> : vector<8x512xf32>
    %216 = tpu.matmul %214, %215, %cst_96 {dimension_numbers = #tpu.dot_dimension_numbers<[1], [0], [0], [1], [0, 0, 1, 1], [], []>} : vector<8x16xbf16>, vector<16x512xbf16>, vector<8x512xf32> -> vector<8x512xf32>
    %217 = arith.addf %212, %216 : vector<8x512xf32>
    %218 = vector.extract_strided_slice %207 {offsets = [16, 0], sizes = [8, 16], strides = [1, 1]} : vector<64x16xf32> to vector<8x16xf32>
    %219 = arith.truncf %218 : vector<8x16xf32> to vector<8x16xbf16>
    %c544 = arith.constant 544 : index
    %c0_97 = arith.constant 0 : index
    %220 = vector.load %arg3[%c544, %c0_97] : memref<1024x512xbf16, #tpu.memory_space<vmem>>, vector<16x512xbf16>
    %cst_98 = arith.constant dense<0.000000e+00> : vector<8x512xf32>
    %221 = tpu.matmul %219, %220, %cst_98 {dimension_numbers = #tpu.dot_dimension_numbers<[1], [0], [0], [1], [0, 0, 1, 1], [], []>} : vector<8x16xbf16>, vector<16x512xbf16>, vector<8x512xf32> -> vector<8x512xf32>
    %222 = arith.addf %217, %221 : vector<8x512xf32>
    %223 = vector.extract_strided_slice %207 {offsets = [24, 0], sizes = [8, 16], strides = [1, 1]} : vector<64x16xf32> to vector<8x16xf32>
    %224 = arith.truncf %223 : vector<8x16xf32> to vector<8x16xbf16>
    %c560 = arith.constant 560 : index
    %c0_99 = arith.constant 0 : index
    %225 = vector.load %arg3[%c560, %c0_99] : memref<1024x512xbf16, #tpu.memory_space<vmem>>, vector<16x512xbf16>
    %cst_100 = arith.constant dense<0.000000e+00> : vector<8x512xf32>
    %226 = tpu.matmul %224, %225, %cst_100 {dimension_numbers = #tpu.dot_dimension_numbers<[1], [0], [0], [1], [0, 0, 1, 1], [], []>} : vector<8x16xbf16>, vector<16x512xbf16>, vector<8x512xf32> -> vector<8x512xf32>
    %227 = arith.addf %222, %226 : vector<8x512xf32>
    %228 = vector.extract_strided_slice %207 {offsets = [32, 0], sizes = [8, 16], strides = [1, 1]} : vector<64x16xf32> to vector<8x16xf32>
    %229 = arith.truncf %228 : vector<8x16xf32> to vector<8x16xbf16>
    %c576 = arith.constant 576 : index
    %c0_101 = arith.constant 0 : index
    %230 = vector.load %arg3[%c576, %c0_101] : memref<1024x512xbf16, #tpu.memory_space<vmem>>, vector<16x512xbf16>
    %cst_102 = arith.constant dense<0.000000e+00> : vector<8x512xf32>
    %231 = tpu.matmul %229, %230, %cst_102 {dimension_numbers = #tpu.dot_dimension_numbers<[1], [0], [0], [1], [0, 0, 1, 1], [], []>} : vector<8x16xbf16>, vector<16x512xbf16>, vector<8x512xf32> -> vector<8x512xf32>
    %232 = arith.addf %227, %231 : vector<8x512xf32>
    %233 = vector.extract_strided_slice %207 {offsets = [40, 0], sizes = [8, 16], strides = [1, 1]} : vector<64x16xf32> to vector<8x16xf32>
    %234 = arith.truncf %233 : vector<8x16xf32> to vector<8x16xbf16>
    %c592 = arith.constant 592 : index
    %c0_103 = arith.constant 0 : index
    %235 = vector.load %arg3[%c592, %c0_103] : memref<1024x512xbf16, #tpu.memory_space<vmem>>, vector<16x512xbf16>
    %cst_104 = arith.constant dense<0.000000e+00> : vector<8x512xf32>
    %236 = tpu.matmul %234, %235, %cst_104 {dimension_numbers = #tpu.dot_dimension_numbers<[1], [0], [0], [1], [0, 0, 1, 1], [], []>} : vector<8x16xbf16>, vector<16x512xbf16>, vector<8x512xf32> -> vector<8x512xf32>
    %237 = arith.addf %232, %236 : vector<8x512xf32>
    %238 = vector.extract_strided_slice %207 {offsets = [48, 0], sizes = [8, 16], strides = [1, 1]} : vector<64x16xf32> to vector<8x16xf32>
    %239 = arith.truncf %238 : vector<8x16xf32> to vector<8x16xbf16>
    %c608 = arith.constant 608 : index
    %c0_105 = arith.constant 0 : index
    %240 = vector.load %arg3[%c608, %c0_105] : memref<1024x512xbf16, #tpu.memory_space<vmem>>, vector<16x512xbf16>
    %cst_106 = arith.constant dense<0.000000e+00> : vector<8x512xf32>
    %241 = tpu.matmul %239, %240, %cst_106 {dimension_numbers = #tpu.dot_dimension_numbers<[1], [0], [0], [1], [0, 0, 1, 1], [], []>} : vector<8x16xbf16>, vector<16x512xbf16>, vector<8x512xf32> -> vector<8x512xf32>
    %242 = arith.addf %237, %241 : vector<8x512xf32>
    %243 = vector.extract_strided_slice %207 {offsets = [56, 0], sizes = [8, 16], strides = [1, 1]} : vector<64x16xf32> to vector<8x16xf32>
    %244 = arith.truncf %243 : vector<8x16xf32> to vector<8x16xbf16>
    %c624 = arith.constant 624 : index
    %c0_107 = arith.constant 0 : index
    %245 = vector.load %arg3[%c624, %c0_107] : memref<1024x512xbf16, #tpu.memory_space<vmem>>, vector<16x512xbf16>
    %cst_108 = arith.constant dense<0.000000e+00> : vector<8x512xf32>
    %246 = tpu.matmul %244, %245, %cst_108 {dimension_numbers = #tpu.dot_dimension_numbers<[1], [0], [0], [1], [0, 0, 1, 1], [], []>} : vector<8x16xbf16>, vector<16x512xbf16>, vector<8x512xf32> -> vector<8x512xf32>
    %247 = arith.addf %242, %246 : vector<8x512xf32>
    %c320_109 = arith.constant 320 : index
    %c0_110 = arith.constant 0 : index
    %248 = vector.load %arg0[%c320_109, %c0_110] : memref<512x96xbf16, #tpu.memory_space<vmem>>, vector<64x96xbf16>
    %cst_111 = arith.constant dense<0.000000e+00> : vector<64x16xf32>
    %249 = tpu.matmul %248, %0, %cst_111 {dimension_numbers = #tpu.dot_dimension_numbers<[1], [0], [0], [1], [0, 0, 1, 1], [], []>} : vector<64x96xbf16>, vector<96x16xbf16>, vector<64x16xf32> -> vector<64x16xf32>
    %250 = vector.broadcast %1 : vector<1x16xf32> to vector<64x16xf32>
    %251 = arith.addf %249, %250 : vector<64x16xf32>
    %cst_112 = arith.constant 0.000000e+00 : f32
    %252 = vector.broadcast %cst_112 : f32 to vector<64x16xf32>
    %253 = arith.cmpf ogt, %251, %252 : vector<64x16xf32>
    %cst_113 = arith.constant 2.000000e-01 : f32
    %254 = vector.broadcast %cst_113 : f32 to vector<64x16xf32>
    %255 = arith.mulf %254, %251 : vector<64x16xf32>
    %256 = arith.select %253, %251, %255 : vector<64x16xi1>, vector<64x16xf32>
    %257 = vector.extract_strided_slice %256 {offsets = [0, 0], sizes = [8, 16], strides = [1, 1]} : vector<64x16xf32> to vector<8x16xf32>
    %258 = arith.truncf %257 : vector<8x16xf32> to vector<8x16xbf16>
    %c640 = arith.constant 640 : index
    %c0_114 = arith.constant 0 : index
    %259 = vector.load %arg3[%c640, %c0_114] : memref<1024x512xbf16, #tpu.memory_space<vmem>>, vector<16x512xbf16>
    %cst_115 = arith.constant dense<0.000000e+00> : vector<8x512xf32>
    %260 = tpu.matmul %258, %259, %cst_115 {dimension_numbers = #tpu.dot_dimension_numbers<[1], [0], [0], [1], [0, 0, 1, 1], [], []>} : vector<8x16xbf16>, vector<16x512xbf16>, vector<8x512xf32> -> vector<8x512xf32>
    %261 = arith.addf %247, %260 : vector<8x512xf32>
    %262 = vector.extract_strided_slice %256 {offsets = [8, 0], sizes = [8, 16], strides = [1, 1]} : vector<64x16xf32> to vector<8x16xf32>
    %263 = arith.truncf %262 : vector<8x16xf32> to vector<8x16xbf16>
    %c656 = arith.constant 656 : index
    %c0_116 = arith.constant 0 : index
    %264 = vector.load %arg3[%c656, %c0_116] : memref<1024x512xbf16, #tpu.memory_space<vmem>>, vector<16x512xbf16>
    %cst_117 = arith.constant dense<0.000000e+00> : vector<8x512xf32>
    %265 = tpu.matmul %263, %264, %cst_117 {dimension_numbers = #tpu.dot_dimension_numbers<[1], [0], [0], [1], [0, 0, 1, 1], [], []>} : vector<8x16xbf16>, vector<16x512xbf16>, vector<8x512xf32> -> vector<8x512xf32>
    %266 = arith.addf %261, %265 : vector<8x512xf32>
    %267 = vector.extract_strided_slice %256 {offsets = [16, 0], sizes = [8, 16], strides = [1, 1]} : vector<64x16xf32> to vector<8x16xf32>
    %268 = arith.truncf %267 : vector<8x16xf32> to vector<8x16xbf16>
    %c672 = arith.constant 672 : index
    %c0_118 = arith.constant 0 : index
    %269 = vector.load %arg3[%c672, %c0_118] : memref<1024x512xbf16, #tpu.memory_space<vmem>>, vector<16x512xbf16>
    %cst_119 = arith.constant dense<0.000000e+00> : vector<8x512xf32>
    %270 = tpu.matmul %268, %269, %cst_119 {dimension_numbers = #tpu.dot_dimension_numbers<[1], [0], [0], [1], [0, 0, 1, 1], [], []>} : vector<8x16xbf16>, vector<16x512xbf16>, vector<8x512xf32> -> vector<8x512xf32>
    %271 = arith.addf %266, %270 : vector<8x512xf32>
    %272 = vector.extract_strided_slice %256 {offsets = [24, 0], sizes = [8, 16], strides = [1, 1]} : vector<64x16xf32> to vector<8x16xf32>
    %273 = arith.truncf %272 : vector<8x16xf32> to vector<8x16xbf16>
    %c688 = arith.constant 688 : index
    %c0_120 = arith.constant 0 : index
    %274 = vector.load %arg3[%c688, %c0_120] : memref<1024x512xbf16, #tpu.memory_space<vmem>>, vector<16x512xbf16>
    %cst_121 = arith.constant dense<0.000000e+00> : vector<8x512xf32>
    %275 = tpu.matmul %273, %274, %cst_121 {dimension_numbers = #tpu.dot_dimension_numbers<[1], [0], [0], [1], [0, 0, 1, 1], [], []>} : vector<8x16xbf16>, vector<16x512xbf16>, vector<8x512xf32> -> vector<8x512xf32>
    %276 = arith.addf %271, %275 : vector<8x512xf32>
    %277 = vector.extract_strided_slice %256 {offsets = [32, 0], sizes = [8, 16], strides = [1, 1]} : vector<64x16xf32> to vector<8x16xf32>
    %278 = arith.truncf %277 : vector<8x16xf32> to vector<8x16xbf16>
    %c704 = arith.constant 704 : index
    %c0_122 = arith.constant 0 : index
    %279 = vector.load %arg3[%c704, %c0_122] : memref<1024x512xbf16, #tpu.memory_space<vmem>>, vector<16x512xbf16>
    %cst_123 = arith.constant dense<0.000000e+00> : vector<8x512xf32>
    %280 = tpu.matmul %278, %279, %cst_123 {dimension_numbers = #tpu.dot_dimension_numbers<[1], [0], [0], [1], [0, 0, 1, 1], [], []>} : vector<8x16xbf16>, vector<16x512xbf16>, vector<8x512xf32> -> vector<8x512xf32>
    %281 = arith.addf %276, %280 : vector<8x512xf32>
    %282 = vector.extract_strided_slice %256 {offsets = [40, 0], sizes = [8, 16], strides = [1, 1]} : vector<64x16xf32> to vector<8x16xf32>
    %283 = arith.truncf %282 : vector<8x16xf32> to vector<8x16xbf16>
    %c720 = arith.constant 720 : index
    %c0_124 = arith.constant 0 : index
    %284 = vector.load %arg3[%c720, %c0_124] : memref<1024x512xbf16, #tpu.memory_space<vmem>>, vector<16x512xbf16>
    %cst_125 = arith.constant dense<0.000000e+00> : vector<8x512xf32>
    %285 = tpu.matmul %283, %284, %cst_125 {dimension_numbers = #tpu.dot_dimension_numbers<[1], [0], [0], [1], [0, 0, 1, 1], [], []>} : vector<8x16xbf16>, vector<16x512xbf16>, vector<8x512xf32> -> vector<8x512xf32>
    %286 = arith.addf %281, %285 : vector<8x512xf32>
    %287 = vector.extract_strided_slice %256 {offsets = [48, 0], sizes = [8, 16], strides = [1, 1]} : vector<64x16xf32> to vector<8x16xf32>
    %288 = arith.truncf %287 : vector<8x16xf32> to vector<8x16xbf16>
    %c736 = arith.constant 736 : index
    %c0_126 = arith.constant 0 : index
    %289 = vector.load %arg3[%c736, %c0_126] : memref<1024x512xbf16, #tpu.memory_space<vmem>>, vector<16x512xbf16>
    %cst_127 = arith.constant dense<0.000000e+00> : vector<8x512xf32>
    %290 = tpu.matmul %288, %289, %cst_127 {dimension_numbers = #tpu.dot_dimension_numbers<[1], [0], [0], [1], [0, 0, 1, 1], [], []>} : vector<8x16xbf16>, vector<16x512xbf16>, vector<8x512xf32> -> vector<8x512xf32>
    %291 = arith.addf %286, %290 : vector<8x512xf32>
    %292 = vector.extract_strided_slice %256 {offsets = [56, 0], sizes = [8, 16], strides = [1, 1]} : vector<64x16xf32> to vector<8x16xf32>
    %293 = arith.truncf %292 : vector<8x16xf32> to vector<8x16xbf16>
    %c752 = arith.constant 752 : index
    %c0_128 = arith.constant 0 : index
    %294 = vector.load %arg3[%c752, %c0_128] : memref<1024x512xbf16, #tpu.memory_space<vmem>>, vector<16x512xbf16>
    %cst_129 = arith.constant dense<0.000000e+00> : vector<8x512xf32>
    %295 = tpu.matmul %293, %294, %cst_129 {dimension_numbers = #tpu.dot_dimension_numbers<[1], [0], [0], [1], [0, 0, 1, 1], [], []>} : vector<8x16xbf16>, vector<16x512xbf16>, vector<8x512xf32> -> vector<8x512xf32>
    %296 = arith.addf %291, %295 : vector<8x512xf32>
    %c384_130 = arith.constant 384 : index
    %c0_131 = arith.constant 0 : index
    %297 = vector.load %arg0[%c384_130, %c0_131] : memref<512x96xbf16, #tpu.memory_space<vmem>>, vector<64x96xbf16>
    %cst_132 = arith.constant dense<0.000000e+00> : vector<64x16xf32>
    %298 = tpu.matmul %297, %0, %cst_132 {dimension_numbers = #tpu.dot_dimension_numbers<[1], [0], [0], [1], [0, 0, 1, 1], [], []>} : vector<64x96xbf16>, vector<96x16xbf16>, vector<64x16xf32> -> vector<64x16xf32>
    %299 = vector.broadcast %1 : vector<1x16xf32> to vector<64x16xf32>
    %300 = arith.addf %298, %299 : vector<64x16xf32>
    %cst_133 = arith.constant 0.000000e+00 : f32
    %301 = vector.broadcast %cst_133 : f32 to vector<64x16xf32>
    %302 = arith.cmpf ogt, %300, %301 : vector<64x16xf32>
    %cst_134 = arith.constant 2.000000e-01 : f32
    %303 = vector.broadcast %cst_134 : f32 to vector<64x16xf32>
    %304 = arith.mulf %303, %300 : vector<64x16xf32>
    %305 = arith.select %302, %300, %304 : vector<64x16xi1>, vector<64x16xf32>
    %306 = vector.extract_strided_slice %305 {offsets = [0, 0], sizes = [8, 16], strides = [1, 1]} : vector<64x16xf32> to vector<8x16xf32>
    %307 = arith.truncf %306 : vector<8x16xf32> to vector<8x16xbf16>
    %c768 = arith.constant 768 : index
    %c0_135 = arith.constant 0 : index
    %308 = vector.load %arg3[%c768, %c0_135] : memref<1024x512xbf16, #tpu.memory_space<vmem>>, vector<16x512xbf16>
    %cst_136 = arith.constant dense<0.000000e+00> : vector<8x512xf32>
    %309 = tpu.matmul %307, %308, %cst_136 {dimension_numbers = #tpu.dot_dimension_numbers<[1], [0], [0], [1], [0, 0, 1, 1], [], []>} : vector<8x16xbf16>, vector<16x512xbf16>, vector<8x512xf32> -> vector<8x512xf32>
    %310 = arith.addf %296, %309 : vector<8x512xf32>
    %311 = vector.extract_strided_slice %305 {offsets = [8, 0], sizes = [8, 16], strides = [1, 1]} : vector<64x16xf32> to vector<8x16xf32>
    %312 = arith.truncf %311 : vector<8x16xf32> to vector<8x16xbf16>
    %c784 = arith.constant 784 : index
    %c0_137 = arith.constant 0 : index
    %313 = vector.load %arg3[%c784, %c0_137] : memref<1024x512xbf16, #tpu.memory_space<vmem>>, vector<16x512xbf16>
    %cst_138 = arith.constant dense<0.000000e+00> : vector<8x512xf32>
    %314 = tpu.matmul %312, %313, %cst_138 {dimension_numbers = #tpu.dot_dimension_numbers<[1], [0], [0], [1], [0, 0, 1, 1], [], []>} : vector<8x16xbf16>, vector<16x512xbf16>, vector<8x512xf32> -> vector<8x512xf32>
    %315 = arith.addf %310, %314 : vector<8x512xf32>
    %316 = vector.extract_strided_slice %305 {offsets = [16, 0], sizes = [8, 16], strides = [1, 1]} : vector<64x16xf32> to vector<8x16xf32>
    %317 = arith.truncf %316 : vector<8x16xf32> to vector<8x16xbf16>
    %c800 = arith.constant 800 : index
    %c0_139 = arith.constant 0 : index
    %318 = vector.load %arg3[%c800, %c0_139] : memref<1024x512xbf16, #tpu.memory_space<vmem>>, vector<16x512xbf16>
    %cst_140 = arith.constant dense<0.000000e+00> : vector<8x512xf32>
    %319 = tpu.matmul %317, %318, %cst_140 {dimension_numbers = #tpu.dot_dimension_numbers<[1], [0], [0], [1], [0, 0, 1, 1], [], []>} : vector<8x16xbf16>, vector<16x512xbf16>, vector<8x512xf32> -> vector<8x512xf32>
    %320 = arith.addf %315, %319 : vector<8x512xf32>
    %321 = vector.extract_strided_slice %305 {offsets = [24, 0], sizes = [8, 16], strides = [1, 1]} : vector<64x16xf32> to vector<8x16xf32>
    %322 = arith.truncf %321 : vector<8x16xf32> to vector<8x16xbf16>
    %c816 = arith.constant 816 : index
    %c0_141 = arith.constant 0 : index
    %323 = vector.load %arg3[%c816, %c0_141] : memref<1024x512xbf16, #tpu.memory_space<vmem>>, vector<16x512xbf16>
    %cst_142 = arith.constant dense<0.000000e+00> : vector<8x512xf32>
    %324 = tpu.matmul %322, %323, %cst_142 {dimension_numbers = #tpu.dot_dimension_numbers<[1], [0], [0], [1], [0, 0, 1, 1], [], []>} : vector<8x16xbf16>, vector<16x512xbf16>, vector<8x512xf32> -> vector<8x512xf32>
    %325 = arith.addf %320, %324 : vector<8x512xf32>
    %326 = vector.extract_strided_slice %305 {offsets = [32, 0], sizes = [8, 16], strides = [1, 1]} : vector<64x16xf32> to vector<8x16xf32>
    %327 = arith.truncf %326 : vector<8x16xf32> to vector<8x16xbf16>
    %c832 = arith.constant 832 : index
    %c0_143 = arith.constant 0 : index
    %328 = vector.load %arg3[%c832, %c0_143] : memref<1024x512xbf16, #tpu.memory_space<vmem>>, vector<16x512xbf16>
    %cst_144 = arith.constant dense<0.000000e+00> : vector<8x512xf32>
    %329 = tpu.matmul %327, %328, %cst_144 {dimension_numbers = #tpu.dot_dimension_numbers<[1], [0], [0], [1], [0, 0, 1, 1], [], []>} : vector<8x16xbf16>, vector<16x512xbf16>, vector<8x512xf32> -> vector<8x512xf32>
    %330 = arith.addf %325, %329 : vector<8x512xf32>
    %331 = vector.extract_strided_slice %305 {offsets = [40, 0], sizes = [8, 16], strides = [1, 1]} : vector<64x16xf32> to vector<8x16xf32>
    %332 = arith.truncf %331 : vector<8x16xf32> to vector<8x16xbf16>
    %c848 = arith.constant 848 : index
    %c0_145 = arith.constant 0 : index
    %333 = vector.load %arg3[%c848, %c0_145] : memref<1024x512xbf16, #tpu.memory_space<vmem>>, vector<16x512xbf16>
    %cst_146 = arith.constant dense<0.000000e+00> : vector<8x512xf32>
    %334 = tpu.matmul %332, %333, %cst_146 {dimension_numbers = #tpu.dot_dimension_numbers<[1], [0], [0], [1], [0, 0, 1, 1], [], []>} : vector<8x16xbf16>, vector<16x512xbf16>, vector<8x512xf32> -> vector<8x512xf32>
    %335 = arith.addf %330, %334 : vector<8x512xf32>
    %336 = vector.extract_strided_slice %305 {offsets = [48, 0], sizes = [8, 16], strides = [1, 1]} : vector<64x16xf32> to vector<8x16xf32>
    %337 = arith.truncf %336 : vector<8x16xf32> to vector<8x16xbf16>
    %c864 = arith.constant 864 : index
    %c0_147 = arith.constant 0 : index
    %338 = vector.load %arg3[%c864, %c0_147] : memref<1024x512xbf16, #tpu.memory_space<vmem>>, vector<16x512xbf16>
    %cst_148 = arith.constant dense<0.000000e+00> : vector<8x512xf32>
    %339 = tpu.matmul %337, %338, %cst_148 {dimension_numbers = #tpu.dot_dimension_numbers<[1], [0], [0], [1], [0, 0, 1, 1], [], []>} : vector<8x16xbf16>, vector<16x512xbf16>, vector<8x512xf32> -> vector<8x512xf32>
    %340 = arith.addf %335, %339 : vector<8x512xf32>
    %341 = vector.extract_strided_slice %305 {offsets = [56, 0], sizes = [8, 16], strides = [1, 1]} : vector<64x16xf32> to vector<8x16xf32>
    %342 = arith.truncf %341 : vector<8x16xf32> to vector<8x16xbf16>
    %c880 = arith.constant 880 : index
    %c0_149 = arith.constant 0 : index
    %343 = vector.load %arg3[%c880, %c0_149] : memref<1024x512xbf16, #tpu.memory_space<vmem>>, vector<16x512xbf16>
    %cst_150 = arith.constant dense<0.000000e+00> : vector<8x512xf32>
    %344 = tpu.matmul %342, %343, %cst_150 {dimension_numbers = #tpu.dot_dimension_numbers<[1], [0], [0], [1], [0, 0, 1, 1], [], []>} : vector<8x16xbf16>, vector<16x512xbf16>, vector<8x512xf32> -> vector<8x512xf32>
    %345 = arith.addf %340, %344 : vector<8x512xf32>
    %c448_151 = arith.constant 448 : index
    %c0_152 = arith.constant 0 : index
    %346 = vector.load %arg0[%c448_151, %c0_152] : memref<512x96xbf16, #tpu.memory_space<vmem>>, vector<64x96xbf16>
    %cst_153 = arith.constant dense<0.000000e+00> : vector<64x16xf32>
    %347 = tpu.matmul %346, %0, %cst_153 {dimension_numbers = #tpu.dot_dimension_numbers<[1], [0], [0], [1], [0, 0, 1, 1], [], []>} : vector<64x96xbf16>, vector<96x16xbf16>, vector<64x16xf32> -> vector<64x16xf32>
    %348 = vector.broadcast %1 : vector<1x16xf32> to vector<64x16xf32>
    %349 = arith.addf %347, %348 : vector<64x16xf32>
    %cst_154 = arith.constant 0.000000e+00 : f32
    %350 = vector.broadcast %cst_154 : f32 to vector<64x16xf32>
    %351 = arith.cmpf ogt, %349, %350 : vector<64x16xf32>
    %cst_155 = arith.constant 2.000000e-01 : f32
    %352 = vector.broadcast %cst_155 : f32 to vector<64x16xf32>
    %353 = arith.mulf %352, %349 : vector<64x16xf32>
    %354 = arith.select %351, %349, %353 : vector<64x16xi1>, vector<64x16xf32>
    %355 = vector.extract_strided_slice %354 {offsets = [0, 0], sizes = [8, 16], strides = [1, 1]} : vector<64x16xf32> to vector<8x16xf32>
    %356 = arith.truncf %355 : vector<8x16xf32> to vector<8x16xbf16>
    %c896 = arith.constant 896 : index
    %c0_156 = arith.constant 0 : index
    %357 = vector.load %arg3[%c896, %c0_156] : memref<1024x512xbf16, #tpu.memory_space<vmem>>, vector<16x512xbf16>
    %cst_157 = arith.constant dense<0.000000e+00> : vector<8x512xf32>
    %358 = tpu.matmul %356, %357, %cst_157 {dimension_numbers = #tpu.dot_dimension_numbers<[1], [0], [0], [1], [0, 0, 1, 1], [], []>} : vector<8x16xbf16>, vector<16x512xbf16>, vector<8x512xf32> -> vector<8x512xf32>
    %359 = arith.addf %345, %358 : vector<8x512xf32>
    %360 = vector.extract_strided_slice %354 {offsets = [8, 0], sizes = [8, 16], strides = [1, 1]} : vector<64x16xf32> to vector<8x16xf32>
    %361 = arith.truncf %360 : vector<8x16xf32> to vector<8x16xbf16>
    %c912 = arith.constant 912 : index
    %c0_158 = arith.constant 0 : index
    %362 = vector.load %arg3[%c912, %c0_158] : memref<1024x512xbf16, #tpu.memory_space<vmem>>, vector<16x512xbf16>
    %cst_159 = arith.constant dense<0.000000e+00> : vector<8x512xf32>
    %363 = tpu.matmul %361, %362, %cst_159 {dimension_numbers = #tpu.dot_dimension_numbers<[1], [0], [0], [1], [0, 0, 1, 1], [], []>} : vector<8x16xbf16>, vector<16x512xbf16>, vector<8x512xf32> -> vector<8x512xf32>
    %364 = arith.addf %359, %363 : vector<8x512xf32>
    %365 = vector.extract_strided_slice %354 {offsets = [16, 0], sizes = [8, 16], strides = [1, 1]} : vector<64x16xf32> to vector<8x16xf32>
    %366 = arith.truncf %365 : vector<8x16xf32> to vector<8x16xbf16>
    %c928 = arith.constant 928 : index
    %c0_160 = arith.constant 0 : index
    %367 = vector.load %arg3[%c928, %c0_160] : memref<1024x512xbf16, #tpu.memory_space<vmem>>, vector<16x512xbf16>
    %cst_161 = arith.constant dense<0.000000e+00> : vector<8x512xf32>
    %368 = tpu.matmul %366, %367, %cst_161 {dimension_numbers = #tpu.dot_dimension_numbers<[1], [0], [0], [1], [0, 0, 1, 1], [], []>} : vector<8x16xbf16>, vector<16x512xbf16>, vector<8x512xf32> -> vector<8x512xf32>
    %369 = arith.addf %364, %368 : vector<8x512xf32>
    %370 = vector.extract_strided_slice %354 {offsets = [24, 0], sizes = [8, 16], strides = [1, 1]} : vector<64x16xf32> to vector<8x16xf32>
    %371 = arith.truncf %370 : vector<8x16xf32> to vector<8x16xbf16>
    %c944 = arith.constant 944 : index
    %c0_162 = arith.constant 0 : index
    %372 = vector.load %arg3[%c944, %c0_162] : memref<1024x512xbf16, #tpu.memory_space<vmem>>, vector<16x512xbf16>
    %cst_163 = arith.constant dense<0.000000e+00> : vector<8x512xf32>
    %373 = tpu.matmul %371, %372, %cst_163 {dimension_numbers = #tpu.dot_dimension_numbers<[1], [0], [0], [1], [0, 0, 1, 1], [], []>} : vector<8x16xbf16>, vector<16x512xbf16>, vector<8x512xf32> -> vector<8x512xf32>
    %374 = arith.addf %369, %373 : vector<8x512xf32>
    %375 = vector.extract_strided_slice %354 {offsets = [32, 0], sizes = [8, 16], strides = [1, 1]} : vector<64x16xf32> to vector<8x16xf32>
    %376 = arith.truncf %375 : vector<8x16xf32> to vector<8x16xbf16>
    %c960 = arith.constant 960 : index
    %c0_164 = arith.constant 0 : index
    %377 = vector.load %arg3[%c960, %c0_164] : memref<1024x512xbf16, #tpu.memory_space<vmem>>, vector<16x512xbf16>
    %cst_165 = arith.constant dense<0.000000e+00> : vector<8x512xf32>
    %378 = tpu.matmul %376, %377, %cst_165 {dimension_numbers = #tpu.dot_dimension_numbers<[1], [0], [0], [1], [0, 0, 1, 1], [], []>} : vector<8x16xbf16>, vector<16x512xbf16>, vector<8x512xf32> -> vector<8x512xf32>
    %379 = arith.addf %374, %378 : vector<8x512xf32>
    %380 = vector.extract_strided_slice %354 {offsets = [40, 0], sizes = [8, 16], strides = [1, 1]} : vector<64x16xf32> to vector<8x16xf32>
    %381 = arith.truncf %380 : vector<8x16xf32> to vector<8x16xbf16>
    %c976 = arith.constant 976 : index
    %c0_166 = arith.constant 0 : index
    %382 = vector.load %arg3[%c976, %c0_166] : memref<1024x512xbf16, #tpu.memory_space<vmem>>, vector<16x512xbf16>
    %cst_167 = arith.constant dense<0.000000e+00> : vector<8x512xf32>
    %383 = tpu.matmul %381, %382, %cst_167 {dimension_numbers = #tpu.dot_dimension_numbers<[1], [0], [0], [1], [0, 0, 1, 1], [], []>} : vector<8x16xbf16>, vector<16x512xbf16>, vector<8x512xf32> -> vector<8x512xf32>
    %384 = arith.addf %379, %383 : vector<8x512xf32>
    %385 = vector.extract_strided_slice %354 {offsets = [48, 0], sizes = [8, 16], strides = [1, 1]} : vector<64x16xf32> to vector<8x16xf32>
    %386 = arith.truncf %385 : vector<8x16xf32> to vector<8x16xbf16>
    %c992 = arith.constant 992 : index
    %c0_168 = arith.constant 0 : index
    %387 = vector.load %arg3[%c992, %c0_168] : memref<1024x512xbf16, #tpu.memory_space<vmem>>, vector<16x512xbf16>
    %cst_169 = arith.constant dense<0.000000e+00> : vector<8x512xf32>
    %388 = tpu.matmul %386, %387, %cst_169 {dimension_numbers = #tpu.dot_dimension_numbers<[1], [0], [0], [1], [0, 0, 1, 1], [], []>} : vector<8x16xbf16>, vector<16x512xbf16>, vector<8x512xf32> -> vector<8x512xf32>
    %389 = arith.addf %384, %388 : vector<8x512xf32>
    %390 = vector.extract_strided_slice %354 {offsets = [56, 0], sizes = [8, 16], strides = [1, 1]} : vector<64x16xf32> to vector<8x16xf32>
    %391 = arith.truncf %390 : vector<8x16xf32> to vector<8x16xbf16>
    %c1008 = arith.constant 1008 : index
    %c0_170 = arith.constant 0 : index
    %392 = vector.load %arg3[%c1008, %c0_170] : memref<1024x512xbf16, #tpu.memory_space<vmem>>, vector<16x512xbf16>
    %cst_171 = arith.constant dense<0.000000e+00> : vector<8x512xf32>
    %393 = tpu.matmul %391, %392, %cst_171 {dimension_numbers = #tpu.dot_dimension_numbers<[1], [0], [0], [1], [0, 0, 1, 1], [], []>} : vector<8x16xbf16>, vector<16x512xbf16>, vector<8x512xf32> -> vector<8x512xf32>
    %394 = arith.addf %389, %393 : vector<8x512xf32>
    %c0_172 = arith.constant 0 : index
    %c0_173 = arith.constant 0 : index
    %395 = vector.load %arg4[%c0_172, %c0_173] : memref<1x512xf32, #tpu.memory_space<vmem>>, vector<1x512xf32>
    %396 = vector.broadcast %395 : vector<1x512xf32> to vector<8x512xf32>
    %397 = arith.addf %394, %396 : vector<8x512xf32>
    %cst_174 = arith.constant 0.000000e+00 : f32
    %398 = vector.broadcast %cst_174 : f32 to vector<8x512xf32>
    %399 = arith.cmpf ogt, %397, %398 : vector<8x512xf32>
    %cst_175 = arith.constant 2.000000e-01 : f32
    %400 = vector.broadcast %cst_175 : f32 to vector<8x512xf32>
    %401 = arith.mulf %400, %397 : vector<8x512xf32>
    %402 = arith.select %399, %397, %401 : vector<8x512xi1>, vector<8x512xf32>
    %c0_176 = arith.constant 0 : index
    %c0_177 = arith.constant 0 : index
    %403 = vector.load %arg5[%c0_176, %c0_177] : memref<1x512xf32, #tpu.memory_space<vmem>>, vector<1x512xf32>
    %404 = vector.broadcast %403 : vector<1x512xf32> to vector<8x512xf32>
    %405 = arith.mulf %402, %404 : vector<8x512xf32>
    %cst_178 = arith.constant dense<0.000000e+00> : vector<8xf32>
    %406 = vector.multi_reduction <add>, %405, %cst_178 [1] : vector<8x512xf32> to vector<8xf32>
    %407 = vector.shape_cast %406 : vector<8xf32> to vector<8x1xf32>
    %c0_179 = arith.constant 0 : index
    %c0_180 = arith.constant 0 : index
    %408 = memref.load %arg6[%c0_179, %c0_180] : memref<1x1xf32, #tpu.memory_space<smem>>
    %409 = vector.extract_strided_slice %407 {offsets = [0, 0], sizes = [2, 1], strides = [1, 1]} : vector<8x1xf32> to vector<2x1xf32>
    %410 = vector.shape_cast %409 : vector<2x1xf32> to vector<1x2x1xf32>
    %cst_181 = arith.constant dense<0.000000e+00> : vector<1xf32>
    %411 = vector.multi_reduction <add>, %410, %cst_181 [1, 2] : vector<1x2x1xf32> to vector<1xf32>
    %412 = vector.shape_cast %411 : vector<1xf32> to vector<1x1x1xf32>
    %413 = vector.extract %412[0, 0, 0] : f32 from vector<1x1x1xf32>
    %cst_182 = arith.constant 5.000000e-01 : f32
    %414 = arith.mulf %413, %cst_182 : f32
    %415 = arith.addf %414, %408 : f32
    %416 = vector.extract_strided_slice %407 {offsets = [2, 0], sizes = [2, 1], strides = [1, 1]} : vector<8x1xf32> to vector<2x1xf32>
    %417 = vector.shape_cast %416 : vector<2x1xf32> to vector<1x2x1xf32>
    %cst_183 = arith.constant dense<0.000000e+00> : vector<1xf32>
    %418 = vector.multi_reduction <add>, %417, %cst_183 [1, 2] : vector<1x2x1xf32> to vector<1xf32>
    %419 = vector.shape_cast %418 : vector<1xf32> to vector<1x1x1xf32>
    %420 = vector.extract %419[0, 0, 0] : f32 from vector<1x1x1xf32>
    %cst_184 = arith.constant 5.000000e-01 : f32
    %421 = arith.mulf %420, %cst_184 : f32
    %422 = arith.addf %421, %408 : f32
    %cst_185 = arith.constant 1.000000e+00 : f32
    %423 = arith.subf %cst_185, %415 : f32
    %cst_186 = arith.constant 0.000000e+00 : f32
    %424 = arith.maximumf %423, %cst_186 : f32
    %cst_187 = arith.constant 1.000000e+00 : f32
    %425 = arith.addf %cst_187, %422 : f32
    %cst_188 = arith.constant 0.000000e+00 : f32
    %426 = arith.maximumf %425, %cst_188 : f32
    %427 = arith.addf %424, %426 : f32
    %cst_189 = arith.constant 0.000000e+00 : f32
    %428 = arith.subf %cst_189, %422 : f32
    %429 = tpu.iota {dimensions = array<i32: 1>} : vector<1x128xi32>
    %c0_i32 = arith.constant 0 : i32
    %430 = vector.broadcast %c0_i32 : i32 to vector<1x128xi32>
    %431 = arith.cmpi eq, %429, %430 : vector<1x128xi32>
    %c1_i32 = arith.constant 1 : i32
    %432 = vector.broadcast %c1_i32 : i32 to vector<1x128xi32>
    %433 = arith.cmpi eq, %429, %432 : vector<1x128xi32>
    %cst_190 = arith.constant 0.000000e+00 : f32
    %434 = vector.broadcast %428 : f32 to vector<1x128xf32>
    %435 = vector.broadcast %cst_190 : f32 to vector<1x128xf32>
    %436 = arith.select %433, %434, %435 : vector<1x128xi1>, vector<1x128xf32>
    %437 = vector.broadcast %427 : f32 to vector<1x128xf32>
    %438 = arith.select %431, %437, %436 : vector<1x128xi1>, vector<1x128xf32>
    %c0_191 = arith.constant 0 : index
    %c0_192 = arith.constant 0 : index
    %439 = vector.load %arg7[%c0_191, %c0_192] : memref<1x128xf32, #tpu.memory_space<vmem>>, vector<1x128xf32>
    tpu.vector_store %arg7[%c0_191, %c0_192], %438 {strides = array<i32>} : memref<1x128xf32, #tpu.memory_space<vmem>>, vector<1x128xf32>,
    return
  }
}

</mosaic_0001>

<bundles_post_ra>
// kernel: loss_doc_forward.1
= control target key start
LH: loop header
LB: loop body
LE: loop exit
PB: predicated region body
PF: predicated region fallthrough
CT: control target
= control target key end

     0   :  { %vm108_vm0 = vcmask 785408   ;;  %vm204_vm2 = vcmask 130048   ;;  %s8072_s27 = smov 0.0   ;;  %s10489_s1 = inlined_call_operand.vmem [shape: bf16[96,16], index: 1, kind: input, shape index: {}]   ;;  %s10490_s2 = inlined_call_operand.vmem [shape: f32[1,16], index: 2, kind: input, shape index: {}]   ;;  %s10491_s0 = inlined_call_operand.vmem [shape: bf16[512,96], index: 0, kind: input, shape index: {}]   ;;  %s10492_s3 = inlined_call_operand.vmem [shape: bf16[1024,512], index: 3, kind: input, shape index: {}]   ;;  %s10493_s4 = inlined_call_operand.vmem [shape: f32[1,512], index: 4, kind: input, shape index: {}]   ;;  %s10494_s5 = inlined_call_operand.vmem [shape: f32[1,512], index: 5, kind: input, shape index: {}]   ;;  %s10495_s6 = inlined_call_operand.<no memory space> [shape: f32[1,1], index: 6, kind: input, shape index: {}]   ;;  %s10496_s7 = inlined_call_operand.vmem [shape: f32[1,128], index: 7, kind: output, shape index: {}]  }
   0x1   :  { %v8116_v0 = vld [vmem:[%s10489_s1 + $0x28] sm:$0xff]  ;;  %v8122_v1 = vld [vmem:[%s10489_s1 + $0x20] sm:$0xff]  ;;  %v8128_v2 = vld [vmem:[%s10489_s1 + $0x18] sm:$0xff] }
   0x2   :  { %123 = vmatpush.bf16.msra.mxu0 %v8116_v0  ;;  %v8134_v3 = vld [vmem:[%s10489_s1 + $0x10] sm:$0xff]  ;;  %v8140_v4 = vld [vmem:[%s10489_s1 + $0x8] sm:$0xff]  ;;  %v8146_v5 = vld [vmem:[%s10489_s1] sm:$0xff] }
   0x3   :  { %v7757_v6 = vld [vmem:[%s10491_s0] sm:$0xff]  ;;  %v7758_v7 = vld [vmem:[%s10491_s0 + $0x8] sm:$0xff]  ;;  %v7759_v8 = vld [vmem:[%s10491_s0 + $0x10] sm:$0xff] }
   0x4   :  { %v7760_v9 = vld [vmem:[%s10491_s0 + $0x18] sm:$0xff]  ;;  %v6333_v10 = vld [vmem:[%s10492_s3 + $0x20] sm:$0xf]  ;;  %v7767_v11 = vld [vmem:[%s10492_s3 + $0x2c] sm:$0xf0] }
   0x5   :  { %v7765_v12 = vld [vmem:[%s10492_s3 + $0x24] sm:$0xf]  ;;  %v6334_v13 = vor.u32 %v7767_v11, %v6333_v10  ;;  %v6335_v14 = vld [vmem:[%s10492_s3 + $0x30] sm:$0xf0]  ;;  %v6341_v15 = vld [vmem:[%s10492_s3 + $0x28] sm:$0xf] }
   0x6   :  { %124 = vmatpush.bf16.msra.mxu0 %v8122_v1  ;;  %v7768_v16 = vld [vmem:[%s10492_s3 + $0x34] sm:$0xf0]  ;;  %v6338_v17 = vor.u32 %v7765_v12, %v6335_v14  ;;  %v6353_v19 = vld [vmem:[%s10492_s3] sm:$0xf]  ;;  %v7763_v20 = vld [vmem:[%s10492_s3 + $0xc] sm:$0xf0] }
   0x7   :  { %v6342_v18 = vor.u32 %v7768_v16, %v6341_v15  ;;  %215 = vmatpush.bf16.msra.mxu1 %v6334_v13  ;;  %v6354_v21 = vor.u32 %v7763_v20, %v6353_v19  ;;  %v7766_v22 = vld [vmem:[%s10492_s3 + $0x2c] sm:$0xf]  ;;  %v6343_v23 = vld [vmem:[%s10492_s3 + $0x38] sm:$0xf0]  ;;  %v7761_v24 = vld [vmem:[%s10492_s3 + $0x4] sm:$0xf] }
   0x8   :  { %228 = vmatpush.bf16.msra.mxu2 %v6338_v17  ;;  %v6346_v25 = vor.u32 %v7766_v22, %v6343_v23  ;;  %v6355_v26 = vld [vmem:[%s10492_s3 + $0x10] sm:$0xf0]  ;;  %v6421_v29 = vld [vmem:[%s10492_s3 + $0x88] sm:$0xf]  ;;  %v7780_v30 = vld [vmem:[%s10492_s3 + $0x94] sm:$0xf0] }
   0x9   :  { %241 = vmatpush.bf16.msra.mxu3 %v6342_v18  ;;  %v6358_v27 = vor.u32 %v7761_v24, %v6355_v26  ;;  %v8210_v31 = vld [vmem:[%s10490_s2] ss:$0 sm:$0xff]  ;;  %v6422_v32 = vor.u32 %v7780_v30, %v6421_v29  ;;  %v7762_v35 = vld [vmem:[%s10492_s3 + $0xc] sm:$0xf]  ;;  %v6363_v36 = vld [vmem:[%s10492_s3 + $0x18] sm:$0xf0] }
   0xa   :  { %125 = vmatpush.bf16.msra.mxu0 %v8128_v2  ;;  %v6361_v37 = vld [vmem:[%s10492_s3 + $0x8] sm:$0xf]  ;;  %v7764_v38 = vld [vmem:[%s10492_s3 + $0x14] sm:$0xf0]  ;;  %v6373_v39 = vld [vmem:[%s10492_s3 + $0x40] sm:$0xf]  ;;  %v6366_v43 = vor.u32 %v7762_v35, %v6363_v36 }
   0xb   :  { %254 = vmatpush.bf16.msrb.mxu1 %v6346_v25  ;;  %v7771_v41 = vld [vmem:[%s10492_s3 + $0x4c] sm:$0xf0]  ;;  %v6362_v45 = vor.u32 %v7764_v38, %v6361_v37  ;;  %v6441_v48 = vld [vmem:[%s10492_s3 + $0xa8] sm:$0xf]  ;;  %v7784_v49 = vld [vmem:[%s10492_s3 + $0xb4] sm:$0xf0] }
   0xc   :  { %290 = vmatpush.bf16.msrb.mxu2 %v6354_v21  ;;  %v6374_v46 = vor.u32 %v7771_v41, %v6373_v39  ;;  %v6442_v51 = vor.u32 %v7784_v49, %v6441_v48  ;;  %v6381_v54 = vld [vmem:[%s10492_s3 + $0x48] sm:$0xf]  ;;  %v7772_v55 = vld [vmem:[%s10492_s3 + $0x54] sm:$0xf0]  ;;  %v7769_v56 = vld [vmem:[%s10492_s3 + $0x44] sm:$0xf] }
   0xd   :  { %303 = vmatpush.bf16.msrb.mxu3 %v6358_v27  ;;  %v6375_v58 = vld [vmem:[%s10492_s3 + $0x50] sm:$0xf0]  ;;  %v7770_v59 = vld [vmem:[%s10492_s3 + $0x4c] sm:$0xf]  ;;  %v6383_v60 = vld [vmem:[%s10492_s3 + $0x58] sm:$0xf0]  ;;  %v6382_v61 = vor.u32 %v7772_v55, %v6381_v54 }
   0xe   :  { %126 = vmatpush.bf16.msra.mxu0 %v8134_v3  ;;  %v6378_v63 = vor.u32 %v7769_v56, %v6375_v58  ;;  %v6461_v10 = vld [vmem:[%s10492_s3 + $0xc8] sm:$0xf]  ;;  %v7788_v11 = vld [vmem:[%s10492_s3 + $0xd4] sm:$0xf0]  ;;  %v7773_v20 = vld [vmem:[%s10492_s3 + $0x64] sm:$0xf] }
   0xf   :  { %v6462_v14 = vor.u32 %v7788_v11, %v6461_v10  ;;  %v6395_v21 = vld [vmem:[%s10492_s3 + $0x70] sm:$0xf0]  ;;  %v6393_v22 = vld [vmem:[%s10492_s3 + $0x60] sm:$0xf]  ;;  %v7775_v23 = vld [vmem:[%s10492_s3 + $0x6c] sm:$0xf0] }
  0x10   :  { %v6401_v24 = vld [vmem:[%s10492_s3 + $0x68] sm:$0xf]  ;;  %v7776_v25 = vld [vmem:[%s10492_s3 + $0x74] sm:$0xf0]  ;;  %v6394_v29 = vor.u32 %v7775_v23, %v6393_v22  ;;  %v6413_v39 = vld [vmem:[%s10492_s3 + $0x80] sm:$0xf] }
  0x11   :  { %v6402_v30 = vor.u32 %v7776_v25, %v6401_v24  ;;  %v7774_v41 = vld [vmem:[%s10492_s3 + $0x6c] sm:$0xf]  ;;  %v6433_v56 = vld [vmem:[%s10492_s3 + $0xa0] sm:$0xf]  ;;  %v7791_v22 = vld [vmem:[%s10492_s3 + $0xec] sm:$0xf0] }
  0x12   :  { %127 = vmatpush.bf16.msra.mxu0 %v8140_v4  ;;  %v6453_v11 = vld [vmem:[%s10492_s3 + $0xc0] sm:$0xf]  ;;  %v7786_v23 = vld [vmem:[%s10492_s3 + $0xcc] sm:$0xf]  ;;  %v6463_v24 = vld [vmem:[%s10492_s3 + $0xd8] sm:$0xf0] }
  0x13   :  { %v7789_v25 = vld [vmem:[%s10492_s3 + $0xe4] sm:$0xf] }
  0x16   :  { %128 = vmatpush.bf16.msra.mxu0 %v8146_v5 }
  0x19   :  { %6327 = vmatmul.msk.bf16.vlgmr.msra.gmra.mxu0 %vm108_vm0, %v7757_v6  ;;  %v6386_v6 = vor.u32 %v7770_v59, %v6383_v60  ;;  %v6423_v59 = vld [vmem:[%s10492_s3 + $0x98] sm:$0xf0]  ;;  %v7781_v60 = vld [vmem:[%s10492_s3 + $0xa4] sm:$0xf] }
  0x1a   :  { %564 = vmatpush.bf16.msrb.mxu0 %v6422_v32 }
  0x1e   :  { %648 = vmatpush.bf16.msra.mxu0 %v6442_v51 }
  0x29   :  { %6328 = vmatmul.msk.bf16.gmra.mxu0 %vm108_vm0, %v7758_v7 }
  0x39   :  { %6329 = vmatmul.msk.bf16.gmra.mxu0 %vm108_vm0, %v7759_v8 }
  0x49   :  { %6330 = vmatmul.msk.bf16.gmra.mxu0 %vm108_vm0, %v7760_v9 }
  0x96   :  { %v130_v28 = vpop.f32.mrf.mxu0 }
  0x97   :  { %v131_v50 = vadd.f32 %v8210_v31, %v130_v28  ;;  %v6398_v28 = vor.u32 %v7773_v20, %v6395_v21  ;;  %v6473_v21 = vld [vmem:[%s10492_s3 + $0xe0] sm:$0xf] }
  0x99   :  { %v158_v52 = vmul.f32 0.2, %v131_v50  ;;  %vm150_vm3 = vcmp.gt.f32.partialorder %v131_v50, 0.0 }
  0x9b   :  { %v166_v57 = vsel %vm150_vm3, %v131_v50, %v158_v52 }
  0x9c   :  { %v174_v62 = vpack.c.bf16 %v166_v57, %v166_v57  ;;  %v7783_v57 = vld [vmem:[%s10492_s3 + $0xac] sm:$0xf0] }
  0x9e   :  { %v132_v33 = vpop.f32.mrf.mxu0 }
  0x9f   :  { %v133_v34 = vadd.f32 %v8210_v31, %v132_v33  ;;  %v6481_v33 = vld [vmem:[%s10492_s3 + $0xe8] sm:$0xf] }
  0xa1   :  { %vm151_vm1 = vcmp.gt.f32.partialorder %v133_v34, 0.0  ;;  %v159_v40 = vmul.f32 0.2, %v133_v34 }
  0xa3   :  { %v167_v42 = vsel %vm151_vm1, %v133_v34, %v159_v40  ;;  %v7792_v34 = vld [vmem:[%s10492_s3 + $0xf4] sm:$0xf0]  ;;  %v7779_v40 = vld [vmem:[%s10492_s3 + $0x8c] sm:$0xf0] }
  0xa4   :  { %v179_v44 = vpack.c.bf16 %v167_v42, %v167_v42  ;;  %v6482_v36 = vor.u32 %v7792_v34, %v6481_v33  ;;  %v6403_v42 = vld [vmem:[%s10492_s3 + $0x78] sm:$0xf0] }
  0xa6   :  { %6347 = vmatmul.msk.bf16.vlgmr.msra.gmra.mxu1 %vm204_vm2, %v179_v44  ;;  %6348 = vmatmul.msk.bf16.vlgmr.msra.gmra.mxu2 %vm204_vm2, %v179_v44  ;;  %v135_v47 = vpop.f32.mrf.mxu0 }
  0xa7   :  { %6349 = vmatmul.msk.bf16.vlgmr.msra.gmra.mxu3 %vm204_vm2, %v179_v44  ;;  %329 = vmatpush.bf16.msra.mxu2 %v6366_v43  ;;  %v136_v9 = vadd.f32 %v8210_v31, %v135_v47  ;;  %v7777_v43 = vld [vmem:[%s10492_s3 + $0x84] sm:$0xf]  ;;  %v6406_v47 = vor.u32 %v7774_v41, %v6403_v42 }
  0xa8   :  { %316 = vmatpush.bf16.msra.mxu1 %v6362_v45  ;;  %370 = vmatpush.bf16.msra.mxu3 %v6374_v46  ;;  %v6414_v46 = vor.u32 %v7779_v40, %v6413_v39 }
  0xa9   :  { %v160_v15 = vmul.f32 0.2, %v136_v9  ;;  %vm152_vm5 = vcmp.gt.f32.partialorder %v136_v9, 0.0 }
  0xab   :  { %v168_v19 = vsel %vm152_vm5, %v136_v9, %v160_v15  ;;  %v7785_v15 = vld [vmem:[%s10492_s3 + $0xc4] sm:$0xf] }
  0xac   :  { %v335_v26 = vpack.c.bf16 %v168_v19, %v168_v19 }
  0xae   :  { %v8241_v53 = vpop.f32.mrf.mxu0 }
  0xaf   :  { %v138_v50 = vadd.f32 %v8210_v31, %v8241_v53  ;;  %v7778_v53 = vld [vmem:[%s10492_s3 + $0x8c] sm:$0xf] }
  0xb1   :  { %v161_v54 = vmul.f32 0.2, %v138_v50  ;;  %vm153_vm8 = vcmp.gt.f32.partialorder %v138_v50, 0.0 }
  0xb3   :  { %v169_v58 = vsel %vm153_vm8, %v138_v50, %v161_v54 }
  0xb6   :  { %6350 = vmatmul.msk.bf16.vlgmr.msrb.gmra.mxu1 %vm204_vm2, %v179_v44  ;;  %6367 = vmatmul.msk.bf16.vlgmr.msrb.gmra.mxu2 %vm204_vm2, %v174_v62  ;;  %v140_v7 = vpop.f32.mrf.mxu0  ;;  %v6415_v44 = vld [vmem:[%s10492_s3 + $0x90] sm:$0xf0] }
  0xb7   :  { %6368 = vmatmul.msk.bf16.vlgmr.msrb.gmra.mxu3 %vm204_vm2, %v174_v62  ;;  %v141_v8 = vadd.f32 %v8210_v31, %v140_v7  ;;  %396 = vmatpush.bf16.msrb.mxu2 %v6382_v61  ;;  %v6418_v48 = vor.u32 %v7777_v43, %v6415_v44  ;;  %v6435_v61 = vld [vmem:[%s10492_s3 + $0xb0] sm:$0xf0]  ;;  %v6426_v7 = vor.u32 %v7778_v53, %v6423_v59 }
  0xb8   :  { %383 = vmatpush.bf16.msrb.mxu1 %v6378_v63  ;;  %409 = vmatpush.bf16.msrb.mxu3 %v6386_v6  ;;  %v6434_v63 = vor.u32 %v7783_v57, %v6433_v56  ;;  %v419_v6 = vpack.c.bf16 %v169_v58, %v169_v58  ;;  %v7795_v56 = vld [vmem:[%s10491_s0 + $0x30] sm:$0xff] }
  0xb9   :  { %vm154_vm4 = vcmp.gt.f32.partialorder %v141_v8, 0.0  ;;  %v162_v12 = vmul.f32 0.2, %v141_v8 }
  0xbb   :  { %v170_v13 = vsel %vm154_vm4, %v141_v8, %v162_v12  ;;  %v6438_v8 = vor.u32 %v7781_v60, %v6435_v61  ;;  %v7787_v12 = vld [vmem:[%s10492_s3 + $0xcc] sm:$0xf0] }
  0xbc   :  { %v8272_v16 = vpack.c.bf16 %v170_v13, %v170_v13  ;;  %v7782_v13 = vld [vmem:[%s10492_s3 + $0xac] sm:$0xf] }
  0xbe   :  { %6429 = vmatmul.msk.bf16.vlgmr.msrb.gmra.mxu0 %vm204_vm2, %v8272_v16  ;;  %v142_v17 = vpop.f32.mrf.mxu0 }
  0xbf   :  { %v143_v18 = vadd.f32 %v8210_v31, %v142_v17  ;;  %732 = vmatpush.bf16.msrb.mxu0 %v6462_v14  ;;  %v6443_v14 = vld [vmem:[%s10492_s3 + $0xb8] sm:$0xf0]  ;;  %v6455_v17 = vld [vmem:[%s10492_s3 + $0xd0] sm:$0xf0] }
  0xc0   :  { %v6446_v19 = vor.u32 %v7782_v13, %v6443_v14  ;;  %v6458_v20 = vor.u32 %v7785_v15, %v6455_v17 }
  0xc1   :  { %v163_v27 = vmul.f32 0.2, %v143_v18  ;;  %vm155_vm6 = vcmp.gt.f32.partialorder %v143_v18, 0.0 }
  0xc3   :  { %v171_v32 = vsel %vm155_vm6, %v143_v18, %v163_v27  ;;  %v6454_v18 = vor.u32 %v7787_v12, %v6453_v11  ;;  %v6474_v27 = vor.u32 %v7791_v22, %v6473_v21 }
  0xc4   :  { %v8304_v35 = vpack.c.bf16 %v171_v32, %v171_v32  ;;  %v6483_v32 = vld [vmem:[%s10492_s3 + $0xf8] sm:$0xf0] }
  0xc6   :  { %6369 = vmatmul.msk.bf16.vlgmr.msra.gmra.mxu1 %vm204_vm2, %v174_v62  ;;  %6370 = vmatmul.msk.bf16.vlgmr.msra.gmra.mxu2 %vm204_vm2, %v174_v62  ;;  %v145_v37 = vpop.f32.mrf.mxu0 }
  0xc7   :  { %6387 = vmatmul.msk.bf16.vlgmr.msra.gmra.mxu3 %vm204_vm2, %v335_v26  ;;  %467 = vmatpush.bf16.msra.mxu2 %v6398_v28  ;;  %v146_v38 = vadd.f32 %v8210_v31, %v145_v37  ;;  %v6466_v28 = vor.u32 %v7786_v23, %v6463_v24 }
  0xc8   :  { %454 = vmatpush.bf16.msra.mxu1 %v6394_v29  ;;  %480 = vmatpush.bf16.msra.mxu3 %v6402_v30  ;;  %v7790_v30 = vld [vmem:[%s10492_s3 + $0xec] sm:$0xf] }
  0xc9   :  { %v164_v45 = vmul.f32 0.2, %v146_v38  ;;  %vm156_vm7 = vcmp.gt.f32.partialorder %v146_v38, 0.0  ;;  %v6486_v33 = vor.u32 %v7790_v30, %v6483_v32 }
  0xcb   :  { %v172_v49 = vsel %vm156_vm7, %v146_v38, %v164_v45 }
  0xcc   :  { %v8332_v51 = vpack.c.bf16 %v172_v49, %v172_v49 }
  0xce   :  { %6449 = vmatmul.msk.bf16.vlgmr.msra.gmra.mxu0 %vm204_vm2, %v8304_v35  ;;  %v147_v52 = vpop.f32.mrf.mxu0 }
  0xcf   :  { %816 = vmatpush.bf16.msra.mxu0 %v6482_v36  ;;  %v148_v55 = vadd.f32 %v8210_v31, %v147_v52 }
  0xd1   :  { %v165_v62 = vmul.f32 0.2, %v148_v55  ;;  %vm157_vm9 = vcmp.gt.f32.partialorder %v148_v55, 0.0 }
  0xd3   :  { %v173_v9 = vsel %vm157_vm9, %v148_v55, %v165_v62 }
  0xd4   :  { %v755_v10 = vpack.c.bf16 %v173_v9, %v173_v9  ;;  %v7796_v9 = vld [vmem:[%s10491_s0 + $0x38] sm:$0xff] }
  0xd6   :  { %6388 = vmatmul.msk.bf16.vlgmr.msrb.gmra.mxu1 %vm204_vm2, %v335_v26  ;;  %6389 = vmatmul.msk.bf16.vlgmr.msrb.gmra.mxu2 %vm204_vm2, %v335_v26 }
  0xd7   :  { %6390 = vmatmul.msk.bf16.vlgmr.msrb.gmra.mxu3 %vm204_vm2, %v335_v26  ;;  %538 = vmatpush.bf16.msrb.mxu2 %v6414_v46  ;;  %v6475_v26 = vld [vmem:[%s10492_s3 + $0xf0] sm:$0xf0] }
  0xd8   :  { %493 = vmatpush.bf16.msrb.mxu1 %v6406_v47  ;;  %551 = vmatpush.bf16.msrb.mxu3 %v6418_v48  ;;  %v6478_v29 = vor.u32 %v7789_v25, %v6475_v26 }
  0xde   :  { %6469 = vmatmul.msk.bf16.vlgmr.msrb.gmra.mxu0 %vm204_vm2, %v8332_v51 }
  0xe6   :  { %6407 = vmatmul.msk.bf16.vlgmr.msra.gmra.mxu1 %vm204_vm2, %v419_v6  ;;  %6408 = vmatmul.msk.bf16.vlgmr.msra.gmra.mxu2 %vm204_vm2, %v419_v6 }
  0xe7   :  { %6409 = vmatmul.msk.bf16.vlgmr.msra.gmra.mxu3 %vm204_vm2, %v419_v6  ;;  %622 = vmatpush.bf16.msra.mxu2 %v6434_v63 }
  0xe8   :  { %577 = vmatpush.bf16.msra.mxu1 %v6426_v7  ;;  %635 = vmatpush.bf16.msra.mxu3 %v6438_v8 }
  0xee   :  { %6489 = vmatmul.msk.bf16.vlgmr.msra.gmra.mxu0 %vm204_vm2, %v755_v10 }
  0xf6   :  { %6410 = vmatmul.msk.bf16.vlgmr.msrb.gmra.mxu1 %vm204_vm2, %v419_v6  ;;  %6427 = vmatmul.msk.bf16.vlgmr.msrb.gmra.mxu2 %vm204_vm2, %v8272_v16 }
  0xf7   :  { %6428 = vmatmul.msk.bf16.vlgmr.msrb.gmra.mxu3 %vm204_vm2, %v8272_v16  ;;  %706 = vmatpush.bf16.msrb.mxu2 %v6454_v18 }
  0xf8   :  { %661 = vmatpush.bf16.msrb.mxu1 %v6446_v19  ;;  %719 = vmatpush.bf16.msrb.mxu3 %v6458_v20 }
 0x106   :  { %6430 = vmatmul.msk.bf16.vlgmr.msra.gmra.mxu1 %vm204_vm2, %v8272_v16  ;;  %6447 = vmatmul.msk.bf16.vlgmr.msra.gmra.mxu2 %vm204_vm2, %v8304_v35 }
 0x107   :  { %6448 = vmatmul.msk.bf16.vlgmr.msra.gmra.mxu3 %vm204_vm2, %v8304_v35  ;;  %790 = vmatpush.bf16.msra.mxu2 %v6474_v27 }
 0x108   :  { %745 = vmatpush.bf16.msra.mxu1 %v6466_v28  ;;  %803 = vmatpush.bf16.msra.mxu3 %v6478_v29 }
 0x116   :  { %6450 = vmatmul.msk.bf16.vlgmr.msrb.gmra.mxu1 %vm204_vm2, %v8304_v35  ;;  %6467 = vmatmul.msk.bf16.vlgmr.msrb.gmra.mxu2 %vm204_vm2, %v8332_v51 }
 0x117   :  { %6468 = vmatmul.msk.bf16.vlgmr.msrb.gmra.mxu3 %vm204_vm2, %v8332_v51  ;;  %881 = vmatpush.bf16.msrb.mxu2 %v8116_v0 }
 0x118   :  { %829 = vmatpush.bf16.msrb.mxu1 %v6486_v33 }
 0x11b   :  { %882 = vmatpush.bf16.msrb.mxu2 %v8122_v1 }
 0x11f   :  { %883 = vmatpush.bf16.msrb.mxu2 %v8128_v2  ;;  %v7793_v2 = vld [vmem:[%s10491_s0 + $0x20] sm:$0xff] }
 0x123   :  { %v217_v16 = vpop.f32.mrf.mxu1  ;;  %884 = vmatpush.bf16.msrb.mxu2 %v8134_v3 }
 0x126   :  { %6470 = vmatmul.msk.bf16.vlgmr.msra.gmra.mxu1 %vm204_vm2, %v8332_v51  ;;  %6487 = vmatmul.msk.bf16.vlgmr.msra.gmra.mxu2 %vm204_vm2, %v755_v10 }
 0x127   :  { %6488 = vmatmul.msk.bf16.vlgmr.msra.gmra.mxu3 %vm204_vm2, %v755_v10  ;;  %885 = vmatpush.bf16.msrb.mxu2 %v8140_v4 }
 0x129   :  { %v230_v34 = vpop.f32.mrf.mxu2 }
 0x12a   :  { %v243_v35 = vpop.f32.mrf.mxu3 }
 0x12b   :  { %v219_v0 = vpop.f32.mrf.mxu1  ;;  %886 = vmatpush.bf16.msrb.mxu2 %v8146_v5  ;;  %v7794_v5 = vld [vmem:[%s10491_s0 + $0x28] sm:$0xff] }
 0x131   :  { %v232_v1 = vpop.f32.mrf.mxu2 }
 0x132   :  { %v245_v36 = vpop.f32.mrf.mxu3 }
 0x133   :  { %v256_v3 = vpop.f32.mrf.mxu1 }
 0x136   :  { %6490 = vmatmul.msk.bf16.vlgmr.msrb.gmra.mxu1 %vm204_vm2, %v755_v10  ;;  %6507 = vmatmul.msk.bf16.vlgmr.msrb.gmra.mxu2 %vm108_vm0, %v7793_v2 }
 0x139   :  { %v292_v37 = vpop.f32.mrf.mxu2 }
 0x13a   :  { %v293_v38 = vadd.f32 %v292_v37, %v217_v16  ;;  %v305_v39 = vpop.f32.mrf.mxu3 }
 0x13b   :  { %v306_v4 = vadd.f32 %v305_v39, %v230_v34  ;;  %v258_v40 = vpop.f32.mrf.mxu1  ;;  %v566_v41 = vpop.f32.mrf.mxu0 }
 0x13c   :  { %v6513_v40 = vld [vmem:[%s10492_s3 + $0x100] sm:$0xf] }
 0x141   :  { %v294_v42 = vpop.f32.mrf.mxu2 }
 0x142   :  { %v307_v43 = vpop.f32.mrf.mxu3 }
 0x143   :  { %v318_v44 = vpop.f32.mrf.mxu1  ;;  %v568_v45 = vpop.f32.mrf.mxu0 }
 0x144   :  { %v319_v46 = vadd.f32 %v318_v44, %v243_v35 }
 0x146   :  { %6508 = vmatmul.msk.bf16.gmra.mxu2 %vm108_vm0, %v7794_v5 }
 0x149   :  { %v331_v47 = vpop.f32.mrf.mxu2 }
 0x14a   :  { %v332_v48 = vadd.f32 %v331_v47, %v256_v3  ;;  %v372_v49 = vpop.f32.mrf.mxu3 }
 0x14b   :  { %v415_v50 = vadd.f32 %v372_v49, %v293_v38  ;;  %v320_v51 = vpop.f32.mrf.mxu1  ;;  %v650_v52 = vpop.f32.mrf.mxu0  ;;  %v7797_v49 = vld [vmem:[%s10492_s3 + $0x104] sm:$0xf] }
 0x14c   :  { %v6521_v51 = vld [vmem:[%s10492_s3 + $0x108] sm:$0xf] }
 0x151   :  { %v333_v54 = vpop.f32.mrf.mxu2 }
 0x152   :  { %v374_v55 = vpop.f32.mrf.mxu3  ;;  %v7800_v54 = vld [vmem:[%s10492_s3 + $0x114] sm:$0xf0] }
 0x153   :  { %v385_v57 = vpop.f32.mrf.mxu1  ;;  %v652_v53 = vpop.f32.mrf.mxu0  ;;  %v6522_v55 = vor.u32 %v7800_v54, %v6521_v51 }
 0x154   :  { %v416_v58 = vadd.f32 %v385_v57, %v306_v4 }
 0x155   :  { %993 = vmatpush.bf16.msra.mxu1 %v6522_v55  ;;  %v6621_v55 = vld [vmem:[%s10492_s3 + $0x1a8] sm:$0xf] }
 0x156   :  { %6509 = vmatmul.msk.bf16.gmra.mxu2 %vm108_vm0, %v7795_v56 }
 0x159   :  { %v398_v59 = vpop.f32.mrf.mxu2 }
 0x15a   :  { %v417_v60 = vadd.f32 %v398_v59, %v319_v46  ;;  %v411_v61 = vpop.f32.mrf.mxu3  ;;  %v7798_v59 = vld [vmem:[%s10492_s3 + $0x10c] sm:$0xf] }
 0x15b   :  { %v418_v62 = vadd.f32 %v411_v61, %v332_v48  ;;  %v387_v63 = vpop.f32.mrf.mxu1  ;;  %v734_v6 = vpop.f32.mrf.mxu0 }
 0x161   :  { %v400_v7 = vpop.f32.mrf.mxu2 }
 0x162   :  { %v413_v8 = vpop.f32.mrf.mxu3 }
 0x163   :  { %v456_v10 = vpop.f32.mrf.mxu1  ;;  %v736_v11 = vpop.f32.mrf.mxu0 }
 0x164   :  { %v499_v12 = vadd.f32 %v456_v10, %v415_v50  ;;  %v6515_v50 = vld [vmem:[%s10492_s3 + $0x110] sm:$0xf0]  ;;  %v7803_v10 = vld [vmem:[%s10492_s3 + $0x12c] sm:$0xf0]  ;;  %v7801_v11 = vld [vmem:[%s10492_s3 + $0x124] sm:$0xf] }
 0x166   :  { %6510 = vmatmul.msk.bf16.gmra.mxu2 %vm108_vm0, %v7796_v9  ;;  %v6533_v9 = vld [vmem:[%s10492_s3 + $0x120] sm:$0xf] }
 0x169   :  { %v469_v13 = vpop.f32.mrf.mxu2 }
 0x16a   :  { %v500_v14 = vadd.f32 %v469_v13, %v416_v58  ;;  %v482_v15 = vpop.f32.mrf.mxu3  ;;  %v6535_v13 = vld [vmem:[%s10492_s3 + $0x130] sm:$0xf0] }
 0x16b   :  { %v501_v17 = vadd.f32 %v482_v15, %v417_v60  ;;  %v458_v18 = vpop.f32.mrf.mxu1  ;;  %v818_v19 = vpop.f32.mrf.mxu0  ;;  %v6523_v60 = vld [vmem:[%s10492_s3 + $0x118] sm:$0xf0] }
 0x16c   :  { %v6526_v61 = vor.u32 %v7798_v59, %v6523_v60 }
 0x16d   :  { %v585_v20 = vadd.f32 %v566_v41, %v501_v17  ;;  %v7799_v41 = vld [vmem:[%s10492_s3 + $0x10c] sm:$0xf0] }
 0x16e   :  { %v6514_v43 = vor.u32 %v7799_v41, %v6513_v40  ;;  %v7805_v41 = vld [vmem:[%s10492_s3 + $0x144] sm:$0xf] }
 0x16f   :  { %v669_v21 = vadd.f32 %v650_v52, %v585_v20  ;;  %v6518_v52 = vor.u32 %v7797_v49, %v6515_v50  ;;  %v6581_v20 = vld [vmem:[%s10492_s3 + $0x168] sm:$0xf] }
 0x170   :  { %967 = vmatpush.bf16.msrb.mxu3 %v6514_v43  ;;  %v6561_v43 = vld [vmem:[%s10492_s3 + $0x148] sm:$0xf] }
 0x171   :  { %v753_v22 = vadd.f32 %v734_v6, %v669_v21  ;;  %v471_v23 = vpop.f32.mrf.mxu2  ;;  %980 = vmatpush.bf16.msrb.mxu0 %v6518_v52  ;;  %v7812_v21 = vld [vmem:[%s10492_s3 + $0x174] sm:$0xf0] }
 0x172   :  { %v484_v24 = vpop.f32.mrf.mxu3 }
 0x173   :  { %v8445_v25 = vadd.f32 %v818_v19, %v753_v22  ;;  %v495_v26 = vpop.f32.mrf.mxu1  ;;  %v820_v27 = vpop.f32.mrf.mxu0  ;;  %v6582_v22 = vor.u32 %v7812_v21, %v6581_v20 }
 0x174   :  { %v502_v28 = vadd.f32 %v495_v26, %v418_v62  ;;  %1006 = vmatpush.bf16.msra.mxu3 %v6526_v61  ;;  %v6541_v26 = vld [vmem:[%s10492_s3 + $0x128] sm:$0xf]  ;;  %v7804_v27 = vld [vmem:[%s10492_s3 + $0x134] sm:$0xf0] }
 0x175   :  { %1245 = vmatpush.bf16.msra.mxu2 %v6582_v22  ;;  %v6641_v22 = vld [vmem:[%s10492_s3 + $0x1c8] sm:$0xf] }
 0x179   :  { %v540_v29 = vpop.f32.mrf.mxu2 }
 0x17a   :  { %v583_v30 = vadd.f32 %v540_v29, %v499_v12  ;;  %v553_v32 = vpop.f32.mrf.mxu3  ;;  %v6534_v12 = vor.u32 %v7803_v10, %v6533_v9  ;;  %v7802_v29 = vld [vmem:[%s10492_s3 + $0x12c] sm:$0xf]  ;;  %v7811_v9 = vld [vmem:[%s10492_s3 + $0x16c] sm:$0xf0]  ;;  %v7809_v10 = vld [vmem:[%s10492_s3 + $0x164] sm:$0xf] }
 0x17b   :  { %v584_v33 = vadd.f32 %v553_v32, %v500_v14  ;;  %v497_v16 = vpop.f32.mrf.mxu1  ;;  %v6538_v14 = vor.u32 %v7801_v11, %v6535_v13  ;;  %v6553_v32 = vld [vmem:[%s10492_s3 + $0x140] sm:$0xf]  ;;  %v6575_v11 = vld [vmem:[%s10492_s3 + $0x170] sm:$0xf0]  ;;  %v6583_v13 = vld [vmem:[%s10492_s3 + $0x178] sm:$0xf0] }
 0x17c   :  { %1051 = vmatpush.bf16.msra.mxu0 %v6534_v12  ;;  %v7807_v16 = vld [vmem:[%s10492_s3 + $0x14c] sm:$0xf0]  ;;  %v7810_v12 = vld [vmem:[%s10492_s3 + $0x16c] sm:$0xf] }
 0x17d   :  { %1064 = vmatpush.bf16.msrb.mxu1 %v6538_v14  ;;  %v6586_v20 = vor.u32 %v7810_v12, %v6583_v13  ;;  %v6655_v12 = vld [vmem:[%s10492_s3 + $0x1f0] sm:$0xf0]  ;;  %v7826_v13 = vld [vmem:[%s10492_s3 + $0x1ec] sm:$0xf] }
 0x181   :  { %v542_v34 = vpop.f32.mrf.mxu2 }
 0x182   :  { %v555_v35 = vpop.f32.mrf.mxu3 }
 0x183   :  { %v579_v0 = vpop.f32.mrf.mxu1  ;;  %v6542_v35 = vor.u32 %v7804_v27, %v6541_v26 }
 0x184   :  { %v586_v1 = vadd.f32 %v579_v0, %v502_v28 }
 0x189   :  { %v624_v36 = vpop.f32.mrf.mxu2 }
 0x18a   :  { %v667_v2 = vadd.f32 %v624_v36, %v583_v30  ;;  %v637_v3 = vpop.f32.mrf.mxu3  ;;  %v6543_v30 = vld [vmem:[%s10492_s3 + $0x138] sm:$0xf0]  ;;  %v6554_v36 = vor.u32 %v7807_v16, %v6553_v32  ;;  %v7813_v32 = vld [vmem:[%s10492_s3 + $0x184] sm:$0xf]  ;;  %v7814_v16 = vld [vmem:[%s10492_s3 + $0x18c] sm:$0xf] }
 0x18b   :  { %v668_v37 = vadd.f32 %v637_v3, %v584_v33  ;;  %v581_v38 = vpop.f32.mrf.mxu1  ;;  %v6601_v3 = vld [vmem:[%s10492_s3 + $0x188] sm:$0xf] }
 0x191   :  { %v626_v39 = vpop.f32.mrf.mxu2 }
 0x192   :  { %v639_v4 = vpop.f32.mrf.mxu3 }
 0x193   :  { %v663_v42 = vpop.f32.mrf.mxu1 }
 0x194   :  { %v670_v5 = vadd.f32 %v663_v42, %v586_v1  ;;  %v6546_v1 = vor.u32 %v7802_v29, %v6543_v30  ;;  %v6555_v42 = vld [vmem:[%s10492_s3 + $0x150] sm:$0xf0]  ;;  %v6593_v29 = vld [vmem:[%s10492_s3 + $0x180] sm:$0xf]  ;;  %v7815_v30 = vld [vmem:[%s10492_s3 + $0x18c] sm:$0xf0] }
 0x199   :  { %v708_v44 = vpop.f32.mrf.mxu2 }
 0x19a   :  { %v751_v45 = vadd.f32 %v708_v44, %v667_v2  ;;  %v721_v46 = vpop.f32.mrf.mxu3  ;;  %v7808_v44 = vld [vmem:[%s10492_s3 + $0x154] sm:$0xf0] }
 0x19b   :  { %v752_v47 = vadd.f32 %v721_v46, %v668_v37  ;;  %v665_v48 = vpop.f32.mrf.mxu1  ;;  %v7816_v37 = vld [vmem:[%s10492_s3 + $0x194] sm:$0xf0]  ;;  %v6563_v46 = vld [vmem:[%s10492_s3 + $0x158] sm:$0xf0]  ;;  %v6562_v49 = vor.u32 %v7808_v44, %v6561_v43  ;;  %v7817_v43 = vld [vmem:[%s10492_s3 + $0x1a4] sm:$0xf] }
 0x19c   :  { %v6602_v39 = vor.u32 %v7816_v37, %v6601_v3  ;;  %v6661_v3 = vld [vmem:[%s10492_s3 + $0x1e8] sm:$0xf]  ;;  %v7828_v37 = vld [vmem:[%s10492_s3 + $0x1f4] sm:$0xf0]  ;;  %v7818_v44 = vld [vmem:[%s10492_s3 + $0x1ac] sm:$0xf] }
 0x19e   :  { %1329 = vmatpush.bf16.msrb.mxu2 %v6602_v39  ;;  %v6662_v39 = vor.u32 %v7828_v37, %v6661_v3 }
 0x1a1   :  { %v710_v56 = vpop.f32.mrf.mxu2 }
 0x1a2   :  { %v723_v57 = vpop.f32.mrf.mxu3  ;;  %v7820_v56 = vld [vmem:[%s10492_s3 + $0x1b4] sm:$0xf0] }
 0x1a3   :  { %v747_v53 = vpop.f32.mrf.mxu1 }
 0x1a4   :  { %v754_v58 = vadd.f32 %v747_v53, %v670_v5 }
 0x1a9   :  { %v792_v62 = vpop.f32.mrf.mxu2 }
 0x1aa   :  { %v8471_v63 = vadd.f32 %v792_v62, %v751_v45  ;;  %v805_v6 = vpop.f32.mrf.mxu3  ;;  %v7806_v45 = vld [vmem:[%s10492_s3 + $0x14c] sm:$0xf] }
 0x1ab   :  { %v8473_v7 = vadd.f32 %v805_v6, %v752_v47  ;;  %v749_v8 = vpop.f32.mrf.mxu1  ;;  %v6558_v47 = vor.u32 %v7805_v41, %v6555_v42  ;;  %v6566_v50 = vor.u32 %v7806_v45, %v6563_v46  ;;  %v6613_v41 = vld [vmem:[%s10492_s3 + $0x1a0] sm:$0xf]  ;;  %v7819_v42 = vld [vmem:[%s10492_s3 + $0x1ac] sm:$0xf0]  ;;  %v6623_v45 = vld [vmem:[%s10492_s3 + $0x1b8] sm:$0xf0] }
 0x1ac   :  { %v6573_v8 = vld [vmem:[%s10492_s3 + $0x160] sm:$0xf] }
 0x1b1   :  { %v794_v15 = vpop.f32.mrf.mxu2 }
 0x1b2   :  { %v807_v17 = vpop.f32.mrf.mxu3 }
 0x1b3   :  { %v831_v18 = vpop.f32.mrf.mxu1  ;;  %v6574_v17 = vor.u32 %v7811_v9, %v6573_v8  ;;  %v6653_v9 = vld [vmem:[%s10492_s3 + $0x1e0] sm:$0xf] }
 0x1b4   :  { %v8487_v19 = vadd.f32 %v831_v18, %v754_v58  ;;  %v6622_v58 = vor.u32 %v7820_v56, %v6621_v55  ;;  %v6578_v18 = vor.u32 %v7809_v10, %v6575_v11  ;;  %v6633_v55 = vld [vmem:[%s10492_s3 + $0x1c0] sm:$0xf]  ;;  %v7823_v56 = vld [vmem:[%s10492_s3 + $0x1cc] sm:$0xf0]  ;;  %v7825_v11 = vld [vmem:[%s10492_s3 + $0x1e4] sm:$0xf] }
 0x1b5   :  { %v7827_v10 = vld [vmem:[%s10492_s3 + $0x1ec] sm:$0xf0] }
 0x1b9   :  { %v888_v23 = vpop.f32.mrf.mxu2 }
 0x1ba   :  { %v889_v24 = vadd.f32 %v8210_v31, %v888_v23  ;;  %v7824_v23 = vld [vmem:[%s10492_s3 + $0x1d4] sm:$0xf0] }
 0x1bb   :  { %v833_v28 = vpop.f32.mrf.mxu1  ;;  %v6642_v26 = vor.u32 %v7824_v23, %v6641_v22  ;;  %v8709_v22 = vld [vmem:[%s10489_s1 + $0x18] sm:$0xff] }
 0x1bc   :  { %vm908_vm10 = vcmp.gt.f32.partialorder %v889_v24, 0.0  ;;  %v916_v33 = vmul.f32 0.2, %v889_v24 }
 0x1be   :  { %v924_v34 = vsel %vm908_vm10, %v889_v24, %v916_v33  ;;  %v6595_v33 = vld [vmem:[%s10492_s3 + $0x190] sm:$0xf0] }
 0x1bf   :  { %v932_v0 = vpack.c.bf16 %v924_v34, %v924_v34  ;;  %v6603_v34 = vld [vmem:[%s10492_s3 + $0x198] sm:$0xf0] }
 0x1c1   :  { %v890_v2 = vpop.f32.mrf.mxu2  ;;  %6527 = vmatmul.msk.bf16.vlgmr.msrb.gmra.mxu3 %vm204_vm2, %v932_v0  ;;  %6528 = vmatmul.msk.bf16.vlgmr.msrb.gmra.mxu0 %vm204_vm2, %v932_v0 }
 0x1c2   :  { %6529 = vmatmul.msk.bf16.vlgmr.msra.gmra.mxu1 %vm204_vm2, %v932_v0  ;;  %1077 = vmatpush.bf16.msrb.mxu3 %v6542_v35  ;;  %v891_v38 = vadd.f32 %v8210_v31, %v890_v2 }
 0x1c3   :  { %1090 = vmatpush.bf16.msrb.mxu0 %v6546_v1  ;;  %1135 = vmatpush.bf16.msra.mxu1 %v6554_v36  ;;  %v6598_v1 = vor.u32 %v7813_v32, %v6595_v33  ;;  %v6606_v36 = vor.u32 %v7814_v16, %v6603_v34  ;;  %v7829_v34 = vld [vmem:[%s10491_s0 + $0x40] sm:$0xff] }
 0x1c4   :  { %v917_v4 = vmul.f32 0.2, %v891_v38  ;;  %vm909_vm11 = vcmp.gt.f32.partialorder %v891_v38, 0.0 }
 0x1c6   :  { %v925_v5 = vsel %vm909_vm11, %v891_v38, %v917_v4 }
 0x1c7   :  { %v1016_v48 = vpack.c.bf16 %v925_v5, %v925_v5  ;;  %v6615_v5 = vld [vmem:[%s10492_s3 + $0x1b0] sm:$0xf0] }
 0x1c9   :  { %v893_v40 = vpop.f32.mrf.mxu2 }
 0x1ca   :  { %v894_v54 = vadd.f32 %v8210_v31, %v893_v40 }
 0x1cc   :  { %v918_v59 = vmul.f32 0.2, %v894_v54  ;;  %vm910_vm13 = vcmp.gt.f32.partialorder %v894_v54, 0.0 }
 0x1ce   :  { %v926_v6 = vsel %vm910_vm13, %v894_v54, %v918_v59 }
 0x1cf   :  { %v1100_v14 = vpack.c.bf16 %v926_v6, %v926_v6 }
 0x1d1   :  { %v895_v51 = vpop.f32.mrf.mxu2  ;;  %6530 = vmatmul.msk.bf16.vlgmr.msra.gmra.mxu3 %vm204_vm2, %v932_v0  ;;  %6547 = vmatmul.msk.bf16.vlgmr.msra.gmra.mxu0 %vm204_vm2, %v1016_v48  ;;  %v6594_v0 = vor.u32 %v7815_v30, %v6593_v29  ;;  %v8726_v29 = vld [vmem:[%s10489_s1 + $0x8] sm:$0xff] }
 0x1d2   :  { %v896_v52 = vadd.f32 %v8210_v31, %v895_v51  ;;  %6548 = vmatmul.msk.bf16.vlgmr.msrb.gmra.mxu1 %vm204_vm2, %v1016_v48  ;;  %1148 = vmatpush.bf16.msra.mxu3 %v6558_v47  ;;  %v6614_v47 = vor.u32 %v7819_v42, %v6613_v41 }
 0x1d3   :  { %1161 = vmatpush.bf16.msra.mxu0 %v6562_v49  ;;  %1174 = vmatpush.bf16.msrb.mxu1 %v6566_v50  ;;  %v6626_v49 = vor.u32 %v7818_v44, %v6623_v45 }
 0x1d4   :  { %vm911_vm12 = vcmp.gt.f32.partialorder %v896_v52, 0.0  ;;  %v919_v57 = vmul.f32 0.2, %v896_v52 }
 0x1d6   :  { %v927_v53 = vsel %vm911_vm12, %v896_v52, %v919_v57  ;;  %v7821_v57 = vld [vmem:[%s10492_s3 + $0x1c4] sm:$0xf] }
 0x1d7   :  { %v8553_v60 = vpack.c.bf16 %v927_v53, %v927_v53  ;;  %v6635_v53 = vld [vmem:[%s10492_s3 + $0x1d0] sm:$0xf0] }
 0x1d9   :  { %6589 = vmatmul.msk.bf16.vlgmr.msra.gmra.mxu2 %vm204_vm2, %v8553_v60  ;;  %v898_v61 = vpop.f32.mrf.mxu2 }
 0x1da   :  { %v899_v62 = vadd.f32 %v8210_v31, %v898_v61  ;;  %1413 = vmatpush.bf16.msra.mxu2 %v6622_v58  ;;  %v6643_v58 = vld [vmem:[%s10492_s3 + $0x1d8] sm:$0xf0]  ;;  %v6638_v61 = vor.u32 %v7821_v57, %v6635_v53 }
 0x1dc   :  { %v920_v15 = vmul.f32 0.2, %v899_v62  ;;  %vm912_vm14 = vcmp.gt.f32.partialorder %v899_v62, 0.0 }
 0x1de   :  { %v928_v21 = vsel %vm912_vm14, %v899_v62, %v920_v15  ;;  %v6654_v15 = vor.u32 %v7827_v10, %v6653_v9 }
 0x1df   :  { %v8585_v24 = vpack.c.bf16 %v928_v21, %v928_v21  ;;  %v8703_v21 = vld [vmem:[%s10489_s1 + $0x20] sm:$0xff] }
 0x1e1   :  { %6549 = vmatmul.msk.bf16.vlgmr.msrb.gmra.mxu3 %vm204_vm2, %v1016_v48  ;;  %6550 = vmatmul.msk.bf16.vlgmr.msrb.gmra.mxu0 %vm204_vm2, %v1016_v48  ;;  %v900_v27 = vpop.f32.mrf.mxu2  ;;  %v6618_v48 = vor.u32 %v7817_v43, %v6615_v5 }
 0x1e2   :  { %6567 = vmatmul.msk.bf16.vlgmr.msra.gmra.mxu1 %vm204_vm2, %v1100_v14  ;;  %1219 = vmatpush.bf16.msrb.mxu3 %v6574_v17  ;;  %v901_v28 = vadd.f32 %v8210_v31, %v900_v27  ;;  %v6658_v17 = vor.u32 %v7825_v11, %v6655_v12 }
 0x1e3   :  { %1232 = vmatpush.bf16.msrb.mxu0 %v6578_v18  ;;  %1258 = vmatpush.bf16.msra.mxu1 %v6586_v20  ;;  %v8697_v20 = vld [vmem:[%s10489_s1 + $0x28] sm:$0xff] }
 0x1e4   :  { %v921_v35 = vmul.f32 0.2, %v901_v28  ;;  %vm913_vm15 = vcmp.gt.f32.partialorder %v901_v28, 0.0 }
 0x1e6   :  { %v929_v2 = vsel %vm913_vm15, %v901_v28, %v921_v35 }
 0x1e7   :  { %v1352_v38 = vpack.c.bf16 %v929_v2, %v929_v2 }
 0x1e9   :  { %6609 = vmatmul.msk.bf16.vlgmr.msrb.gmra.mxu2 %vm204_vm2, %v8585_v24  ;;  %v903_v4 = vpop.f32.mrf.mxu2 }
 0x1ea   :  { %1497 = vmatpush.bf16.msrb.mxu2 %v6642_v26  ;;  %v904_v40 = vadd.f32 %v8210_v31, %v903_v4  ;;  %v7830_v4 = vld [vmem:[%s10491_s0 + $0x48] sm:$0xff] }
 0x1ec   :  { %v922_v46 = vmul.f32 0.2, %v904_v40  ;;  %vm914_vm1 = vcmp.gt.f32.partialorder %v904_v40, 0.0 }
 0x1ee   :  { %v930_v50 = vsel %vm914_vm1, %v904_v40, %v922_v46 }
 0x1ef   :  { %v1436_v51 = vpack.c.bf16 %v930_v50, %v930_v50 }
 0x1f1   :  { %6568 = vmatmul.msk.bf16.vlgmr.msra.gmra.mxu3 %vm204_vm2, %v1100_v14  ;;  %6569 = vmatmul.msk.bf16.vlgmr.msra.gmra.mxu0 %vm204_vm2, %v1100_v14  ;;  %v905_v52 = vpop.f32.mrf.mxu2 }
 0x1f2   :  { %6570 = vmatmul.msk.bf16.vlgmr.msrb.gmra.mxu1 %vm204_vm2, %v1100_v14  ;;  %1303 = vmatpush.bf16.msra.mxu3 %v6594_v0  ;;  %v906_v54 = vadd.f32 %v8210_v31, %v905_v52  ;;  %v7822_v31 = vld [vmem:[%s10492_s3 + $0x1cc] sm:$0xf]  ;;  %v6663_v14 = vld [vmem:[%s10492_s3 + $0x1f8] sm:$0xf0] }
 0x1f3   :  { %1316 = vmatpush.bf16.msra.mxu0 %v6598_v1  ;;  %1342 = vmatpush.bf16.msrb.mxu1 %v6606_v36  ;;  %v6646_v62 = vor.u32 %v7822_v31, %v6643_v58  ;;  %v6666_v18 = vor.u32 %v7826_v13, %v6663_v14 }
 0x1f4   :  { %v923_v59 = vmul.f32 0.2, %v906_v54  ;;  %vm915_vm3 = vcmp.gt.f32.partialorder %v906_v54, 0.0 }
 0x1f6   :  { %v931_v6 = vsel %vm915_vm3, %v906_v54, %v923_v59 }
 0x1f7   :  { %v1520_v8 = vpack.c.bf16 %v931_v6, %v931_v6  ;;  %v7832_v6 = vld [vmem:[%s10491_s0 + $0x58] sm:$0xff] }
 0x1f9   :  { %6629 = vmatmul.msk.bf16.vlgmr.msra.gmra.mxu2 %vm204_vm2, %v1352_v38 }
 0x1fa   :  { %1581 = vmatpush.bf16.msra.mxu2 %v6662_v39 }
 0x201   :  { %6587 = vmatmul.msk.bf16.vlgmr.msrb.gmra.mxu3 %vm204_vm2, %v8553_v60  ;;  %6588 = vmatmul.msk.bf16.vlgmr.msrb.gmra.mxu0 %vm204_vm2, %v8553_v60 }
 0x202   :  { %6590 = vmatmul.msk.bf16.vlgmr.msra.gmra.mxu1 %vm204_vm2, %v8553_v60  ;;  %1387 = vmatpush.bf16.msrb.mxu3 %v6614_v47  ;;  %v6634_v60 = vor.u32 %v7823_v56, %v6633_v55 }
 0x203   :  { %1400 = vmatpush.bf16.msrb.mxu0 %v6618_v48  ;;  %1426 = vmatpush.bf16.msra.mxu1 %v6626_v49  ;;  %v7831_v49 = vld [vmem:[%s10491_s0 + $0x50] sm:$0xff] }
 0x209   :  { %6649 = vmatmul.msk.bf16.vlgmr.msrb.gmra.mxu2 %vm204_vm2, %v1436_v51 }
 0x211   :  { %6607 = vmatmul.msk.bf16.vlgmr.msra.gmra.mxu3 %vm204_vm2, %v8585_v24  ;;  %6608 = vmatmul.msk.bf16.vlgmr.msra.gmra.mxu0 %vm204_vm2, %v8585_v24 }
 0x212   :  { %6610 = vmatmul.msk.bf16.vlgmr.msrb.gmra.mxu1 %vm204_vm2, %v8585_v24  ;;  %1471 = vmatpush.bf16.msra.mxu3 %v6634_v60  ;;  %v8715_v24 = vld [vmem:[%s10489_s1 + $0x10] sm:$0xff] }
 0x213   :  { %1484 = vmatpush.bf16.msra.mxu0 %v6638_v61  ;;  %1510 = vmatpush.bf16.msrb.mxu1 %v6646_v62 }
 0x219   :  { %6669 = vmatmul.msk.bf16.vlgmr.msra.gmra.mxu2 %vm204_vm2, %v1520_v8 }
 0x221   :  { %6627 = vmatmul.msk.bf16.vlgmr.msrb.gmra.mxu3 %vm204_vm2, %v1352_v38  ;;  %6628 = vmatmul.msk.bf16.vlgmr.msrb.gmra.mxu0 %vm204_vm2, %v1352_v38 }
 0x222   :  { %6630 = vmatmul.msk.bf16.vlgmr.msra.gmra.mxu1 %vm204_vm2, %v1352_v38  ;;  %1555 = vmatpush.bf16.msrb.mxu3 %v6654_v15 }
 0x223   :  { %1568 = vmatpush.bf16.msrb.mxu0 %v6658_v17  ;;  %1594 = vmatpush.bf16.msra.mxu1 %v6666_v18 }
 0x231   :  { %6647 = vmatmul.msk.bf16.vlgmr.msra.gmra.mxu3 %vm204_vm2, %v1436_v51  ;;  %6648 = vmatmul.msk.bf16.vlgmr.msra.gmra.mxu0 %vm204_vm2, %v1436_v51 }
 0x232   :  { %6650 = vmatmul.msk.bf16.vlgmr.msrb.gmra.mxu1 %vm204_vm2, %v1436_v51  ;;  %1646 = vmatpush.bf16.msra.mxu3 %v8697_v20 }
 0x236   :  { %1647 = vmatpush.bf16.msra.mxu3 %v8703_v21 }
 0x23a   :  { %1648 = vmatpush.bf16.msra.mxu3 %v8709_v22 }
 0x23e   :  { %v982_v23 = vpop.f32.mrf.mxu0  ;;  %1649 = vmatpush.bf16.msra.mxu3 %v8715_v24 }
 0x23f   :  { %v1013_v26 = vadd.f32 %v982_v23, %v8473_v7  ;;  %v995_v27 = vpop.f32.mrf.mxu1 }
 0x240   :  { %v1014_v28 = vadd.f32 %v995_v27, %v8445_v25  ;;  %v8733_v25 = vld [vmem:[%s10489_s1] sm:$0xff] }
 0x241   :  { %6667 = vmatmul.msk.bf16.vlgmr.msrb.gmra.mxu3 %vm204_vm2, %v1520_v8  ;;  %6668 = vmatmul.msk.bf16.vlgmr.msrb.gmra.mxu0 %vm204_vm2, %v1520_v8 }
 0x242   :  { %6670 = vmatmul.msk.bf16.vlgmr.msra.gmra.mxu1 %vm204_vm2, %v1520_v8  ;;  %1650 = vmatpush.bf16.msra.mxu3 %v8726_v29 }
 0x244   :  { %v969_v30 = vpop.f32.mrf.mxu3 }
 0x245   :  { %v1012_v32 = vadd.f32 %v969_v30, %v8471_v63 }
 0x246   :  { %v984_v7 = vpop.f32.mrf.mxu0  ;;  %1651 = vmatpush.bf16.msra.mxu3 %v8733_v25 }
 0x247   :  { %v997_v33 = vpop.f32.mrf.mxu1 }
 0x24c   :  { %v971_v16 = vpop.f32.mrf.mxu3 }
 0x24e   :  { %v1053_v35 = vpop.f32.mrf.mxu0 }
 0x24f   :  { %v1096_v0 = vadd.f32 %v1053_v35, %v1012_v32  ;;  %v1066_v1 = vpop.f32.mrf.mxu1 }
 0x250   :  { %v1097_v36 = vadd.f32 %v1066_v1, %v1013_v26 }
 0x251   :  { %6687 = vmatmul.msk.bf16.vlgmr.msra.gmra.mxu3 %vm108_vm0, %v7829_v34 }
 0x254   :  { %v1008_v63 = vpop.f32.mrf.mxu3 }
 0x255   :  { %v1015_v2 = vadd.f32 %v1008_v63, %v8487_v19 }
 0x256   :  { %v1055_v3 = vpop.f32.mrf.mxu0 }
 0x257   :  { %v1068_v37 = vpop.f32.mrf.mxu1 }
 0x25c   :  { %v1010_v38 = vpop.f32.mrf.mxu3  ;;  %v1247_v39 = vpop.f32.mrf.mxu2 }
 0x25e   :  { %v1092_v40 = vpop.f32.mrf.mxu0 }
 0x25f   :  { %v1099_v41 = vadd.f32 %v1092_v40, %v1015_v2  ;;  %v1137_v42 = vpop.f32.mrf.mxu1 }
 0x260   :  { %v1180_v43 = vadd.f32 %v1137_v42, %v1096_v0 }
 0x261   :  { %6688 = vmatmul.msk.bf16.gmra.mxu3 %vm108_vm0, %v7830_v4 }
 0x264   :  { %v1079_v5 = vpop.f32.mrf.mxu3  ;;  %v1249_v44 = vpop.f32.mrf.mxu2 }
 0x265   :  { %v1098_v45 = vadd.f32 %v1079_v5, %v1014_v28  ;;  %v7835_v5 = vld [vmem:[%s10492_s3 + $0x20c] sm:$0xf0] }
 0x266   :  { %v1094_v46 = vpop.f32.mrf.mxu0 }
 0x267   :  { %v1139_v47 = vpop.f32.mrf.mxu1 }
 0x26c   :  { %v1081_v19 = vpop.f32.mrf.mxu3  ;;  %v1331_v48 = vpop.f32.mrf.mxu2 }
 0x26e   :  { %v1163_v50 = vpop.f32.mrf.mxu0 }
 0x26f   :  { %v1182_v51 = vadd.f32 %v1163_v50, %v1098_v45  ;;  %v1176_v52 = vpop.f32.mrf.mxu1 }
 0x270   :  { %v1183_v54 = vadd.f32 %v1176_v52, %v1099_v41  ;;  %v7833_v52 = vld [vmem:[%s10492_s3 + $0x204] sm:$0xf] }
 0x271   :  { %v1266_v55 = vadd.f32 %v1247_v39, %v1182_v51  ;;  %6689 = vmatmul.msk.bf16.gmra.mxu3 %vm108_vm0, %v7831_v49 }
 0x273   :  { %v1350_v56 = vadd.f32 %v1331_v48, %v1266_v55  ;;  %v6701_v55 = vld [vmem:[%s10492_s3 + $0x208] sm:$0xf] }
 0x274   :  { %v1150_v57 = vpop.f32.mrf.mxu3  ;;  %v1333_v53 = vpop.f32.mrf.mxu2 }
 0x275   :  { %v1181_v31 = vadd.f32 %v1150_v57, %v1097_v36  ;;  %v7836_v57 = vld [vmem:[%s10492_s3 + $0x214] sm:$0xf0] }
 0x276   :  { %v1165_v58 = vpop.f32.mrf.mxu0  ;;  %v6702_v53 = vor.u32 %v7836_v57, %v6701_v55 }
 0x277   :  { %v1178_v59 = vpop.f32.mrf.mxu1 }
 0x278   :  { %1758 = vmatpush.bf16.msrb.mxu1 %v6702_v53 }
 0x27c   :  { %v1152_v60 = vpop.f32.mrf.mxu3  ;;  %v1415_v61 = vpop.f32.mrf.mxu2 }
 0x27d   :  { %v1434_v62 = vadd.f32 %v1415_v61, %v1350_v56 }
 0x27e   :  { %v1234_v8 = vpop.f32.mrf.mxu0 }
 0x27f   :  { %v1265_v9 = vadd.f32 %v1234_v8, %v1181_v31  ;;  %v1260_v10 = vpop.f32.mrf.mxu1 }
 0x280   :  { %v1267_v11 = vadd.f32 %v1260_v10, %v1183_v54  ;;  %v6695_v54 = vld [vmem:[%s10492_s3 + $0x210] sm:$0xf0] }
 0x281   :  { %6690 = vmatmul.msk.bf16.gmra.mxu3 %vm108_vm0, %v7832_v6  ;;  %v6698_v56 = vor.u32 %v7833_v52, %v6695_v54  ;;  %v6703_v6 = vld [vmem:[%s10492_s3 + $0x218] sm:$0xf0] }
 0x283   :  { %1745 = vmatpush.bf16.msrb.mxu2 %v6698_v56 }
 0x284   :  { %v1221_v12 = vpop.f32.mrf.mxu3  ;;  %v1417_v13 = vpop.f32.mrf.mxu2 }
 0x285   :  { %v1264_v14 = vadd.f32 %v1221_v12, %v1180_v43  ;;  %v6693_v43 = vld [vmem:[%s10492_s3 + $0x200] sm:$0xf] }
 0x286   :  { %v1236_v15 = vpop.f32.mrf.mxu0  ;;  %v6694_v44 = vor.u32 %v7835_v5, %v6693_v43  ;;  %v6713_v13 = vld [vmem:[%s10492_s3 + $0x220] sm:$0xf] }
 0x287   :  { %v1262_v17 = vpop.f32.mrf.mxu1  ;;  %v7837_v15 = vld [vmem:[%s10492_s3 + $0x224] sm:$0xf] }
 0x288   :  { %1732 = vmatpush.bf16.msra.mxu0 %v6694_v44 }
 0x28c   :  { %v1223_v18 = vpop.f32.mrf.mxu3  ;;  %v1499_v23 = vpop.f32.mrf.mxu2 }
 0x28d   :  { %v1518_v26 = vadd.f32 %v1499_v23, %v1434_v62  ;;  %v7834_v62 = vld [vmem:[%s10492_s3 + $0x20c] sm:$0xf]  ;;  %v6715_v18 = vld [vmem:[%s10492_s3 + $0x230] sm:$0xf0] }
 0x28e   :  { %v1318_v27 = vpop.f32.mrf.mxu0  ;;  %v6706_v8 = vor.u32 %v7834_v62, %v6703_v6  ;;  %v6718_v23 = vor.u32 %v7837_v15, %v6715_v18  ;;  %v6753_v15 = vld [vmem:[%s10492_s3 + $0x260] sm:$0xf]  ;;  %v7845_v18 = vld [vmem:[%s10492_s3 + $0x264] sm:$0xf] }
 0x28f   :  { %v1349_v28 = vadd.f32 %v1318_v27, %v1265_v9  ;;  %v1344_v30 = vpop.f32.mrf.mxu1  ;;  %v6761_v27 = vld [vmem:[%s10492_s3 + $0x268] sm:$0xf] }
 0x290   :  { %v1351_v32 = vadd.f32 %v1344_v30, %v1267_v11  ;;  %1771 = vmatpush.bf16.msrb.mxu0 %v6706_v8  ;;  %1829 = vmatpush.bf16.msra.mxu1 %v6718_v23  ;;  %v6755_v23 = vld [vmem:[%s10492_s3 + $0x270] sm:$0xf0] }
 0x294   :  { %v1305_v7 = vpop.f32.mrf.mxu3  ;;  %v1501_v33 = vpop.f32.mrf.mxu2 }
 0x295   :  { %v1348_v16 = vadd.f32 %v1305_v7, %v1264_v14  ;;  %v7839_v14 = vld [vmem:[%s10492_s3 + $0x22c] sm:$0xf0]  ;;  %v8806_v7 = vld [vmem:[%s10490_s2] ss:$0 sm:$0xff] }
 0x296   :  { %v1320_v34 = vpop.f32.mrf.mxu0  ;;  %v6714_v17 = vor.u32 %v7839_v14, %v6713_v13 }
 0x297   :  { %v1346_v35 = vpop.f32.mrf.mxu1  ;;  %v7840_v34 = vld [vmem:[%s10492_s3 + $0x234] sm:$0xf0] }
 0x298   :  { %1816 = vmatpush.bf16.msra.mxu2 %v6714_v17  ;;  %v7838_v35 = vld [vmem:[%s10492_s3 + $0x22c] sm:$0xf]  ;;  %v7847_v17 = vld [vmem:[%s10492_s3 + $0x26c] sm:$0xf0] }
 0x29c   :  { %v1307_v0 = vpop.f32.mrf.mxu3  ;;  %v1583_v1 = vpop.f32.mrf.mxu2 }
 0x29d   :  { %v8753_v36 = vadd.f32 %v1583_v1, %v1518_v26  ;;  %v6723_v0 = vld [vmem:[%s10492_s3 + $0x238] sm:$0xf0]  ;;  %v6733_v1 = vld [vmem:[%s10492_s3 + $0x240] sm:$0xf] }
 0x29e   :  { %v1402_v63 = vpop.f32.mrf.mxu0 }
 0x29f   :  { %v1433_v2 = vadd.f32 %v1402_v63, %v1349_v28  ;;  %v1428_v3 = vpop.f32.mrf.mxu1  ;;  %v7848_v28 = vld [vmem:[%s10492_s3 + $0x274] sm:$0xf0] }
 0x2a0   :  { %v1435_v37 = vadd.f32 %v1428_v3, %v1351_v32  ;;  %v6762_v30 = vor.u32 %v7848_v28, %v6761_v27  ;;  %v6763_v27 = vld [vmem:[%s10492_s3 + $0x278] sm:$0xf0] }
 0x2a2   :  { %2010 = vmatpush.bf16.msrb.mxu3 %v6762_v30 }
 0x2a4   :  { %v1389_v38 = vpop.f32.mrf.mxu3  ;;  %v1585_v39 = vpop.f32.mrf.mxu2 }
 0x2a5   :  { %v1432_v4 = vadd.f32 %v1389_v38, %v1348_v16  ;;  %v6721_v16 = vld [vmem:[%s10492_s3 + $0x228] sm:$0xf]  ;;  %v6726_v39 = vor.u32 %v7838_v35, %v6723_v0  ;;  %v7860_v0 = vld [vmem:[%s10492_s3 + $0x2d4] sm:$0xf0] }
 0x2a6   :  { %v1404_v40 = vpop.f32.mrf.mxu0  ;;  %v6821_v35 = vld [vmem:[%s10492_s3 + $0x2c8] sm:$0xf] }
 0x2a7   :  { %v1430_v41 = vpop.f32.mrf.mxu1 }
 0x2a8   :  { %v6781_v41 = vld [vmem:[%s10492_s3 + $0x288] sm:$0xf] }
 0x2ac   :  { %v1391_v42 = vpop.f32.mrf.mxu3 }
 0x2ad   :  { %v7852_v42 = vld [vmem:[%s10492_s3 + $0x294] sm:$0xf0] }
 0x2ae   :  { %v1486_v45 = vpop.f32.mrf.mxu0  ;;  %v6782_v5 = vor.u32 %v7852_v42, %v6781_v41  ;;  %v6783_v41 = vld [vmem:[%s10492_s3 + $0x298] sm:$0xf0] }
 0x2af   :  { %v1517_v46 = vadd.f32 %v1486_v45, %v1433_v2  ;;  %v1512_v47 = vpop.f32.mrf.mxu1  ;;  %v7843_v2 = vld [vmem:[%s10492_s3 + $0x24c] sm:$0xf0] }
 0x2b0   :  { %v1519_v19 = vadd.f32 %v1512_v47, %v1435_v37  ;;  %v6722_v37 = vor.u32 %v7840_v34, %v6721_v16  ;;  %2094 = vmatpush.bf16.msra.mxu3 %v6782_v5  ;;  %v6735_v47 = vld [vmem:[%s10492_s3 + $0x250] sm:$0xf0] }
 0x2b4   :  { %v1473_v48 = vpop.f32.mrf.mxu3 }
 0x2b5   :  { %v1516_v49 = vadd.f32 %v1473_v48, %v1432_v4  ;;  %v6734_v4 = vor.u32 %v7843_v2, %v6733_v1 }
 0x2b6   :  { %v1488_v50 = vpop.f32.mrf.mxu0 }
 0x2b7   :  { %v1514_v51 = vpop.f32.mrf.mxu1  ;;  %v7842_v50 = vld [vmem:[%s10492_s3 + $0x24c] sm:$0xf] }
 0x2b8   :  { %v6743_v51 = vld [vmem:[%s10492_s3 + $0x258] sm:$0xf0] }
 0x2b9   :  { %v6746_v56 = vor.u32 %v7842_v50, %v6743_v51  ;;  %v6793_v51 = vld [vmem:[%s10492_s3 + $0x2a0] sm:$0xf] }
 0x2bc   :  { %v1475_v31 = vpop.f32.mrf.mxu3 }
 0x2be   :  { %v1570_v58 = vpop.f32.mrf.mxu0 }
 0x2bf   :  { %v8773_v59 = vadd.f32 %v1570_v58, %v1517_v46  ;;  %v1596_v60 = vpop.f32.mrf.mxu1  ;;  %v7841_v46 = vld [vmem:[%s10492_s3 + $0x244] sm:$0xf]  ;;  %v6801_v58 = vld [vmem:[%s10492_s3 + $0x2a8] sm:$0xf] }
 0x2c0   :  { %v8775_v61 = vadd.f32 %v1596_v60, %v1519_v19  ;;  %v6741_v19 = vld [vmem:[%s10492_s3 + $0x248] sm:$0xf]  ;;  %v6738_v52 = vor.u32 %v7841_v46, %v6735_v47  ;;  %v7856_v60 = vld [vmem:[%s10492_s3 + $0x2b4] sm:$0xf0] }
 0x2c1   :  { %v6802_v8 = vor.u32 %v7856_v60, %v6801_v58  ;;  %v6841_v46 = vld [vmem:[%s10492_s3 + $0x2e8] sm:$0xf]  ;;  %v7864_v47 = vld [vmem:[%s10492_s3 + $0x2f4] sm:$0xf0] }
 0x2c4   :  { %v1557_v9 = vpop.f32.mrf.mxu3 }
 0x2c5   :  { %v8783_v10 = vadd.f32 %v1557_v9, %v1516_v49  ;;  %v7844_v49 = vld [vmem:[%s10492_s3 + $0x254] sm:$0xf0] }
 0x2c6   :  { %v1572_v11 = vpop.f32.mrf.mxu0  ;;  %v6742_v55 = vor.u32 %v7844_v49, %v6741_v19 }
 0x2c7   :  { %v1598_v12 = vpop.f32.mrf.mxu1 }
 0x2cc   :  { %v1559_v26 = vpop.f32.mrf.mxu3 }
 0x2cd   :  { %v7846_v26 = vld [vmem:[%s10492_s3 + $0x26c] sm:$0xf] }
 0x2ce   :  { %v6766_v16 = vor.u32 %v7846_v26, %v6763_v27 }
 0x2d4   :  { %v1653_v32 = vpop.f32.mrf.mxu3 }
 0x2d5   :  { %v1654_v33 = vadd.f32 %v8806_v7, %v1653_v32  ;;  %v6754_v32 = vor.u32 %v7847_v17, %v6753_v15  ;;  %v7858_v15 = vld [vmem:[%s10492_s3 + $0x2cc] sm:$0xf]  ;;  %v6823_v17 = vld [vmem:[%s10492_s3 + $0x2d8] sm:$0xf0] }
 0x2d6   :  { %v6826_v27 = vor.u32 %v7858_v15, %v6823_v17  ;;  %v7868_v17 = vld [vmem:[%s10491_s0 + $0x78] sm:$0xff] }
 0x2d7   :  { %vm1673_vm4 = vcmp.gt.f32.partialorder %v1654_v33, 0.0  ;;  %v1681_v63 = vmul.f32 0.2, %v1654_v33 }
 0x2d9   :  { %v1689_v3 = vsel %vm1673_vm4, %v1654_v33, %v1681_v63  ;;  %v6758_v33 = vor.u32 %v7845_v18, %v6755_v23  ;;  %v6822_v63 = vor.u32 %v7860_v0, %v6821_v35  ;;  %v7862_v35 = vld [vmem:[%s10492_s3 + $0x2ec] sm:$0xf]  ;;  %v6843_v0 = vld [vmem:[%s10492_s3 + $0x2f8] sm:$0xf0] }
 0x2da   :  { %v1697_v38 = vpack.c.bf16 %v1689_v3, %v1689_v3 }
 0x2dc   :  { %v1655_v40 = vpop.f32.mrf.mxu3  ;;  %6707 = vmatmul.msk.bf16.vlgmr.msra.gmra.mxu0 %vm204_vm2, %v1697_v38  ;;  %6708 = vmatmul.msk.bf16.vlgmr.msrb.gmra.mxu2 %vm204_vm2, %v1697_v38 }
 0x2dd   :  { %6709 = vmatmul.msk.bf16.vlgmr.msrb.gmra.mxu1 %vm204_vm2, %v1697_v38  ;;  %1842 = vmatpush.bf16.msra.mxu0 %v6722_v37  ;;  %v1656_v43 = vadd.f32 %v8806_v7, %v1655_v40  ;;  %v6773_v37 = vld [vmem:[%s10492_s3 + $0x280] sm:$0xf]  ;;  %v7850_v40 = vld [vmem:[%s10492_s3 + $0x28c] sm:$0xf] }
 0x2de   :  { %1855 = vmatpush.bf16.msrb.mxu2 %v6726_v39  ;;  %1900 = vmatpush.bf16.msrb.mxu1 %v6734_v4  ;;  %v7849_v39 = vld [vmem:[%s10492_s3 + $0x284] sm:$0xf]  ;;  %v6775_v4 = vld [vmem:[%s10492_s3 + $0x290] sm:$0xf0] }
 0x2df   :  { %v1682_v44 = vmul.f32 0.2, %v1656_v43  ;;  %vm1674_vm5 = vcmp.gt.f32.partialorder %v1656_v43, 0.0  ;;  %v6778_v5 = vor.u32 %v7849_v39, %v6775_v4 }
 0x2e1   :  { %v1690_v48 = vsel %vm1674_vm5, %v1656_v43, %v1682_v44  ;;  %v6786_v44 = vor.u32 %v7850_v40, %v6783_v41 }
 0x2e2   :  { %v1781_v54 = vpack.c.bf16 %v1690_v48, %v1690_v48  ;;  %v6842_v48 = vor.u32 %v7864_v47, %v6841_v46 }
 0x2e4   :  { %v1658_v45 = vpop.f32.mrf.mxu3 }
 0x2e5   :  { %v1659_v31 = vadd.f32 %v8806_v7, %v1658_v45 }
 0x2e7   :  { %v1683_v9 = vmul.f32 0.2, %v1659_v31  ;;  %vm1675_vm7 = vcmp.gt.f32.partialorder %v1659_v31, 0.0 }
 0x2e9   :  { %v1691_v14 = vsel %vm1675_vm7, %v1659_v31, %v1683_v9 }
 0x2ea   :  { %v1865_v28 = vpack.c.bf16 %v1691_v14, %v1691_v14  ;;  %v6815_v14 = vld [vmem:[%s10492_s3 + $0x2d0] sm:$0xf0] }
 0x2ec   :  { %v1660_v57 = vpop.f32.mrf.mxu3  ;;  %6710 = vmatmul.msk.bf16.vlgmr.msrb.gmra.mxu0 %vm204_vm2, %v1697_v38  ;;  %6727 = vmatmul.msk.bf16.vlgmr.msra.gmra.mxu2 %vm204_vm2, %v1781_v54  ;;  %v7851_v38 = vld [vmem:[%s10492_s3 + $0x28c] sm:$0xf0] }
 0x2ed   :  { %v1661_v53 = vadd.f32 %v8806_v7, %v1660_v57  ;;  %6728 = vmatmul.msk.bf16.vlgmr.msra.gmra.mxu1 %vm204_vm2, %v1781_v54  ;;  %1913 = vmatpush.bf16.msrb.mxu0 %v6738_v52  ;;  %v6774_v43 = vor.u32 %v7851_v38, %v6773_v37  ;;  %v7855_v52 = vld [vmem:[%s10492_s3 + $0x2ac] sm:$0xf0]  ;;  %v6803_v57 = vld [vmem:[%s10492_s3 + $0x2b8] sm:$0xf0] }
 0x2ee   :  { %1926 = vmatpush.bf16.msra.mxu2 %v6742_v55  ;;  %1939 = vmatpush.bf16.msra.mxu1 %v6746_v56  ;;  %v6795_v55 = vld [vmem:[%s10492_s3 + $0x2b0] sm:$0xf0]  ;;  %v7854_v56 = vld [vmem:[%s10492_s3 + $0x2ac] sm:$0xf]  ;;  %v6794_v31 = vor.u32 %v7855_v52, %v6793_v51 }
 0x2ef   :  { %vm1676_vm6 = vcmp.gt.f32.partialorder %v1661_v53, 0.0  ;;  %v1684_v62 = vmul.f32 0.2, %v1661_v53  ;;  %v6806_v60 = vor.u32 %v7854_v56, %v6803_v57  ;;  %v7867_v56 = vld [vmem:[%s10491_s0 + $0x70] sm:$0xff] }
 0x2f1   :  { %v1692_v6 = vsel %vm1676_vm6, %v1661_v53, %v1684_v62 }
 0x2f2   :  { %v8866_v11 = vpack.c.bf16 %v1692_v6, %v1692_v6 }
 0x2f4   :  { %6769 = vmatmul.msk.bf16.vlgmr.msrb.gmra.mxu3 %vm204_vm2, %v8866_v11  ;;  %v1663_v12 = vpop.f32.mrf.mxu3 }
 0x2f5   :  { %v1664_v13 = vadd.f32 %v8806_v7, %v1663_v12  ;;  %2178 = vmatpush.bf16.msrb.mxu3 %v6802_v8  ;;  %v6813_v12 = vld [vmem:[%s10492_s3 + $0x2c0] sm:$0xf] }
 0x2f7   :  { %v1685_v30 = vmul.f32 0.2, %v1664_v13  ;;  %vm1677_vm8 = vcmp.gt.f32.partialorder %v1664_v13, 0.0 }
 0x2f9   :  { %v1693_v34 = vsel %vm1677_vm8, %v1664_v13, %v1685_v30  ;;  %v7859_v13 = vld [vmem:[%s10492_s3 + $0x2cc] sm:$0xf0] }
 0x2fa   :  { %v8898_v1 = vpack.c.bf16 %v1693_v34, %v1693_v34  ;;  %v6814_v23 = vor.u32 %v7859_v13, %v6813_v12  ;;  %v6835_v34 = vld [vmem:[%s10492_s3 + $0x2f0] sm:$0xf0] }
 0x2fc   :  { %6729 = vmatmul.msk.bf16.vlgmr.msra.gmra.mxu0 %vm204_vm2, %v1781_v54  ;;  %6730 = vmatmul.msk.bf16.vlgmr.msrb.gmra.mxu2 %vm204_vm2, %v1781_v54  ;;  %v1665_v2 = vpop.f32.mrf.mxu3  ;;  %v7853_v54 = vld [vmem:[%s10492_s3 + $0x2a4] sm:$0xf] }
 0x2fd   :  { %6747 = vmatmul.msk.bf16.vlgmr.msrb.gmra.mxu1 %vm204_vm2, %v1865_v28  ;;  %1984 = vmatpush.bf16.msra.mxu0 %v6754_v32  ;;  %v1666_v3 = vadd.f32 %v8806_v7, %v1665_v2  ;;  %v6798_v58 = vor.u32 %v7853_v54, %v6795_v55  ;;  %v6833_v32 = vld [vmem:[%s10492_s3 + $0x2e0] sm:$0xf]  ;;  %v6846_v2 = vor.u32 %v7862_v35, %v6843_v0 }
 0x2fe   :  { %1997 = vmatpush.bf16.msrb.mxu2 %v6758_v33  ;;  %2023 = vmatpush.bf16.msrb.mxu1 %v6766_v16  ;;  %v7863_v33 = vld [vmem:[%s10492_s3 + $0x2ec] sm:$0xf0]  ;;  %v7861_v16 = vld [vmem:[%s10492_s3 + $0x2e4] sm:$0xf] }
 0x2ff   :  { %v1686_v42 = vmul.f32 0.2, %v1666_v3  ;;  %vm1678_vm9 = vcmp.gt.f32.partialorder %v1666_v3, 0.0 }
 0x301   :  { %v1694_v45 = vsel %vm1678_vm9, %v1666_v3, %v1686_v42 }
 0x302   :  { %v2117_v19 = vpack.c.bf16 %v1694_v45, %v1694_v45 }
 0x304   :  { %6789 = vmatmul.msk.bf16.vlgmr.msra.gmra.mxu3 %vm204_vm2, %v8898_v1  ;;  %v1668_v49 = vpop.f32.mrf.mxu3 }
 0x305   :  { %2262 = vmatpush.bf16.msra.mxu3 %v6822_v63  ;;  %v1669_v50 = vadd.f32 %v8806_v7, %v1668_v49  ;;  %v6838_v63 = vor.u32 %v7861_v16, %v6835_v34 }
 0x307   :  { %v1687_v53 = vmul.f32 0.2, %v1669_v50  ;;  %vm1679_vm10 = vcmp.gt.f32.partialorder %v1669_v50, 0.0 }
 0x309   :  { %v1695_v62 = vsel %vm1679_vm10, %v1669_v50, %v1687_v53 }
 0x30a   :  { %v2201_v6 = vpack.c.bf16 %v1695_v62, %v1695_v62 }
 0x30c   :  { %6748 = vmatmul.msk.bf16.vlgmr.msrb.gmra.mxu0 %vm204_vm2, %v1865_v28  ;;  %6749 = vmatmul.msk.bf16.vlgmr.msra.gmra.mxu2 %vm204_vm2, %v1865_v28  ;;  %v1670_v8 = vpop.f32.mrf.mxu3 }
 0x30d   :  { %6750 = vmatmul.msk.bf16.vlgmr.msra.gmra.mxu1 %vm204_vm2, %v1865_v28  ;;  %2068 = vmatpush.bf16.msrb.mxu0 %v6774_v43  ;;  %v1671_v9 = vadd.f32 %v8806_v7, %v1670_v8 }
 0x30e   :  { %2081 = vmatpush.bf16.msra.mxu2 %v6778_v5  ;;  %2107 = vmatpush.bf16.msra.mxu1 %v6786_v44 }
 0x30f   :  { %v1688_v18 = vmul.f32 0.2, %v1671_v9  ;;  %vm1680_vm11 = vcmp.gt.f32.partialorder %v1671_v9, 0.0 }
 0x311   :  { %v1696_v28 = vsel %vm1680_vm11, %v1671_v9, %v1688_v18 }
 0x312   :  { %v2285_v30 = vpack.c.bf16 %v1696_v28, %v1696_v28 }
 0x314   :  { %6809 = vmatmul.msk.bf16.vlgmr.msrb.gmra.mxu3 %vm204_vm2, %v2117_v19 }
 0x315   :  { %2346 = vmatpush.bf16.msrb.mxu3 %v6842_v48 }
 0x31c   :  { %6767 = vmatmul.msk.bf16.vlgmr.msra.gmra.mxu0 %vm204_vm2, %v8866_v11  ;;  %6768 = vmatmul.msk.bf16.vlgmr.msrb.gmra.mxu2 %vm204_vm2, %v8866_v11 }
 0x31d   :  { %6770 = vmatmul.msk.bf16.vlgmr.msrb.gmra.mxu1 %vm204_vm2, %v8866_v11  ;;  %2152 = vmatpush.bf16.msra.mxu0 %v6794_v31  ;;  %v7857_v11 = vld [vmem:[%s10492_s3 + $0x2c4] sm:$0xf] }
 0x31e   :  { %2165 = vmatpush.bf16.msrb.mxu2 %v6798_v58  ;;  %2191 = vmatpush.bf16.msrb.mxu1 %v6806_v60  ;;  %v6818_v26 = vor.u32 %v7857_v11, %v6815_v14 }
 0x324   :  { %6829 = vmatmul.msk.bf16.vlgmr.msra.gmra.mxu3 %vm204_vm2, %v2201_v6 }
 0x32c   :  { %6787 = vmatmul.msk.bf16.vlgmr.msrb.gmra.mxu0 %vm204_vm2, %v8898_v1  ;;  %6788 = vmatmul.msk.bf16.vlgmr.msra.gmra.mxu2 %vm204_vm2, %v8898_v1 }
 0x32d   :  { %6790 = vmatmul.msk.bf16.vlgmr.msra.gmra.mxu1 %vm204_vm2, %v8898_v1  ;;  %2236 = vmatpush.bf16.msrb.mxu0 %v6814_v23  ;;  %v6834_v1 = vor.u32 %v7863_v33, %v6833_v32 }
 0x32e   :  { %2249 = vmatpush.bf16.msra.mxu2 %v6818_v26  ;;  %2275 = vmatpush.bf16.msra.mxu1 %v6826_v27 }
 0x334   :  { %6849 = vmatmul.msk.bf16.vlgmr.msrb.gmra.mxu3 %vm204_vm2, %v2285_v30 }
 0x33c   :  { %6807 = vmatmul.msk.bf16.vlgmr.msra.gmra.mxu0 %vm204_vm2, %v2117_v19  ;;  %6808 = vmatmul.msk.bf16.vlgmr.msrb.gmra.mxu2 %vm204_vm2, %v2117_v19 }
 0x33d   :  { %6810 = vmatmul.msk.bf16.vlgmr.msrb.gmra.mxu1 %vm204_vm2, %v2117_v19  ;;  %2320 = vmatpush.bf16.msra.mxu0 %v6834_v1 }
 0x33e   :  { %2333 = vmatpush.bf16.msrb.mxu2 %v6838_v63  ;;  %2359 = vmatpush.bf16.msrb.mxu1 %v6846_v2 }
 0x34c   :  { %6827 = vmatmul.msk.bf16.vlgmr.msrb.gmra.mxu0 %vm204_vm2, %v2201_v6  ;;  %6828 = vmatmul.msk.bf16.vlgmr.msra.gmra.mxu2 %vm204_vm2, %v2201_v6 }
 0x34d   :  { %6830 = vmatmul.msk.bf16.vlgmr.msra.gmra.mxu1 %vm204_vm2, %v2201_v6  ;;  %2411 = vmatpush.bf16.msrb.mxu0 %v8697_v20 }
 0x351   :  { %2412 = vmatpush.bf16.msrb.mxu0 %v8703_v21 }
 0x355   :  { %2413 = vmatpush.bf16.msrb.mxu0 %v8709_v22 }
 0x359   :  { %v1734_v3 = vpop.f32.mrf.mxu0  ;;  %2414 = vmatpush.bf16.msrb.mxu0 %v8715_v24 }
 0x35a   :  { %v1777_v37 = vadd.f32 %v1734_v3, %v8783_v10  ;;  %v1760_v38 = vpop.f32.mrf.mxu1 }
 0x35b   :  { %v1779_v39 = vadd.f32 %v1760_v38, %v8753_v36  ;;  %v7865_v36 = vld [vmem:[%s10491_s0 + $0x60] sm:$0xff] }
 0x35c   :  { %6847 = vmatmul.msk.bf16.vlgmr.msra.gmra.mxu0 %vm204_vm2, %v2285_v30  ;;  %6848 = vmatmul.msk.bf16.vlgmr.msrb.gmra.mxu2 %vm204_vm2, %v2285_v30 }
 0x35d   :  { %6850 = vmatmul.msk.bf16.vlgmr.msrb.gmra.mxu1 %vm204_vm2, %v2285_v30  ;;  %2415 = vmatpush.bf16.msrb.mxu0 %v8726_v29 }
 0x35f   :  { %v1747_v20 = vpop.f32.mrf.mxu2 }
 0x360   :  { %v1778_v21 = vadd.f32 %v1747_v20, %v8773_v59 }
 0x361   :  { %v1736_v22 = vpop.f32.mrf.mxu0  ;;  %2416 = vmatpush.bf16.msrb.mxu0 %v8733_v25  ;;  %v7866_v25 = vld [vmem:[%s10491_s0 + $0x68] sm:$0xff] }
 0x362   :  { %v1762_v24 = vpop.f32.mrf.mxu1 }
 0x367   :  { %v1749_v4 = vpop.f32.mrf.mxu2 }
 0x369   :  { %v1773_v10 = vpop.f32.mrf.mxu0 }
 0x36a   :  { %v1780_v40 = vadd.f32 %v1773_v10, %v8775_v61  ;;  %v1831_v41 = vpop.f32.mrf.mxu1 }
 0x36b   :  { %v1862_v42 = vadd.f32 %v1831_v41, %v1778_v21 }
 0x36c   :  { %6867 = vmatmul.msk.bf16.vlgmr.msrb.gmra.mxu0 %vm108_vm0, %v7865_v36 }
 0x36f   :  { %v1818_v29 = vpop.f32.mrf.mxu2 }
 0x370   :  { %v1861_v43 = vadd.f32 %v1818_v29, %v1777_v37 }
 0x371   :  { %v1775_v5 = vpop.f32.mrf.mxu0 }
 0x372   :  { %v1833_v59 = vpop.f32.mrf.mxu1 }
 0x377   :  { %v1820_v44 = vpop.f32.mrf.mxu2  ;;  %v2012_v45 = vpop.f32.mrf.mxu3 }
 0x378   :  { %v6873_v44 = vld [vmem:[%s10492_s3 + $0x300] sm:$0xf] }
 0x379   :  { %v1844_v46 = vpop.f32.mrf.mxu0 }
 0x37a   :  { %v1863_v47 = vadd.f32 %v1844_v46, %v1779_v39  ;;  %v1902_v19 = vpop.f32.mrf.mxu1 }
 0x37b   :  { %v1945_v48 = vadd.f32 %v1902_v19, %v1861_v43 }
 0x37c   :  { %6868 = vmatmul.msk.bf16.gmra.mxu0 %vm108_vm0, %v7866_v25 }
 0x37f   :  { %v1857_v61 = vpop.f32.mrf.mxu2  ;;  %v2014_v49 = vpop.f32.mrf.mxu3 }
 0x380   :  { %v1864_v50 = vadd.f32 %v1857_v61, %v1780_v40  ;;  %v7869_v49 = vld [vmem:[%s10492_s3 + $0x304] sm:$0xf] }
 0x381   :  { %v1846_v51 = vpop.f32.mrf.mxu0 }
 0x382   :  { %v1904_v52 = vpop.f32.mrf.mxu1  ;;  %v6881_v51 = vld [vmem:[%s10492_s3 + $0x308] sm:$0xf] }
 0x387   :  { %v1859_v54 = vpop.f32.mrf.mxu2  ;;  %v2096_v55 = vpop.f32.mrf.mxu3 }
 0x388   :  { %v7872_v54 = vld [vmem:[%s10492_s3 + $0x314] sm:$0xf0] }
 0x389   :  { %v1915_v57 = vpop.f32.mrf.mxu0 }
 0x38a   :  { %v1946_v53 = vadd.f32 %v1915_v57, %v1862_v42  ;;  %v1941_v31 = vpop.f32.mrf.mxu1 }
 0x38b   :  { %v1948_v58 = vadd.f32 %v1941_v31, %v1864_v50  ;;  %v6875_v50 = vld [vmem:[%s10492_s3 + $0x310] sm:$0xf0] }
 0x38c   :  { %6869 = vmatmul.msk.bf16.gmra.mxu0 %vm108_vm0, %v7867_v56  ;;  %v6878_v52 = vor.u32 %v7869_v49, %v6875_v50 }
 0x38e   :  { %2510 = vmatpush.bf16.msra.mxu3 %v6878_v52 }
 0x38f   :  { %v1928_v60 = vpop.f32.mrf.mxu2  ;;  %v2098_v62 = vpop.f32.mrf.mxu3 }
 0x390   :  { %v1947_v6 = vadd.f32 %v1928_v60, %v1863_v47  ;;  %v7870_v60 = vld [vmem:[%s10492_s3 + $0x30c] sm:$0xf]  ;;  %v6883_v62 = vld [vmem:[%s10492_s3 + $0x318] sm:$0xf0] }
 0x391   :  { %v1917_v8 = vpop.f32.mrf.mxu0 }
 0x392   :  { %v2031_v9 = vadd.f32 %v2012_v45, %v1947_v6  ;;  %v1943_v12 = vpop.f32.mrf.mxu1  ;;  %v7871_v45 = vld [vmem:[%s10492_s3 + $0x30c] sm:$0xf0]  ;;  %v6886_v6 = vor.u32 %v7870_v60, %v6883_v62 }
 0x393   :  { %v6874_v25 = vor.u32 %v7871_v45, %v6873_v44  ;;  %v6915_v44 = vld [vmem:[%s10492_s3 + $0x350] sm:$0xf0]  ;;  %v6921_v45 = vld [vmem:[%s10492_s3 + $0x348] sm:$0xf] }
 0x394   :  { %v2115_v13 = vadd.f32 %v2096_v55, %v2031_v9  ;;  %v6882_v55 = vor.u32 %v7872_v54, %v6881_v51 }
 0x395   :  { %2497 = vmatpush.bf16.msra.mxu2 %v6874_v25 }
 0x396   :  { %2523 = vmatpush.bf16.msra.mxu1 %v6882_v55  ;;  %v6981_v55 = vld [vmem:[%s10492_s3 + $0x3a8] sm:$0xf] }
 0x397   :  { %v1930_v11 = vpop.f32.mrf.mxu2  ;;  %v2180_v14 = vpop.f32.mrf.mxu3 }
 0x398   :  { %v2199_v15 = vadd.f32 %v2180_v14, %v2115_v13  ;;  %v6893_v11 = vld [vmem:[%s10492_s3 + $0x320] sm:$0xf]  ;;  %v7875_v14 = vld [vmem:[%s10492_s3 + $0x32c] sm:$0xf0] }
 0x399   :  { %v1986_v18 = vpop.f32.mrf.mxu0  ;;  %2536 = vmatpush.bf16.msrb.mxu2 %v6886_v6 }
 0x39a   :  { %v2029_v23 = vadd.f32 %v1986_v18, %v1945_v48  ;;  %v2025_v26 = vpop.f32.mrf.mxu1  ;;  %v6895_v18 = vld [vmem:[%s10492_s3 + $0x330] sm:$0xf0] }
 0x39b   :  { %v2032_v27 = vadd.f32 %v2025_v26, %v1948_v58 }
 0x39c   :  { %6870 = vmatmul.msk.bf16.gmra.mxu0 %vm108_vm0, %v7868_v17  ;;  %v6894_v17 = vor.u32 %v7875_v14, %v6893_v11  ;;  %v7883_v11 = vld [vmem:[%s10492_s3 + $0x36c] sm:$0xf0]  ;;  %v7881_v14 = vld [vmem:[%s10492_s3 + $0x364] sm:$0xf] }
 0x39e   :  { %2581 = vmatpush.bf16.msrb.mxu3 %v6894_v17  ;;  %v7882_v17 = vld [vmem:[%s10492_s3 + $0x36c] sm:$0xf] }
 0x39f   :  { %v1999_v28 = vpop.f32.mrf.mxu2  ;;  %v2182_v30 = vpop.f32.mrf.mxu3 }
 0x3a0   :  { %v2030_v32 = vadd.f32 %v1999_v28, %v1946_v53 }
 0x3a1   :  { %v1988_v33 = vpop.f32.mrf.mxu0 }
 0x3a2   :  { %v2027_v16 = vpop.f32.mrf.mxu1  ;;  %v7884_v33 = vld [vmem:[%s10492_s3 + $0x374] sm:$0xf0] }
 0x3a7   :  { %v2001_v34 = vpop.f32.mrf.mxu2  ;;  %v2264_v35 = vpop.f32.mrf.mxu3 }
 0x3a8   :  { %v2283_v0 = vadd.f32 %v2264_v35, %v2199_v15  ;;  %v7873_v15 = vld [vmem:[%s10492_s3 + $0x324] sm:$0xf] }
 0x3a9   :  { %v2070_v1 = vpop.f32.mrf.mxu0 }
 0x3aa   :  { %v2113_v63 = vadd.f32 %v2070_v1, %v2029_v23  ;;  %v2109_v2 = vpop.f32.mrf.mxu1  ;;  %v6898_v23 = vor.u32 %v7873_v15, %v6895_v18  ;;  %v6901_v1 = vld [vmem:[%s10492_s3 + $0x328] sm:$0xf]  ;;  %v6935_v15 = vld [vmem:[%s10492_s3 + $0x370] sm:$0xf0]  ;;  %v6943_v18 = vld [vmem:[%s10492_s3 + $0x378] sm:$0xf0] }
 0x3ab   :  { %v2116_v3 = vadd.f32 %v2109_v2, %v2032_v27  ;;  %v7874_v2 = vld [vmem:[%s10492_s3 + $0x32c] sm:$0xf] }
 0x3ac   :  { %2594 = vmatpush.bf16.msrb.mxu1 %v6898_v23 }
 0x3af   :  { %v2083_v37 = vpop.f32.mrf.mxu2  ;;  %v2266_v38 = vpop.f32.mrf.mxu3 }
 0x3b0   :  { %v2114_v39 = vadd.f32 %v2083_v37, %v2030_v32  ;;  %v6941_v32 = vld [vmem:[%s10492_s3 + $0x368] sm:$0xf]  ;;  %v6913_v37 = vld [vmem:[%s10492_s3 + $0x340] sm:$0xf] }
 0x3b1   :  { %v2072_v20 = vpop.f32.mrf.mxu0  ;;  %v6942_v16 = vor.u32 %v7884_v33, %v6941_v32  ;;  %v6946_v32 = vor.u32 %v7882_v17, %v6943_v18  ;;  %v7015_v17 = vld [vmem:[%s10492_s3 + $0x3f0] sm:$0xf0]  ;;  %v7898_v18 = vld [vmem:[%s10492_s3 + $0x3ec] sm:$0xf] }
 0x3b2   :  { %v2111_v21 = vpop.f32.mrf.mxu1 }
 0x3b3   :  { %2775 = vmatpush.bf16.msra.mxu0 %v6942_v16  ;;  %v7001_v16 = vld [vmem:[%s10492_s3 + $0x3c8] sm:$0xf] }
 0x3b7   :  { %v2085_v22 = vpop.f32.mrf.mxu2  ;;  %v2348_v24 = vpop.f32.mrf.mxu3 }
 0x3b8   :  { %v9036_v4 = vadd.f32 %v2348_v24, %v2283_v0 }
 0x3b9   :  { %v2154_v36 = vpop.f32.mrf.mxu0 }
 0x3ba   :  { %v2197_v10 = vadd.f32 %v2154_v36, %v2113_v63  ;;  %v2193_v40 = vpop.f32.mrf.mxu1  ;;  %v7876_v63 = vld [vmem:[%s10492_s3 + $0x334] sm:$0xf0] }
 0x3bb   :  { %v2200_v41 = vadd.f32 %v2193_v40, %v2116_v3  ;;  %v6903_v3 = vld [vmem:[%s10492_s3 + $0x338] sm:$0xf0]  ;;  %v6902_v21 = vor.u32 %v7876_v63, %v6901_v1  ;;  %v6961_v40 = vld [vmem:[%s10492_s3 + $0x388] sm:$0xf] }
 0x3bc   :  { %v6906_v24 = vor.u32 %v7874_v2, %v6903_v3  ;;  %v6953_v2 = vld [vmem:[%s10492_s3 + $0x380] sm:$0xf]  ;;  %v7887_v3 = vld [vmem:[%s10492_s3 + $0x38c] sm:$0xf0] }
 0x3bf   :  { %v2167_v42 = vpop.f32.mrf.mxu2  ;;  %v2350_v29 = vpop.f32.mrf.mxu3 }
 0x3c0   :  { %v2198_v43 = vadd.f32 %v2167_v42, %v2114_v39  ;;  %v7879_v39 = vld [vmem:[%s10492_s3 + $0x34c] sm:$0xf0] }
 0x3c1   :  { %v2156_v5 = vpop.f32.mrf.mxu0  ;;  %v6914_v36 = vor.u32 %v7879_v39, %v6913_v37  ;;  %v7885_v37 = vld [vmem:[%s10492_s3 + $0x384] sm:$0xf]  ;;  %v7886_v39 = vld [vmem:[%s10492_s3 + $0x38c] sm:$0xf] }
 0x3c2   :  { %v2195_v59 = vpop.f32.mrf.mxu1 }
 0x3c3   :  { %v7877_v59 = vld [vmem:[%s10492_s3 + $0x344] sm:$0xf] }
 0x3c7   :  { %v2169_v46 = vpop.f32.mrf.mxu2 }
 0x3c8   :  { %v7880_v46 = vld [vmem:[%s10492_s3 + $0x354] sm:$0xf0] }
 0x3c9   :  { %v2238_v47 = vpop.f32.mrf.mxu0  ;;  %v6922_v49 = vor.u32 %v7880_v46, %v6921_v45  ;;  %v7889_v45 = vld [vmem:[%s10492_s3 + $0x3a4] sm:$0xf]  ;;  %v7890_v46 = vld [vmem:[%s10492_s3 + $0x3ac] sm:$0xf] }
 0x3ca   :  { %v2281_v19 = vadd.f32 %v2238_v47, %v2197_v10  ;;  %v2277_v48 = vpop.f32.mrf.mxu1  ;;  %v7878_v47 = vld [vmem:[%s10492_s3 + $0x34c] sm:$0xf] }
 0x3cb   :  { %v2284_v61 = vadd.f32 %v2277_v48, %v2200_v41  ;;  %v7888_v41 = vld [vmem:[%s10492_s3 + $0x394] sm:$0xf0]  ;;  %v6918_v48 = vor.u32 %v7877_v59, %v6915_v44  ;;  %v6973_v59 = vld [vmem:[%s10492_s3 + $0x3a0] sm:$0xf]  ;;  %v7891_v44 = vld [vmem:[%s10492_s3 + $0x3ac] sm:$0xf0] }
 0x3cc   :  { %v6962_v29 = vor.u32 %v7888_v41, %v6961_v40  ;;  %v7021_v40 = vld [vmem:[%s10492_s3 + $0x3e8] sm:$0xf]  ;;  %v7900_v41 = vld [vmem:[%s10492_s3 + $0x3f4] sm:$0xf0] }
 0x3ce   :  { %2859 = vmatpush.bf16.msrb.mxu0 %v6962_v29  ;;  %v7022_v29 = vor.u32 %v7900_v41, %v7021_v40 }
 0x3cf   :  { %v2251_v56 = vpop.f32.mrf.mxu2 }
 0x3d0   :  { %v2282_v57 = vadd.f32 %v2251_v56, %v2198_v43  ;;  %v7892_v56 = vld [vmem:[%s10492_s3 + $0x3b4] sm:$0xf0] }
 0x3d1   :  { %v2240_v53 = vpop.f32.mrf.mxu0 }
 0x3d2   :  { %v2279_v31 = vpop.f32.mrf.mxu1 }
 0x3d3   :  { %v6982_v31 = vor.u32 %v7892_v56, %v6981_v55  ;;  %v6993_v55 = vld [vmem:[%s10492_s3 + $0x3c0] sm:$0xf]  ;;  %v7895_v56 = vld [vmem:[%s10492_s3 + $0x3cc] sm:$0xf0] }
 0x3d7   :  { %v2253_v58 = vpop.f32.mrf.mxu2 }
 0x3d9   :  { %v2322_v8 = vpop.f32.mrf.mxu0 }
 0x3da   :  { %v9062_v9 = vadd.f32 %v2322_v8, %v2281_v19  ;;  %v2361_v12 = vpop.f32.mrf.mxu1  ;;  %v6923_v19 = vld [vmem:[%s10492_s3 + $0x358] sm:$0xf0] }
 0x3db   :  { %v9064_v13 = vadd.f32 %v2361_v12, %v2284_v61  ;;  %v6926_v50 = vor.u32 %v7878_v47, %v6923_v19  ;;  %v6933_v12 = vld [vmem:[%s10492_s3 + $0x360] sm:$0xf]  ;;  %v6983_v47 = vld [vmem:[%s10492_s3 + $0x3b8] sm:$0xf0] }
 0x3df   :  { %v2335_v26 = vpop.f32.mrf.mxu2 }
 0x3e0   :  { %v9078_v27 = vadd.f32 %v2335_v26, %v2282_v57 }
 0x3e1   :  { %v2324_v28 = vpop.f32.mrf.mxu0 }
 0x3e2   :  { %v2363_v30 = vpop.f32.mrf.mxu1  ;;  %v6934_v28 = vor.u32 %v7883_v11, %v6933_v12  ;;  %v7013_v11 = vld [vmem:[%s10492_s3 + $0x3e0] sm:$0xf] }
 0x3e3   :  { %v6938_v30 = vor.u32 %v7881_v14, %v6935_v15  ;;  %v7899_v14 = vld [vmem:[%s10492_s3 + $0x3ec] sm:$0xf0]  ;;  %v7897_v15 = vld [vmem:[%s10492_s3 + $0x3e4] sm:$0xf] }
 0x3e7   :  { %v2337_v34 = vpop.f32.mrf.mxu2 }
 0x3e8   :  { %v7896_v34 = vld [vmem:[%s10492_s3 + $0x3d4] sm:$0xf0] }
 0x3e9   :  { %v2418_v35 = vpop.f32.mrf.mxu0 }
 0x3ea   :  { %v2419_v0 = vadd.f32 %v8806_v7, %v2418_v35 }
 0x3ec   :  { %vm2438_vm12 = vcmp.gt.f32.partialorder %v2419_v0, 0.0  ;;  %v2446_v38 = vmul.f32 0.2, %v2419_v0 }
 0x3ee   :  { %v2454_v20 = vsel %vm2438_vm12, %v2419_v0, %v2446_v38  ;;  %v7002_v0 = vor.u32 %v7896_v34, %v7001_v16  ;;  %v6955_v38 = vld [vmem:[%s10492_s3 + $0x390] sm:$0xf0]  ;;  %v9300_v16 = vld [vmem:[%s10489_s1 + $0x18] sm:$0xff] }
 0x3ef   :  { %v2462_v22 = vpack.c.bf16 %v2454_v20, %v2454_v20  ;;  %v6963_v20 = vld [vmem:[%s10492_s3 + $0x398] sm:$0xf0]  ;;  %v9306_v34 = vld [vmem:[%s10489_s1 + $0x10] sm:$0xff] }
 0x3f1   :  { %v2420_v10 = vpop.f32.mrf.mxu0  ;;  %6887 = vmatmul.msk.bf16.vlgmr.msra.gmra.mxu2 %vm204_vm2, %v2462_v22  ;;  %6888 = vmatmul.msk.bf16.vlgmr.msra.gmra.mxu3 %vm204_vm2, %v2462_v22 }
 0x3f2   :  { %6889 = vmatmul.msk.bf16.vlgmr.msra.gmra.mxu1 %vm204_vm2, %v2462_v22  ;;  %2607 = vmatpush.bf16.msra.mxu2 %v6902_v21  ;;  %v2421_v42 = vadd.f32 %v8806_v7, %v2420_v10 }
 0x3f3   :  { %2620 = vmatpush.bf16.msra.mxu3 %v6906_v24  ;;  %2665 = vmatpush.bf16.msra.mxu1 %v6914_v36  ;;  %v6958_v24 = vor.u32 %v7885_v37, %v6955_v38  ;;  %v6966_v36 = vor.u32 %v7886_v39, %v6963_v20 }
 0x3f4   :  { %v2447_v43 = vmul.f32 0.2, %v2421_v42  ;;  %vm2439_vm13 = vcmp.gt.f32.partialorder %v2421_v42, 0.0 }
 0x3f6   :  { %v2455_v25 = vsel %vm2439_vm13, %v2421_v42, %v2447_v43 }
 0x3f7   :  { %v2546_v61 = vpack.c.bf16 %v2455_v25, %v2455_v25  ;;  %v6975_v25 = vld [vmem:[%s10492_s3 + $0x3b0] sm:$0xf0] }
 0x3f9   :  { %v2423_v5 = vpop.f32.mrf.mxu0 }
 0x3fa   :  { %v2424_v54 = vadd.f32 %v8806_v7, %v2423_v5 }
 0x3fc   :  { %v2448_v58 = vmul.f32 0.2, %v2424_v54  ;;  %vm2440_vm15 = vcmp.gt.f32.partialorder %v2424_v54, 0.0 }
 0x3fe   :  { %v2456_v8 = vsel %vm2440_vm15, %v2424_v54, %v2448_v58 }
 0x3ff   :  { %v2630_v23 = vpack.c.bf16 %v2456_v8, %v2456_v8 }
 0x401   :  { %v2425_v51 = vpop.f32.mrf.mxu0  ;;  %6890 = vmatmul.msk.bf16.vlgmr.msrb.gmra.mxu2 %vm204_vm2, %v2462_v22  ;;  %6907 = vmatmul.msk.bf16.vlgmr.msrb.gmra.mxu3 %vm204_vm2, %v2546_v61  ;;  %v6954_v22 = vor.u32 %v7887_v3, %v6953_v2 }
 0x402   :  { %v2426_v52 = vadd.f32 %v8806_v7, %v2425_v51  ;;  %6908 = vmatmul.msk.bf16.vlgmr.msrb.gmra.mxu1 %vm204_vm2, %v2546_v61  ;;  %2678 = vmatpush.bf16.msrb.mxu2 %v6918_v48  ;;  %v6974_v48 = vor.u32 %v7891_v44, %v6973_v59 }
 0x403   :  { %2691 = vmatpush.bf16.msrb.mxu3 %v6922_v49  ;;  %2704 = vmatpush.bf16.msrb.mxu1 %v6926_v50  ;;  %v6986_v49 = vor.u32 %v7890_v46, %v6983_v47 }
 0x404   :  { %vm2441_vm14 = vcmp.gt.f32.partialorder %v2426_v52, 0.0  ;;  %v2449_v57 = vmul.f32 0.2, %v2426_v52 }
 0x406   :  { %v2457_v53 = vsel %vm2441_vm14, %v2426_v52, %v2449_v57  ;;  %v7893_v57 = vld [vmem:[%s10492_s3 + $0x3c4] sm:$0xf] }
 0x407   :  { %v9144_v60 = vpack.c.bf16 %v2457_v53, %v2457_v53  ;;  %v6995_v53 = vld [vmem:[%s10492_s3 + $0x3d0] sm:$0xf0] }
 0x409   :  { %6949 = vmatmul.msk.bf16.vlgmr.msra.gmra.mxu0 %vm204_vm2, %v9144_v60  ;;  %v2428_v62 = vpop.f32.mrf.mxu0 }
 0x40a   :  { %v2429_v6 = vadd.f32 %v8806_v7, %v2428_v62  ;;  %2943 = vmatpush.bf16.msra.mxu0 %v6982_v31  ;;  %v7003_v31 = vld [vmem:[%s10492_s3 + $0x3d8] sm:$0xf0]  ;;  %v6998_v62 = vor.u32 %v7893_v57, %v6995_v53 }
 0x40c   :  { %v2450_v26 = vmul.f32 0.2, %v2429_v6  ;;  %vm2442_vm1 = vcmp.gt.f32.partialorder %v2429_v6, 0.0 }
 0x40e   :  { %v2458_v33 = vsel %vm2442_vm1, %v2429_v6, %v2450_v26  ;;  %v7014_v26 = vor.u32 %v7899_v14, %v7013_v11 }
 0x40f   :  { %v9176_v35 = vpack.c.bf16 %v2458_v33, %v2458_v33  ;;  %v9294_v33 = vld [vmem:[%s10489_s1 + $0x20] sm:$0xff] }
 0x411   :  { %6909 = vmatmul.msk.bf16.vlgmr.msra.gmra.mxu2 %vm204_vm2, %v2546_v61  ;;  %6910 = vmatmul.msk.bf16.vlgmr.msra.gmra.mxu3 %vm204_vm2, %v2546_v61  ;;  %v2430_v1 = vpop.f32.mrf.mxu0  ;;  %v6978_v61 = vor.u32 %v7889_v45, %v6975_v25 }
 0x412   :  { %6927 = vmatmul.msk.bf16.vlgmr.msra.gmra.mxu1 %vm204_vm2, %v2630_v23  ;;  %2749 = vmatpush.bf16.msra.mxu2 %v6934_v28  ;;  %v2431_v63 = vadd.f32 %v8806_v7, %v2430_v1  ;;  %v7018_v28 = vor.u32 %v7897_v15, %v7015_v17  ;;  %v9316_v1 = vld [vmem:[%s10489_s1 + $0x8] sm:$0xff] }
 0x413   :  { %2762 = vmatpush.bf16.msra.mxu3 %v6938_v30  ;;  %2788 = vmatpush.bf16.msra.mxu1 %v6946_v32  ;;  %v9288_v32 = vld [vmem:[%s10489_s1 + $0x28] sm:$0xff] }
 0x414   :  { %v2451_v21 = vmul.f32 0.2, %v2431_v63  ;;  %vm2443_vm3 = vcmp.gt.f32.partialorder %v2431_v63, 0.0 }
 0x416   :  { %v2459_v10 = vsel %vm2443_vm3, %v2431_v63, %v2451_v21  ;;  %v7901_v21 = vld [vmem:[%s10491_s0 + $0x80] sm:$0xff] }
 0x417   :  { %v2882_v42 = vpack.c.bf16 %v2459_v10, %v2459_v10 }
 0x419   :  { %6969 = vmatmul.msk.bf16.vlgmr.msrb.gmra.mxu0 %vm204_vm2, %v9176_v35  ;;  %v2433_v43 = vpop.f32.mrf.mxu0 }
 0x41a   :  { %3027 = vmatpush.bf16.msrb.mxu0 %v7002_v0  ;;  %v2434_v5 = vadd.f32 %v8806_v7, %v2433_v43  ;;  %v7902_v43 = vld [vmem:[%s10491_s0 + $0x88] sm:$0xff] }
 0x41c   :  { %v2452_v19 = vmul.f32 0.2, %v2434_v5  ;;  %vm2444_vm4 = vcmp.gt.f32.partialorder %v2434_v5, 0.0 }
 0x41e   :  { %v2460_v50 = vsel %vm2444_vm4, %v2434_v5, %v2452_v19 }
 0x41f   :  { %v2966_v51 = vpack.c.bf16 %v2460_v50, %v2460_v50 }
 0x421   :  { %6928 = vmatmul.msk.bf16.vlgmr.msrb.gmra.mxu2 %vm204_vm2, %v2630_v23  ;;  %6929 = vmatmul.msk.bf16.vlgmr.msrb.gmra.mxu3 %vm204_vm2, %v2630_v23  ;;  %v2435_v52 = vpop.f32.mrf.mxu0 }
 0x422   :  { %6930 = vmatmul.msk.bf16.vlgmr.msrb.gmra.mxu1 %vm204_vm2, %v2630_v23  ;;  %2833 = vmatpush.bf16.msrb.mxu2 %v6954_v22  ;;  %v2436_v54 = vadd.f32 %v8806_v7, %v2435_v52  ;;  %v7894_v7 = vld [vmem:[%s10492_s3 + $0x3cc] sm:$0xf]  ;;  %v7023_v23 = vld [vmem:[%s10492_s3 + $0x3f8] sm:$0xf0] }
 0x423   :  { %2846 = vmatpush.bf16.msrb.mxu3 %v6958_v24  ;;  %2872 = vmatpush.bf16.msrb.mxu1 %v6966_v36  ;;  %v7006_v6 = vor.u32 %v7894_v7, %v7003_v31  ;;  %v7026_v30 = vor.u32 %v7898_v18, %v7023_v23 }
 0x424   :  { %v2453_v58 = vmul.f32 0.2, %v2436_v54  ;;  %vm2445_vm5 = vcmp.gt.f32.partialorder %v2436_v54, 0.0 }
 0x426   :  { %v2461_v8 = vsel %vm2445_vm5, %v2436_v54, %v2453_v58 }
 0x427   :  { %v3050_v12 = vpack.c.bf16 %v2461_v8, %v2461_v8  ;;  %v7904_v8 = vld [vmem:[%s10491_s0 + $0x98] sm:$0xff] }
 0x429   :  { %6989 = vmatmul.msk.bf16.vlgmr.msra.gmra.mxu0 %vm204_vm2, %v2882_v42 }
 0x42a   :  { %3111 = vmatpush.bf16.msra.mxu0 %v7022_v29 }
 0x431   :  { %6947 = vmatmul.msk.bf16.vlgmr.msra.gmra.mxu2 %vm204_vm2, %v9144_v60  ;;  %6948 = vmatmul.msk.bf16.vlgmr.msra.gmra.mxu3 %vm204_vm2, %v9144_v60 }
 0x432   :  { %6950 = vmatmul.msk.bf16.vlgmr.msra.gmra.mxu1 %vm204_vm2, %v9144_v60  ;;  %2917 = vmatpush.bf16.msra.mxu2 %v6974_v48  ;;  %v6994_v60 = vor.u32 %v7895_v56, %v6993_v55 }
 0x433   :  { %2930 = vmatpush.bf16.msra.mxu3 %v6978_v61  ;;  %2956 = vmatpush.bf16.msra.mxu1 %v6986_v49  ;;  %v7903_v49 = vld [vmem:[%s10491_s0 + $0x90] sm:$0xff] }
 0x439   :  { %7009 = vmatmul.msk.bf16.vlgmr.msrb.gmra.mxu0 %vm204_vm2, %v2966_v51 }
 0x441   :  { %6967 = vmatmul.msk.bf16.vlgmr.msrb.gmra.mxu2 %vm204_vm2, %v9176_v35  ;;  %6968 = vmatmul.msk.bf16.vlgmr.msrb.gmra.mxu3 %vm204_vm2, %v9176_v35 }
 0x442   :  { %6970 = vmatmul.msk.bf16.vlgmr.msrb.gmra.mxu1 %vm204_vm2, %v9176_v35  ;;  %3001 = vmatpush.bf16.msrb.mxu2 %v6994_v60 }
 0x443   :  { %3014 = vmatpush.bf16.msrb.mxu3 %v6998_v62  ;;  %3040 = vmatpush.bf16.msrb.mxu1 %v7006_v6 }
 0x449   :  { %7029 = vmatmul.msk.bf16.vlgmr.msra.gmra.mxu0 %vm204_vm2, %v3050_v12 }
 0x451   :  { %6987 = vmatmul.msk.bf16.vlgmr.msra.gmra.mxu2 %vm204_vm2, %v2882_v42  ;;  %6988 = vmatmul.msk.bf16.vlgmr.msra.gmra.mxu3 %vm204_vm2, %v2882_v42 }
 0x452   :  { %6990 = vmatmul.msk.bf16.vlgmr.msra.gmra.mxu1 %vm204_vm2, %v2882_v42  ;;  %3085 = vmatpush.bf16.msra.mxu2 %v7014_v26 }
 0x453   :  { %3098 = vmatpush.bf16.msra.mxu3 %v7018_v28  ;;  %3124 = vmatpush.bf16.msra.mxu1 %v7026_v30 }
 0x461   :  { %7007 = vmatmul.msk.bf16.vlgmr.msrb.gmra.mxu2 %vm204_vm2, %v2966_v51  ;;  %7008 = vmatmul.msk.bf16.vlgmr.msrb.gmra.mxu3 %vm204_vm2, %v2966_v51 }
 0x462   :  { %7010 = vmatmul.msk.bf16.vlgmr.msrb.gmra.mxu1 %vm204_vm2, %v2966_v51  ;;  %3176 = vmatpush.bf16.msrb.mxu2 %v9288_v32 }
 0x466   :  { %3177 = vmatpush.bf16.msrb.mxu2 %v9294_v33 }
 0x46a   :  { %3178 = vmatpush.bf16.msrb.mxu2 %v9300_v16 }
 0x46e   :  { %3179 = vmatpush.bf16.msrb.mxu2 %v9306_v34 }
 0x46f   :  { %v2525_v35 = vpop.f32.mrf.mxu1 }
 0x470   :  { %v2544_v0 = vadd.f32 %v2525_v35, %v9036_v4  ;;  %v9324_v4 = vld [vmem:[%s10489_s1] sm:$0xff] }
 0x471   :  { %7027 = vmatmul.msk.bf16.vlgmr.msra.gmra.mxu2 %vm204_vm2, %v3050_v12  ;;  %7028 = vmatmul.msk.bf16.vlgmr.msra.gmra.mxu3 %vm204_vm2, %v3050_v12 }
 0x472   :  { %7030 = vmatmul.msk.bf16.vlgmr.msra.gmra.mxu1 %vm204_vm2, %v3050_v12  ;;  %3180 = vmatpush.bf16.msrb.mxu2 %v9316_v1 }
 0x474   :  { %v2499_v63 = vpop.f32.mrf.mxu2  ;;  %v2512_v2 = vpop.f32.mrf.mxu3 }
 0x475   :  { %v2542_v3 = vadd.f32 %v2499_v63, %v9062_v9  ;;  %v2543_v37 = vadd.f32 %v2512_v2, %v9078_v27 }
 0x476   :  { %3181 = vmatpush.bf16.msrb.mxu2 %v9324_v4 }
 0x477   :  { %v2527_v38 = vpop.f32.mrf.mxu1 }
 0x47c   :  { %v2501_v39 = vpop.f32.mrf.mxu2  ;;  %v2514_v20 = vpop.f32.mrf.mxu3 }
 0x47f   :  { %v2596_v22 = vpop.f32.mrf.mxu1 }
 0x480   :  { %v2627_v24 = vadd.f32 %v2596_v22, %v2543_v37 }
 0x481   :  { %7047 = vmatmul.msk.bf16.vlgmr.msrb.gmra.mxu2 %vm108_vm0, %v7901_v21 }
 0x484   :  { %v2538_v9 = vpop.f32.mrf.mxu2  ;;  %v2583_v27 = vpop.f32.mrf.mxu3 }
 0x485   :  { %v2545_v36 = vadd.f32 %v2538_v9, %v9064_v13  ;;  %v2626_v10 = vadd.f32 %v2583_v27, %v2542_v3 }
 0x486   :  { %v2777_v40 = vpop.f32.mrf.mxu0 }
 0x487   :  { %v2598_v41 = vpop.f32.mrf.mxu1 }
 0x48c   :  { %v2540_v42 = vpop.f32.mrf.mxu2  ;;  %v2585_v29 = vpop.f32.mrf.mxu3 }
 0x48e   :  { %v2779_v5 = vpop.f32.mrf.mxu0 }
 0x48f   :  { %v2667_v59 = vpop.f32.mrf.mxu1 }
 0x490   :  { %v2710_v44 = vadd.f32 %v2667_v59, %v2626_v10 }
 0x491   :  { %7048 = vmatmul.msk.bf16.gmra.mxu2 %vm108_vm0, %v7902_v43 }
 0x494   :  { %v2609_v45 = vpop.f32.mrf.mxu2  ;;  %v2622_v25 = vpop.f32.mrf.mxu3 }
 0x495   :  { %v2628_v46 = vadd.f32 %v2609_v45, %v2544_v0  ;;  %v2629_v47 = vadd.f32 %v2622_v25, %v2545_v36  ;;  %v7053_v45 = vld [vmem:[%s10492_s3 + $0x400] sm:$0xf]  ;;  %v7907_v25 = vld [vmem:[%s10492_s3 + $0x40c] sm:$0xf0] }
 0x496   :  { %v2861_v19 = vpop.f32.mrf.mxu0 }
 0x497   :  { %v2669_v13 = vpop.f32.mrf.mxu1 }
 0x49c   :  { %v2611_v48 = vpop.f32.mrf.mxu2  ;;  %v2624_v61 = vpop.f32.mrf.mxu3 }
 0x49e   :  { %v2863_v50 = vpop.f32.mrf.mxu0 }
 0x49f   :  { %v2706_v51 = vpop.f32.mrf.mxu1 }
 0x4a0   :  { %v2713_v52 = vadd.f32 %v2706_v51, %v2629_v47  ;;  %v7905_v51 = vld [vmem:[%s10492_s3 + $0x404] sm:$0xf] }
 0x4a1   :  { %7049 = vmatmul.msk.bf16.gmra.mxu2 %vm108_vm0, %v7903_v49 }
 0x4a4   :  { %v2680_v54 = vpop.f32.mrf.mxu2  ;;  %v2693_v55 = vpop.f32.mrf.mxu3 }
 0x4a5   :  { %v2711_v56 = vadd.f32 %v2680_v54, %v2627_v24  ;;  %v2712_v57 = vadd.f32 %v2693_v55, %v2628_v46  ;;  %v7054_v46 = vor.u32 %v7907_v25, %v7053_v45  ;;  %v7061_v54 = vld [vmem:[%s10492_s3 + $0x408] sm:$0xf] }
 0x4a6   :  { %v2945_v53 = vpop.f32.mrf.mxu0 }
 0x4a7   :  { %v2796_v7 = vadd.f32 %v2777_v40, %v2712_v57  ;;  %v2708_v31 = vpop.f32.mrf.mxu1  ;;  %3262 = vmatpush.bf16.msrb.mxu3 %v7054_v46 }
 0x4a9   :  { %v2880_v58 = vadd.f32 %v2861_v19, %v2796_v7 }
 0x4ab   :  { %v2964_v60 = vadd.f32 %v2945_v53, %v2880_v58 }
 0x4ac   :  { %v2682_v62 = vpop.f32.mrf.mxu2  ;;  %v2695_v6 = vpop.f32.mrf.mxu3 }
 0x4ad   :  { %v7063_v62 = vld [vmem:[%s10492_s3 + $0x418] sm:$0xf0] }
 0x4ae   :  { %v2947_v12 = vpop.f32.mrf.mxu0 }
 0x4af   :  { %v2790_v11 = vpop.f32.mrf.mxu1 }
 0x4b0   :  { %v2797_v14 = vadd.f32 %v2790_v11, %v2713_v52  ;;  %v7055_v52 = vld [vmem:[%s10492_s3 + $0x410] sm:$0xf0] }
 0x4b1   :  { %7050 = vmatmul.msk.bf16.gmra.mxu2 %vm108_vm0, %v7904_v8  ;;  %v7058_v55 = vor.u32 %v7905_v51, %v7055_v52  ;;  %v7103_v51 = vld [vmem:[%s10492_s3 + $0x458] sm:$0xf0] }
 0x4b3   :  { %3275 = vmatpush.bf16.msrb.mxu0 %v7058_v55 }
 0x4b4   :  { %v2751_v15 = vpop.f32.mrf.mxu2  ;;  %v2764_v17 = vpop.f32.mrf.mxu3 }
 0x4b5   :  { %v2794_v18 = vadd.f32 %v2751_v15, %v2710_v44  ;;  %v2795_v23 = vadd.f32 %v2764_v17, %v2711_v56  ;;  %v7908_v56 = vld [vmem:[%s10492_s3 + $0x414] sm:$0xf0]  ;;  %v7073_v17 = vld [vmem:[%s10492_s3 + $0x420] sm:$0xf] }
 0x4b6   :  { %v3029_v26 = vpop.f32.mrf.mxu0  ;;  %v7062_v57 = vor.u32 %v7908_v56, %v7061_v54 }
 0x4b7   :  { %v2792_v28 = vpop.f32.mrf.mxu1  ;;  %v3048_v30 = vadd.f32 %v3029_v26, %v2964_v60  ;;  %v7906_v60 = vld [vmem:[%s10492_s3 + $0x40c] sm:$0xf] }
 0x4b8   :  { %3288 = vmatpush.bf16.msrb.mxu1 %v7062_v57  ;;  %v7066_v6 = vor.u32 %v7906_v60, %v7063_v62  ;;  %v7075_v28 = vld [vmem:[%s10492_s3 + $0x430] sm:$0xf0]  ;;  %v7163_v60 = vld [vmem:[%s10492_s3 + $0x4b8] sm:$0xf0] }
 0x4ba   :  { %3301 = vmatpush.bf16.msra.mxu3 %v7066_v6 }
 0x4bc   :  { %v2753_v35 = vpop.f32.mrf.mxu2  ;;  %v2766_v0 = vpop.f32.mrf.mxu3 }
 0x4be   :  { %v3031_v63 = vpop.f32.mrf.mxu0 }
 0x4bf   :  { %v2874_v2 = vpop.f32.mrf.mxu1  ;;  %v7918_v63 = vld [vmem:[%s10492_s3 + $0x46c] sm:$0xf] }
 0x4c0   :  { %v2881_v3 = vadd.f32 %v2874_v2, %v2797_v14  ;;  %v7123_v2 = vld [vmem:[%s10492_s3 + $0x478] sm:$0xf0] }
 0x4c4   :  { %v2835_v37 = vpop.f32.mrf.mxu2  ;;  %v2848_v38 = vpop.f32.mrf.mxu3 }
 0x4c5   :  { %v2878_v39 = vadd.f32 %v2835_v37, %v2794_v18  ;;  %v2879_v20 = vadd.f32 %v2848_v38, %v2795_v23  ;;  %v7911_v18 = vld [vmem:[%s10492_s3 + $0x42c] sm:$0xf0]  ;;  %v7909_v23 = vld [vmem:[%s10492_s3 + $0x424] sm:$0xf]  ;;  %v9397_v38 = vld [vmem:[%s10490_s2] ss:$0 sm:$0xff] }
 0x4c6   :  { %v3113_v21 = vpop.f32.mrf.mxu0  ;;  %v7074_v26 = vor.u32 %v7911_v18, %v7073_v17 }
 0x4c7   :  { %v2876_v22 = vpop.f32.mrf.mxu1  ;;  %v9344_v24 = vadd.f32 %v3113_v21, %v3048_v30  ;;  %v7078_v30 = vor.u32 %v7909_v23, %v7075_v28  ;;  %v7912_v21 = vld [vmem:[%s10492_s3 + $0x434] sm:$0xf0]  ;;  %v7919_v28 = vld [vmem:[%s10492_s3 + $0x46c] sm:$0xf0] }
 0x4c8   :  { %3346 = vmatpush.bf16.msra.mxu0 %v7074_v26  ;;  %v7910_v22 = vld [vmem:[%s10492_s3 + $0x42c] sm:$0xf]  ;;  %v7113_v26 = vld [vmem:[%s10492_s3 + $0x460] sm:$0xf] }
 0x4c9   :  { %3359 = vmatpush.bf16.msra.mxu1 %v7078_v30  ;;  %v7917_v30 = vld [vmem:[%s10492_s3 + $0x464] sm:$0xf] }
 0x4cc   :  { %v2837_v9 = vpop.f32.mrf.mxu2  ;;  %v2850_v27 = vpop.f32.mrf.mxu3 }
 0x4cd   :  { %v7083_v9 = vld [vmem:[%s10492_s3 + $0x438] sm:$0xf0]  ;;  %v7093_v27 = vld [vmem:[%s10492_s3 + $0x440] sm:$0xf] }
 0x4ce   :  { %v3115_v36 = vpop.f32.mrf.mxu0 }
 0x4cf   :  { %v2958_v10 = vpop.f32.mrf.mxu1 }
 0x4d0   :  { %v2965_v40 = vadd.f32 %v2958_v10, %v2881_v3  ;;  %v7126_v3 = vor.u32 %v7918_v63, %v7123_v2  ;;  %v7915_v10 = vld [vmem:[%s10492_s3 + $0x44c] sm:$0xf0]  ;;  %v7920_v63 = vld [vmem:[%s10492_s3 + $0x474] sm:$0xf0] }
 0x4d2   :  { %3553 = vmatpush.bf16.msra.mxu2 %v7126_v3 }
 0x4d4   :  { %v2919_v41 = vpop.f32.mrf.mxu2  ;;  %v2932_v42 = vpop.f32.mrf.mxu3 }
 0x4d5   :  { %v2962_v29 = vadd.f32 %v2919_v41, %v2878_v39  ;;  %v2963_v43 = vadd.f32 %v2932_v42, %v2879_v20  ;;  %v7081_v20 = vld [vmem:[%s10492_s3 + $0x428] sm:$0xf] }
 0x4d6   :  { %v7082_v41 = vor.u32 %v7912_v21, %v7081_v20 }
 0x4d7   :  { %v2960_v5 = vpop.f32.mrf.mxu1 }
 0x4dc   :  { %v2921_v59 = vpop.f32.mrf.mxu2  ;;  %v2934_v44 = vpop.f32.mrf.mxu3 }
 0x4dd   :  { %v7922_v59 = vld [vmem:[%s10492_s3 + $0x48c] sm:$0xf]  ;;  %v7143_v44 = vld [vmem:[%s10492_s3 + $0x498] sm:$0xf0] }
 0x4de   :  { %v7146_v25 = vor.u32 %v7922_v59, %v7143_v44  ;;  %v7924_v59 = vld [vmem:[%s10492_s3 + $0x494] sm:$0xf0] }
 0x4df   :  { %v3042_v47 = vpop.f32.mrf.mxu1 }
 0x4e0   :  { %v3049_v19 = vadd.f32 %v3042_v47, %v2965_v40  ;;  %3637 = vmatpush.bf16.msrb.mxu2 %v7146_v25 }
 0x4e4   :  { %v3003_v13 = vpop.f32.mrf.mxu2  ;;  %v3016_v48 = vpop.f32.mrf.mxu3 }
 0x4e5   :  { %v3046_v61 = vadd.f32 %v3003_v13, %v2962_v29  ;;  %v3047_v49 = vadd.f32 %v3016_v48, %v2963_v43  ;;  %v7086_v29 = vor.u32 %v7910_v22, %v7083_v9  ;;  %v7094_v43 = vor.u32 %v7915_v10, %v7093_v27  ;;  %v7095_v13 = vld [vmem:[%s10492_s3 + $0x450] sm:$0xf0]  ;;  %v7101_v48 = vld [vmem:[%s10492_s3 + $0x448] sm:$0xf]  ;;  %v7930_v22 = vld [vmem:[%s10492_s3 + $0x4cc] sm:$0xf] }
 0x4e6   :  { %v7183_v9 = vld [vmem:[%s10492_s3 + $0x4d8] sm:$0xf0] }
 0x4e7   :  { %v3044_v50 = vpop.f32.mrf.mxu1 }
 0x4e8   :  { %v7914_v50 = vld [vmem:[%s10492_s3 + $0x44c] sm:$0xf] }
 0x4e9   :  { %v7106_v56 = vor.u32 %v7914_v50, %v7103_v51  ;;  %v7153_v51 = vld [vmem:[%s10492_s3 + $0x4a0] sm:$0xf] }
 0x4ec   :  { %v3005_v53 = vpop.f32.mrf.mxu2  ;;  %v3018_v7 = vpop.f32.mrf.mxu3 }
 0x4ef   :  { %v3126_v31 = vpop.f32.mrf.mxu1 }
 0x4f0   :  { %v9364_v58 = vadd.f32 %v3126_v31, %v3049_v19  ;;  %v7913_v19 = vld [vmem:[%s10492_s3 + $0x444] sm:$0xf]  ;;  %v7926_v31 = vld [vmem:[%s10492_s3 + $0x4ac] sm:$0xf] }
 0x4f1   :  { %v7098_v52 = vor.u32 %v7913_v19, %v7095_v13  ;;  %v7934_v19 = vld [vmem:[%s10492_s3 + $0x4ec] sm:$0xf]  ;;  %v7203_v13 = vld [vmem:[%s10492_s3 + $0x4f8] sm:$0xf0] }
 0x4f4   :  { %v3087_v8 = vpop.f32.mrf.mxu2  ;;  %v3100_v12 = vpop.f32.mrf.mxu3 }
 0x4f5   :  { %v9372_v11 = vadd.f32 %v3087_v8, %v3046_v61  ;;  %v9374_v14 = vadd.f32 %v3100_v12, %v3047_v49  ;;  %v7916_v49 = vld [vmem:[%s10492_s3 + $0x454] sm:$0xf0]  ;;  %v7166_v8 = vor.u32 %v7926_v31, %v7163_v60 }
 0x4f6   :  { %v7102_v55 = vor.u32 %v7916_v49, %v7101_v48 }
 0x4f7   :  { %v3128_v15 = vpop.f32.mrf.mxu1 }
 0x4fc   :  { %v3089_v35 = vpop.f32.mrf.mxu2  ;;  %v3102_v0 = vpop.f32.mrf.mxu3 }
 0x4fd   :  { %v7115_v35 = vld [vmem:[%s10492_s3 + $0x470] sm:$0xf0]  ;;  %v7121_v0 = vld [vmem:[%s10492_s3 + $0x468] sm:$0xf] }
 0x4fe   :  { %v7122_v20 = vor.u32 %v7920_v63, %v7121_v0 }
 0x504   :  { %v3183_v37 = vpop.f32.mrf.mxu2 }
 0x505   :  { %v3184_v39 = vadd.f32 %v9397_v38, %v3183_v37  ;;  %v7114_v37 = vor.u32 %v7919_v28, %v7113_v26  ;;  %v7181_v26 = vld [vmem:[%s10492_s3 + $0x4c8] sm:$0xf]  ;;  %v7932_v28 = vld [vmem:[%s10492_s3 + $0x4d4] sm:$0xf0] }
 0x506   :  { %v7182_v63 = vor.u32 %v7932_v28, %v7181_v26  ;;  %v7940_v28 = vld [vmem:[%s10491_s0 + $0xb8] sm:$0xff] }
 0x507   :  { %vm3203_vm6 = vcmp.gt.f32.partialorder %v3184_v39, 0.0  ;;  %v3211_v36 = vmul.f32 0.2, %v3184_v39 }
 0x509   :  { %v3219_v40 = vsel %vm3203_vm6, %v3184_v39, %v3211_v36  ;;  %v7118_v39 = vor.u32 %v7917_v30, %v7115_v35  ;;  %v7186_v36 = vor.u32 %v7930_v22, %v7183_v9  ;;  %v7201_v22 = vld [vmem:[%s10492_s3 + $0x4e8] sm:$0xf]  ;;  %v7936_v9 = vld [vmem:[%s10492_s3 + $0x4f4] sm:$0xf0] }
 0x50a   :  { %v3227_v42 = vpack.c.bf16 %v3219_v40, %v3219_v40 }
 0x50c   :  { %v3185_v5 = vpop.f32.mrf.mxu2  ;;  %7067 = vmatmul.msk.bf16.vlgmr.msrb.gmra.mxu3 %vm204_vm2, %v3227_v42  ;;  %7068 = vmatmul.msk.bf16.vlgmr.msrb.gmra.mxu0 %vm204_vm2, %v3227_v42 }
 0x50d   :  { %7069 = vmatmul.msk.bf16.vlgmr.msrb.gmra.mxu1 %vm204_vm2, %v3227_v42  ;;  %3372 = vmatpush.bf16.msrb.mxu3 %v7082_v41  ;;  %v3186_v45 = vadd.f32 %v9397_v38, %v3185_v5  ;;  %v7133_v41 = vld [vmem:[%s10492_s3 + $0x480] sm:$0xf]  ;;  %v7141_v5 = vld [vmem:[%s10492_s3 + $0x488] sm:$0xf] }
 0x50e   :  { %3385 = vmatpush.bf16.msrb.mxu0 %v7086_v29  ;;  %3430 = vmatpush.bf16.msrb.mxu1 %v7094_v43  ;;  %v7921_v29 = vld [vmem:[%s10492_s3 + $0x484] sm:$0xf]  ;;  %v7135_v43 = vld [vmem:[%s10492_s3 + $0x490] sm:$0xf0] }
 0x50f   :  { %v3212_v46 = vmul.f32 0.2, %v3186_v45  ;;  %vm3204_vm7 = vcmp.gt.f32.partialorder %v3186_v45, 0.0  ;;  %v7138_v25 = vor.u32 %v7921_v29, %v7135_v43 }
 0x511   :  { %v3220_v61 = vsel %vm3204_vm7, %v3186_v45, %v3212_v46  ;;  %v7142_v46 = vor.u32 %v7924_v59, %v7141_v5 }
 0x512   :  { %v3311_v54 = vpack.c.bf16 %v3220_v61, %v3220_v61  ;;  %v7206_v61 = vor.u32 %v7934_v19, %v7203_v13 }
 0x514   :  { %v3188_v47 = vpop.f32.mrf.mxu2 }
 0x515   :  { %v3189_v7 = vadd.f32 %v9397_v38, %v3188_v47 }
 0x517   :  { %v3213_v12 = vmul.f32 0.2, %v3189_v7  ;;  %vm3205_vm9 = vcmp.gt.f32.partialorder %v3189_v7, 0.0 }
 0x519   :  { %v3221_v23 = vsel %vm3205_vm9, %v3189_v7, %v3213_v12 }
 0x51a   :  { %v3395_v2 = vpack.c.bf16 %v3221_v23, %v3221_v23  ;;  %v7175_v23 = vld [vmem:[%s10492_s3 + $0x4d0] sm:$0xf0] }
 0x51c   :  { %v3190_v57 = vpop.f32.mrf.mxu2  ;;  %7070 = vmatmul.msk.bf16.vlgmr.msra.gmra.mxu3 %vm204_vm2, %v3227_v42  ;;  %7087 = vmatmul.msk.bf16.vlgmr.msra.gmra.mxu0 %vm204_vm2, %v3311_v54  ;;  %v7923_v42 = vld [vmem:[%s10492_s3 + $0x48c] sm:$0xf0] }
 0x51d   :  { %v3191_v53 = vadd.f32 %v9397_v38, %v3190_v57  ;;  %7088 = vmatmul.msk.bf16.vlgmr.msra.gmra.mxu1 %vm204_vm2, %v3311_v54  ;;  %3443 = vmatpush.bf16.msra.mxu3 %v7098_v52  ;;  %v7134_v45 = vor.u32 %v7923_v42, %v7133_v41  ;;  %v7927_v52 = vld [vmem:[%s10492_s3 + $0x4ac] sm:$0xf0]  ;;  %v7928_v57 = vld [vmem:[%s10492_s3 + $0x4b4] sm:$0xf0] }
 0x51e   :  { %3456 = vmatpush.bf16.msra.mxu0 %v7102_v55  ;;  %3469 = vmatpush.bf16.msra.mxu1 %v7106_v56  ;;  %v7155_v55 = vld [vmem:[%s10492_s3 + $0x4b0] sm:$0xf0]  ;;  %v7161_v56 = vld [vmem:[%s10492_s3 + $0x4a8] sm:$0xf]  ;;  %v7154_v7 = vor.u32 %v7927_v52, %v7153_v51 }
 0x51f   :  { %vm3206_vm8 = vcmp.gt.f32.partialorder %v3191_v53, 0.0  ;;  %v3214_v62 = vmul.f32 0.2, %v3191_v53  ;;  %v7162_v60 = vor.u32 %v7928_v57, %v7161_v56  ;;  %v7939_v56 = vld [vmem:[%s10491_s0 + $0xb0] sm:$0xff] }
 0x521   :  { %v3222_v6 = vsel %vm3206_vm8, %v3191_v53, %v3214_v62 }
 0x522   :  { %v9457_v15 = vpack.c.bf16 %v3222_v6, %v3222_v6 }
 0x524   :  { %7130 = vmatmul.msk.bf16.vlgmr.msra.gmra.mxu2 %vm204_vm2, %v9457_v15  ;;  %v3193_v17 = vpop.f32.mrf.mxu2 }
 0x525   :  { %v3194_v18 = vadd.f32 %v9397_v38, %v3193_v17  ;;  %3721 = vmatpush.bf16.msra.mxu2 %v7166_v8  ;;  %v7173_v17 = vld [vmem:[%s10492_s3 + $0x4c0] sm:$0xf] }
 0x527   :  { %v3215_v3 = vmul.f32 0.2, %v3194_v18  ;;  %vm3207_vm10 = vcmp.gt.f32.partialorder %v3194_v18, 0.0 }
 0x529   :  { %v3223_v21 = vsel %vm3207_vm10, %v3194_v18, %v3215_v3  ;;  %v7931_v18 = vld [vmem:[%s10492_s3 + $0x4cc] sm:$0xf0] }
 0x52a   :  { %v9489_v27 = vpack.c.bf16 %v3223_v21, %v3223_v21  ;;  %v7174_v35 = vor.u32 %v7931_v18, %v7173_v17  ;;  %v7195_v21 = vld [vmem:[%s10492_s3 + $0x4f0] sm:$0xf0] }
 0x52c   :  { %7089 = vmatmul.msk.bf16.vlgmr.msrb.gmra.mxu3 %vm204_vm2, %v3311_v54  ;;  %7090 = vmatmul.msk.bf16.vlgmr.msrb.gmra.mxu0 %vm204_vm2, %v3311_v54  ;;  %v3195_v10 = vpop.f32.mrf.mxu2  ;;  %v7925_v54 = vld [vmem:[%s10492_s3 + $0x4a4] sm:$0xf] }
 0x52d   :  { %7107 = vmatmul.msk.bf16.vlgmr.msrb.gmra.mxu1 %vm204_vm2, %v3395_v2  ;;  %3514 = vmatpush.bf16.msrb.mxu3 %v7114_v37  ;;  %v3196_v40 = vadd.f32 %v9397_v38, %v3195_v10  ;;  %v7158_v31 = vor.u32 %v7925_v54, %v7155_v55  ;;  %v7193_v37 = vld [vmem:[%s10492_s3 + $0x4e0] sm:$0xf]  ;;  %v7202_v10 = vor.u32 %v7936_v9, %v7201_v22 }
 0x52e   :  { %3527 = vmatpush.bf16.msrb.mxu0 %v7118_v39  ;;  %3540 = vmatpush.bf16.msrb.mxu1 %v7122_v20  ;;  %v7935_v39 = vld [vmem:[%s10492_s3 + $0x4ec] sm:$0xf0]  ;;  %v7933_v20 = vld [vmem:[%s10492_s3 + $0x4e4] sm:$0xf] }
 0x52f   :  { %v3216_v44 = vmul.f32 0.2, %v3196_v40  ;;  %vm3208_vm11 = vcmp.gt.f32.partialorder %v3196_v40, 0.0 }
 0x531   :  { %v3224_v47 = vsel %vm3208_vm11, %v3196_v40, %v3216_v44 }
 0x532   :  { %v3647_v48 = vpack.c.bf16 %v3224_v47, %v3224_v47 }
 0x534   :  { %7150 = vmatmul.msk.bf16.vlgmr.msrb.gmra.mxu2 %vm204_vm2, %v9489_v27  ;;  %v3198_v49 = vpop.f32.mrf.mxu2 }
 0x535   :  { %3805 = vmatpush.bf16.msrb.mxu2 %v7186_v36  ;;  %v3199_v50 = vadd.f32 %v9397_v38, %v3198_v49  ;;  %v7198_v36 = vor.u32 %v7933_v20, %v7195_v21 }
 0x537   :  { %v3217_v53 = vmul.f32 0.2, %v3199_v50  ;;  %vm3209_vm12 = vcmp.gt.f32.partialorder %v3199_v50, 0.0 }
 0x539   :  { %v3225_v62 = vsel %vm3209_vm12, %v3199_v50, %v3217_v53 }
 0x53a   :  { %v3731_v6 = vpack.c.bf16 %v3225_v62, %v3225_v62 }
 0x53c   :  { %7108 = vmatmul.msk.bf16.vlgmr.msra.gmra.mxu3 %vm204_vm2, %v3395_v2  ;;  %7109 = vmatmul.msk.bf16.vlgmr.msra.gmra.mxu0 %vm204_vm2, %v3395_v2  ;;  %v3200_v8 = vpop.f32.mrf.mxu2 }
 0x53d   :  { %7110 = vmatmul.msk.bf16.vlgmr.msra.gmra.mxu1 %vm204_vm2, %v3395_v2  ;;  %3598 = vmatpush.bf16.msra.mxu3 %v7134_v45  ;;  %v3201_v12 = vadd.f32 %v9397_v38, %v3200_v8 }
 0x53e   :  { %3611 = vmatpush.bf16.msra.mxu0 %v7138_v25  ;;  %3624 = vmatpush.bf16.msra.mxu1 %v7142_v46 }
 0x53f   :  { %v3218_v30 = vmul.f32 0.2, %v3201_v12  ;;  %vm3210_vm13 = vcmp.gt.f32.partialorder %v3201_v12, 0.0 }
 0x541   :  { %v3226_v2 = vsel %vm3210_vm13, %v3201_v12, %v3218_v30 }
 0x542   :  { %v3815_v3 = vpack.c.bf16 %v3226_v2, %v3226_v2 }
 0x544   :  { %7170 = vmatmul.msk.bf16.vlgmr.msra.gmra.mxu2 %vm204_vm2, %v3647_v48 }
 0x545   :  { %3889 = vmatpush.bf16.msra.mxu2 %v7206_v61 }
 0x54c   :  { %7127 = vmatmul.msk.bf16.vlgmr.msrb.gmra.mxu3 %vm204_vm2, %v9457_v15  ;;  %7128 = vmatmul.msk.bf16.vlgmr.msrb.gmra.mxu0 %vm204_vm2, %v9457_v15 }
 0x54d   :  { %7129 = vmatmul.msk.bf16.vlgmr.msrb.gmra.mxu1 %vm204_vm2, %v9457_v15  ;;  %3682 = vmatpush.bf16.msrb.mxu3 %v7154_v7  ;;  %v7929_v15 = vld [vmem:[%s10492_s3 + $0x4c4] sm:$0xf] }
 0x54e   :  { %3695 = vmatpush.bf16.msrb.mxu0 %v7158_v31  ;;  %3708 = vmatpush.bf16.msrb.mxu1 %v7162_v60  ;;  %v7178_v0 = vor.u32 %v7929_v15, %v7175_v23 }
 0x554   :  { %7190 = vmatmul.msk.bf16.vlgmr.msrb.gmra.mxu2 %vm204_vm2, %v3731_v6 }
 0x55c   :  { %7147 = vmatmul.msk.bf16.vlgmr.msra.gmra.mxu3 %vm204_vm2, %v9489_v27  ;;  %7148 = vmatmul.msk.bf16.vlgmr.msra.gmra.mxu0 %vm204_vm2, %v9489_v27 }
 0x55d   :  { %7149 = vmatmul.msk.bf16.vlgmr.msra.gmra.mxu1 %vm204_vm2, %v9489_v27  ;;  %3766 = vmatpush.bf16.msra.mxu3 %v7174_v35  ;;  %v7194_v27 = vor.u32 %v7935_v39, %v7193_v37 }
 0x55e   :  { %3779 = vmatpush.bf16.msra.mxu0 %v7178_v0  ;;  %3792 = vmatpush.bf16.msra.mxu1 %v7182_v63 }
 0x564   :  { %7210 = vmatmul.msk.bf16.vlgmr.msra.gmra.mxu2 %vm204_vm2, %v3815_v3 }
 0x56c   :  { %7167 = vmatmul.msk.bf16.vlgmr.msrb.gmra.mxu3 %vm204_vm2, %v3647_v48  ;;  %7168 = vmatmul.msk.bf16.vlgmr.msrb.gmra.mxu0 %vm204_vm2, %v3647_v48 }
 0x56d   :  { %7169 = vmatmul.msk.bf16.vlgmr.msrb.gmra.mxu1 %vm204_vm2, %v3647_v48  ;;  %3850 = vmatpush.bf16.msrb.mxu3 %v7194_v27 }
 0x56e   :  { %3863 = vmatpush.bf16.msrb.mxu0 %v7198_v36  ;;  %3876 = vmatpush.bf16.msrb.mxu1 %v7202_v10 }
 0x57c   :  { %7187 = vmatmul.msk.bf16.vlgmr.msra.gmra.mxu3 %vm204_vm2, %v3731_v6  ;;  %7188 = vmatmul.msk.bf16.vlgmr.msra.gmra.mxu0 %vm204_vm2, %v3731_v6 }
 0x57d   :  { %7189 = vmatmul.msk.bf16.vlgmr.msra.gmra.mxu1 %vm204_vm2, %v3731_v6  ;;  %3941 = vmatpush.bf16.msra.mxu3 %v9288_v32 }
 0x581   :  { %3942 = vmatpush.bf16.msra.mxu3 %v9294_v33 }
 0x585   :  { %3943 = vmatpush.bf16.msra.mxu3 %v9300_v16 }
 0x589   :  { %v3277_v40 = vpop.f32.mrf.mxu0  ;;  %3944 = vmatpush.bf16.msra.mxu3 %v9306_v34 }
 0x58a   :  { %v3308_v41 = vadd.f32 %v3277_v40, %v9374_v14  ;;  %v3290_v42 = vpop.f32.mrf.mxu1 }
 0x58b   :  { %v3309_v29 = vadd.f32 %v3290_v42, %v9344_v24  ;;  %v7937_v24 = vld [vmem:[%s10491_s0 + $0xa0] sm:$0xff] }
 0x58c   :  { %7207 = vmatmul.msk.bf16.vlgmr.msrb.gmra.mxu3 %vm204_vm2, %v3815_v3  ;;  %7208 = vmatmul.msk.bf16.vlgmr.msrb.gmra.mxu0 %vm204_vm2, %v3815_v3 }
 0x58d   :  { %7209 = vmatmul.msk.bf16.vlgmr.msrb.gmra.mxu1 %vm204_vm2, %v3815_v3  ;;  %3945 = vmatpush.bf16.msra.mxu3 %v9316_v1 }
 0x58f   :  { %v3264_v32 = vpop.f32.mrf.mxu3 }
 0x590   :  { %v3307_v33 = vadd.f32 %v3264_v32, %v9372_v11 }
 0x591   :  { %v3279_v16 = vpop.f32.mrf.mxu0  ;;  %3946 = vmatpush.bf16.msra.mxu3 %v9324_v4  ;;  %v7938_v4 = vld [vmem:[%s10491_s0 + $0xa8] sm:$0xff] }
 0x592   :  { %v3292_v34 = vpop.f32.mrf.mxu1 }
 0x597   :  { %v3266_v43 = vpop.f32.mrf.mxu3 }
 0x599   :  { %v3348_v14 = vpop.f32.mrf.mxu0 }
 0x59a   :  { %v3391_v5 = vadd.f32 %v3348_v14, %v3307_v33  ;;  %v3361_v59 = vpop.f32.mrf.mxu1 }
 0x59b   :  { %v3392_v44 = vadd.f32 %v3361_v59, %v3308_v41 }
 0x59c   :  { %7227 = vmatmul.msk.bf16.vlgmr.msra.gmra.mxu3 %vm108_vm0, %v7937_v24 }
 0x59f   :  { %v3303_v45 = vpop.f32.mrf.mxu3 }
 0x5a0   :  { %v3310_v1 = vadd.f32 %v3303_v45, %v9364_v58 }
 0x5a1   :  { %v3350_v25 = vpop.f32.mrf.mxu0 }
 0x5a2   :  { %v3363_v11 = vpop.f32.mrf.mxu1 }
 0x5a7   :  { %v3305_v46 = vpop.f32.mrf.mxu3  ;;  %v3555_v47 = vpop.f32.mrf.mxu2 }
 0x5a9   :  { %v3387_v19 = vpop.f32.mrf.mxu0 }
 0x5aa   :  { %v3394_v13 = vadd.f32 %v3387_v19, %v3310_v1  ;;  %v3432_v48 = vpop.f32.mrf.mxu1 }
 0x5ab   :  { %v3475_v61 = vadd.f32 %v3432_v48, %v3391_v5 }
 0x5ac   :  { %7228 = vmatmul.msk.bf16.gmra.mxu3 %vm108_vm0, %v7938_v4  ;;  %v7943_v4 = vld [vmem:[%s10492_s3 + $0x50c] sm:$0xf0] }
 0x5af   :  { %v3374_v49 = vpop.f32.mrf.mxu3  ;;  %v3557_v50 = vpop.f32.mrf.mxu2 }
 0x5b0   :  { %v3393_v51 = vadd.f32 %v3374_v49, %v3309_v29 }
 0x5b1   :  { %v3389_v52 = vpop.f32.mrf.mxu0 }
 0x5b2   :  { %v3434_v54 = vpop.f32.mrf.mxu1 }
 0x5b7   :  { %v3376_v58 = vpop.f32.mrf.mxu3  ;;  %v3639_v55 = vpop.f32.mrf.mxu2 }
 0x5b8   :  { %v7941_v58 = vld [vmem:[%s10492_s3 + $0x504] sm:$0xf] }
 0x5b9   :  { %v3458_v57 = vpop.f32.mrf.mxu0 }
 0x5ba   :  { %v3477_v53 = vadd.f32 %v3458_v57, %v3393_v51  ;;  %v3471_v7 = vpop.f32.mrf.mxu1 }
 0x5bb   :  { %v3478_v31 = vadd.f32 %v3471_v7, %v3394_v13 }
 0x5bc   :  { %7229 = vmatmul.msk.bf16.gmra.mxu3 %vm108_vm0, %v7939_v56  ;;  %v7241_v56 = vld [vmem:[%s10492_s3 + $0x508] sm:$0xf] }
 0x5bd   :  { %v3562_v60 = vadd.f32 %v3555_v47, %v3478_v31  ;;  %v7233_v47 = vld [vmem:[%s10492_s3 + $0x500] sm:$0xf] }
 0x5be   :  { %v7234_v19 = vor.u32 %v7943_v4, %v7233_v47  ;;  %v7281_v47 = vld [vmem:[%s10492_s3 + $0x548] sm:$0xf] }
 0x5bf   :  { %v3445_v62 = vpop.f32.mrf.mxu3  ;;  %v3641_v6 = vpop.f32.mrf.mxu2  ;;  %v3646_v8 = vadd.f32 %v3639_v55, %v3562_v60  ;;  %v7235_v55 = vld [vmem:[%s10492_s3 + $0x510] sm:$0xf0] }
 0x5c0   :  { %v3476_v12 = vadd.f32 %v3445_v62, %v3392_v44  ;;  %4027 = vmatpush.bf16.msra.mxu0 %v7234_v19  ;;  %v7238_v57 = vor.u32 %v7941_v58, %v7235_v55  ;;  %v7952_v19 = vld [vmem:[%s10492_s3 + $0x554] sm:$0xf0]  ;;  %v7962_v55 = vld [vmem:[%s10492_s3 + $0x5ac] sm:$0xf] }
 0x5c1   :  { %v3460_v17 = vpop.f32.mrf.mxu0 }
 0x5c2   :  { %v3473_v18 = vpop.f32.mrf.mxu1  ;;  %4040 = vmatpush.bf16.msra.mxu1 %v7238_v57  ;;  %v7243_v17 = vld [vmem:[%s10492_s3 + $0x518] sm:$0xf0] }
 0x5c7   :  { %v3447_v15 = vpop.f32.mrf.mxu3  ;;  %v3723_v23 = vpop.f32.mrf.mxu2 }
 0x5c8   :  { %v3730_v26 = vadd.f32 %v3723_v23, %v3646_v8 }
 0x5c9   :  { %v3529_v30 = vpop.f32.mrf.mxu0 }
 0x5ca   :  { %v3560_v35 = vadd.f32 %v3529_v30, %v3476_v12  ;;  %v3542_v0 = vpop.f32.mrf.mxu1  ;;  %v7942_v12 = vld [vmem:[%s10492_s3 + $0x50c] sm:$0xf]  ;;  %v7253_v30 = vld [vmem:[%s10492_s3 + $0x520] sm:$0xf] }
 0x5cb   :  { %v3561_v63 = vadd.f32 %v3542_v0, %v3477_v53  ;;  %v7944_v53 = vld [vmem:[%s10492_s3 + $0x514] sm:$0xf0]  ;;  %v7246_v18 = vor.u32 %v7942_v12, %v7243_v17  ;;  %v7945_v0 = vld [vmem:[%s10492_s3 + $0x524] sm:$0xf] }
 0x5cc   :  { %7230 = vmatmul.msk.bf16.gmra.mxu3 %vm108_vm0, %v7940_v28  ;;  %v7242_v7 = vor.u32 %v7944_v53, %v7241_v56  ;;  %v7343_v56 = vld [vmem:[%s10492_s3 + $0x5b8] sm:$0xf0] }
 0x5cd   :  { %4066 = vmatpush.bf16.msrb.mxu0 %v7246_v18  ;;  %v7293_v18 = vld [vmem:[%s10492_s3 + $0x560] sm:$0xf] }
 0x5ce   :  { %4053 = vmatpush.bf16.msrb.mxu2 %v7242_v7  ;;  %v7346_v7 = vor.u32 %v7962_v55, %v7343_v56  ;;  %v7353_v55 = vld [vmem:[%s10492_s3 + $0x5c0] sm:$0xf]  ;;  %v7967_v56 = vld [vmem:[%s10492_s3 + $0x5cc] sm:$0xf0] }
 0x5cf   :  { %v3516_v2 = vpop.f32.mrf.mxu3  ;;  %v3725_v3 = vpop.f32.mrf.mxu2 }
 0x5d0   :  { %v3559_v37 = vadd.f32 %v3516_v2, %v3475_v61  ;;  %v7255_v2 = vld [vmem:[%s10492_s3 + $0x530] sm:$0xf0] }
 0x5d1   :  { %v3531_v39 = vpop.f32.mrf.mxu0  ;;  %v7258_v3 = vor.u32 %v7945_v0, %v7255_v2 }
 0x5d2   :  { %v3544_v20 = vpop.f32.mrf.mxu1  ;;  %v7954_v39 = vld [vmem:[%s10492_s3 + $0x56c] sm:$0xf] }
 0x5d3   :  { %4124 = vmatpush.bf16.msra.mxu2 %v7258_v3  ;;  %v7303_v20 = vld [vmem:[%s10492_s3 + $0x578] sm:$0xf0] }
 0x5d7   :  { %v3518_v21 = vpop.f32.mrf.mxu3  ;;  %v3807_v22 = vpop.f32.mrf.mxu2 }
 0x5d8   :  { %v3814_v9 = vadd.f32 %v3807_v22, %v3730_v26  ;;  %v7306_v21 = vor.u32 %v7954_v39, %v7303_v20  ;;  %v7966_v20 = vld [vmem:[%s10492_s3 + $0x5cc] sm:$0xf] }
 0x5d9   :  { %v3613_v27 = vpop.f32.mrf.mxu0 }
 0x5da   :  { %v3644_v36 = vadd.f32 %v3613_v27, %v3560_v35  ;;  %v3626_v10 = vpop.f32.mrf.mxu1  ;;  %v7947_v35 = vld [vmem:[%s10492_s3 + $0x52c] sm:$0xf0]  ;;  %4318 = vmatpush.bf16.msrb.mxu3 %v7306_v21  ;;  %v7261_v27 = vld [vmem:[%s10492_s3 + $0x528] sm:$0xf]  ;;  %v7363_v21 = vld [vmem:[%s10492_s3 + $0x5d8] sm:$0xf0] }
 0x5db   :  { %v3645_v40 = vadd.f32 %v3626_v10, %v3561_v63  ;;  %v7254_v63 = vor.u32 %v7947_v35, %v7253_v30  ;;  %v7946_v10 = vld [vmem:[%s10492_s3 + $0x52c] sm:$0xf]  ;;  %v7301_v30 = vld [vmem:[%s10492_s3 + $0x568] sm:$0xf]  ;;  %v7956_v35 = vld [vmem:[%s10492_s3 + $0x574] sm:$0xf0] }
 0x5dd   :  { %4111 = vmatpush.bf16.msrb.mxu1 %v7254_v63 }
 0x5df   :  { %v3600_v41 = vpop.f32.mrf.mxu3  ;;  %v3809_v42 = vpop.f32.mrf.mxu2 }
 0x5e0   :  { %v3643_v29 = vadd.f32 %v3600_v41, %v3559_v37  ;;  %v7273_v41 = vld [vmem:[%s10492_s3 + $0x540] sm:$0xf] }
 0x5e1   :  { %v3615_v32 = vpop.f32.mrf.mxu0 }
 0x5e2   :  { %v3628_v33 = vpop.f32.mrf.mxu1 }
 0x5e7   :  { %v3602_v16 = vpop.f32.mrf.mxu3  ;;  %v3891_v34 = vpop.f32.mrf.mxu2 }
 0x5e8   :  { %v9627_v43 = vadd.f32 %v3891_v34, %v3814_v9 }
 0x5e9   :  { %v3697_v24 = vpop.f32.mrf.mxu0 }
 0x5ea   :  { %v3728_v14 = vadd.f32 %v3697_v24, %v3644_v36  ;;  %v3710_v5 = vpop.f32.mrf.mxu1  ;;  %v7948_v36 = vld [vmem:[%s10492_s3 + $0x534] sm:$0xf0] }
 0x5eb   :  { %v3729_v59 = vadd.f32 %v3710_v5, %v3645_v40  ;;  %v7263_v40 = vld [vmem:[%s10492_s3 + $0x538] sm:$0xf0]  ;;  %v7262_v33 = vor.u32 %v7948_v36, %v7261_v27  ;;  %v7958_v5 = vld [vmem:[%s10492_s3 + $0x58c] sm:$0xf] }
 0x5ec   :  { %v7266_v34 = vor.u32 %v7946_v10, %v7263_v40  ;;  %v7313_v10 = vld [vmem:[%s10492_s3 + $0x580] sm:$0xf]  ;;  %v7959_v40 = vld [vmem:[%s10492_s3 + $0x58c] sm:$0xf0] }
 0x5ef   :  { %v3684_v44 = vpop.f32.mrf.mxu3  ;;  %v3893_v45 = vpop.f32.mrf.mxu2 }
 0x5f0   :  { %v3727_v1 = vadd.f32 %v3684_v44, %v3643_v29  ;;  %v7951_v29 = vld [vmem:[%s10492_s3 + $0x54c] sm:$0xf0] }
 0x5f1   :  { %v3699_v25 = vpop.f32.mrf.mxu0  ;;  %v7274_v24 = vor.u32 %v7951_v29, %v7273_v41  ;;  %v7957_v41 = vld [vmem:[%s10492_s3 + $0x584] sm:$0xf]  ;;  %v7321_v29 = vld [vmem:[%s10492_s3 + $0x588] sm:$0xf] }
 0x5f2   :  { %v3712_v11 = vpop.f32.mrf.mxu1 }
 0x5f3   :  { %v7949_v11 = vld [vmem:[%s10492_s3 + $0x544] sm:$0xf] }
 0x5f7   :  { %v3686_v46 = vpop.f32.mrf.mxu3 }
 0x5f8   :  { %v7275_v46 = vld [vmem:[%s10492_s3 + $0x550] sm:$0xf0] }
 0x5f9   :  { %v3781_v13 = vpop.f32.mrf.mxu0 }
 0x5fa   :  { %v3812_v48 = vadd.f32 %v3781_v13, %v3728_v14  ;;  %v3794_v61 = vpop.f32.mrf.mxu1  ;;  %v7950_v13 = vld [vmem:[%s10492_s3 + $0x54c] sm:$0xf] }
 0x5fb   :  { %v3813_v49 = vadd.f32 %v3794_v61, %v3729_v59  ;;  %v7323_v59 = vld [vmem:[%s10492_s3 + $0x598] sm:$0xf0]  ;;  %v7278_v61 = vor.u32 %v7949_v11, %v7275_v46  ;;  %v7333_v11 = vld [vmem:[%s10492_s3 + $0x5a0] sm:$0xf]  ;;  %v7963_v46 = vld [vmem:[%s10492_s3 + $0x5ac] sm:$0xf0] }
 0x5fc   :  { %v7326_v45 = vor.u32 %v7958_v5, %v7323_v59  ;;  %v7970_v5 = vld [vmem:[%s10492_s3 + $0x5ec] sm:$0xf]  ;;  %v7383_v59 = vld [vmem:[%s10492_s3 + $0x5f8] sm:$0xf0] }
 0x5fe   :  { %4402 = vmatpush.bf16.msra.mxu3 %v7326_v45  ;;  %v7386_v45 = vor.u32 %v7970_v5, %v7383_v59 }
 0x5ff   :  { %v3768_v50 = vpop.f32.mrf.mxu3 }
 0x600   :  { %v3811_v51 = vadd.f32 %v3768_v50, %v3727_v1  ;;  %v7282_v50 = vor.u32 %v7952_v19, %v7281_v47  ;;  %v7961_v47 = vld [vmem:[%s10492_s3 + $0x5a4] sm:$0xf]  ;;  %v7341_v19 = vld [vmem:[%s10492_s3 + $0x5a8] sm:$0xf] }
 0x601   :  { %v3783_v52 = vpop.f32.mrf.mxu0 }
 0x602   :  { %v3796_v54 = vpop.f32.mrf.mxu1 }
 0x607   :  { %v3770_v31 = vpop.f32.mrf.mxu3 }
 0x609   :  { %v3865_v60 = vpop.f32.mrf.mxu0 }
 0x60a   :  { %v9647_v62 = vadd.f32 %v3865_v60, %v3812_v48  ;;  %v3878_v6 = vpop.f32.mrf.mxu1  ;;  %v7283_v48 = vld [vmem:[%s10492_s3 + $0x558] sm:$0xf0] }
 0x60b   :  { %v9649_v8 = vadd.f32 %v3878_v6, %v3813_v49 }
 0x60f   :  { %v3852_v15 = vpop.f32.mrf.mxu3 }
 0x610   :  { %v9657_v23 = vadd.f32 %v3852_v15, %v3811_v51  ;;  %v7286_v51 = vor.u32 %v7950_v13, %v7283_v48  ;;  %v7955_v15 = vld [vmem:[%s10492_s3 + $0x56c] sm:$0xf0]  ;;  %v7964_v13 = vld [vmem:[%s10492_s3 + $0x5b4] sm:$0xf0] }
 0x611   :  { %v3867_v26 = vpop.f32.mrf.mxu0  ;;  %v7294_v2 = vor.u32 %v7955_v15, %v7293_v18  ;;  %v7373_v15 = vld [vmem:[%s10492_s3 + $0x5e0] sm:$0xf] }
 0x612   :  { %v3880_v28 = vpop.f32.mrf.mxu1  ;;  %v7953_v26 = vld [vmem:[%s10492_s3 + $0x564] sm:$0xf] }
 0x613   :  { %v7295_v28 = vld [vmem:[%s10492_s3 + $0x570] sm:$0xf0] }
 0x614   :  { %v7298_v3 = vor.u32 %v7953_v26, %v7295_v28  ;;  %v7971_v26 = vld [vmem:[%s10492_s3 + $0x5ec] sm:$0xf0]  ;;  %v7969_v28 = vld [vmem:[%s10492_s3 + $0x5e4] sm:$0xf] }
 0x617   :  { %v3854_v37 = vpop.f32.mrf.mxu3 }
 0x618   :  { %v7302_v37 = vor.u32 %v7956_v35, %v7301_v30  ;;  %v7375_v30 = vld [vmem:[%s10492_s3 + $0x5f0] sm:$0xf0]  ;;  %v7381_v35 = vld [vmem:[%s10492_s3 + $0x5e8] sm:$0xf] }
 0x61f   :  { %v3948_v22 = vpop.f32.mrf.mxu3 }
 0x620   :  { %v3949_v9 = vadd.f32 %v9397_v38, %v3948_v22 }
 0x622   :  { %vm3968_vm14 = vcmp.gt.f32.partialorder %v3949_v9, 0.0  ;;  %v3976_v42 = vmul.f32 0.2, %v3949_v9 }
 0x624   :  { %v3984_v32 = vsel %vm3968_vm14, %v3949_v9, %v3976_v42  ;;  %v7366_v9 = vor.u32 %v7966_v20, %v7363_v21  ;;  %v7315_v42 = vld [vmem:[%s10492_s3 + $0x590] sm:$0xf0]  ;;  %v9891_v20 = vld [vmem:[%s10489_s1 + $0x18] sm:$0xff] }
 0x625   :  { %v3992_v16 = vpack.c.bf16 %v3984_v32, %v3984_v32  ;;  %v7960_v32 = vld [vmem:[%s10492_s3 + $0x594] sm:$0xf0] }
 0x627   :  { %v3950_v14 = vpop.f32.mrf.mxu3  ;;  %7247 = vmatmul.msk.bf16.vlgmr.msra.gmra.mxu0 %vm204_vm2, %v3992_v16  ;;  %7248 = vmatmul.msk.bf16.vlgmr.msra.gmra.mxu1 %vm204_vm2, %v3992_v16 }
 0x628   :  { %7249 = vmatmul.msk.bf16.vlgmr.msrb.gmra.mxu2 %vm204_vm2, %v3992_v16  ;;  %4137 = vmatpush.bf16.msra.mxu0 %v7262_v33  ;;  %v3951_v44 = vadd.f32 %v9397_v38, %v3950_v14 }
 0x629   :  { %4150 = vmatpush.bf16.msra.mxu1 %v7266_v34  ;;  %4195 = vmatpush.bf16.msrb.mxu2 %v7274_v24  ;;  %v7318_v34 = vor.u32 %v7957_v41, %v7315_v42  ;;  %v7322_v24 = vor.u32 %v7960_v32, %v7321_v29  ;;  %v7973_v32 = vld [vmem:[%s10491_s0 + $0xc0] sm:$0xff] }
 0x62a   :  { %v3977_v1 = vmul.f32 0.2, %v3951_v44  ;;  %vm3969_vm15 = vcmp.gt.f32.partialorder %v3951_v44, 0.0 }
 0x62c   :  { %v3985_v4 = vsel %vm3969_vm15, %v3951_v44, %v3977_v1 }
 0x62d   :  { %v4076_v49 = vpack.c.bf16 %v3985_v4, %v3985_v4  ;;  %v7335_v4 = vld [vmem:[%s10492_s3 + $0x5b0] sm:$0xf0] }
 0x62f   :  { %v3953_v25 = vpop.f32.mrf.mxu3 }
 0x630   :  { %v3954_v58 = vadd.f32 %v9397_v38, %v3953_v25 }
 0x632   :  { %v3978_v31 = vmul.f32 0.2, %v3954_v58  ;;  %vm3970_vm3 = vcmp.gt.f32.partialorder %v3954_v58, 0.0 }
 0x634   :  { %v3986_v17 = vsel %vm3970_vm3, %v3954_v58, %v3978_v31 }
 0x635   :  { %v4160_v0 = vpack.c.bf16 %v3986_v17, %v3986_v17 }
 0x637   :  { %v3955_v52 = vpop.f32.mrf.mxu3  ;;  %7250 = vmatmul.msk.bf16.vlgmr.msrb.gmra.mxu0 %vm204_vm2, %v3992_v16  ;;  %7267 = vmatmul.msk.bf16.vlgmr.msrb.gmra.mxu1 %vm204_vm2, %v4076_v49  ;;  %v7314_v16 = vor.u32 %v7959_v40, %v7313_v10  ;;  %v9908_v10 = vld [vmem:[%s10489_s1 + $0x8] sm:$0xff] }
 0x638   :  { %v3956_v54 = vadd.f32 %v9397_v38, %v3955_v52  ;;  %7268 = vmatmul.msk.bf16.vlgmr.msra.gmra.mxu2 %vm204_vm2, %v4076_v49  ;;  %4208 = vmatpush.bf16.msrb.mxu0 %v7278_v61  ;;  %v7334_v61 = vor.u32 %v7963_v46, %v7333_v11 }
 0x639   :  { %4221 = vmatpush.bf16.msrb.mxu1 %v7282_v50  ;;  %4234 = vmatpush.bf16.msra.mxu2 %v7286_v51  ;;  %v7342_v50 = vor.u32 %v7964_v13, %v7341_v19 }
 0x63a   :  { %vm3971_vm1 = vcmp.gt.f32.partialorder %v3956_v54, 0.0  ;;  %v3979_v57 = vmul.f32 0.2, %v3956_v54 }
 0x63c   :  { %v3987_v53 = vsel %vm3971_vm1, %v3956_v54, %v3979_v57  ;;  %v7965_v57 = vld [vmem:[%s10492_s3 + $0x5c4] sm:$0xf] }
 0x63d   :  { %v9735_v60 = vpack.c.bf16 %v3987_v53, %v3987_v53  ;;  %v7355_v53 = vld [vmem:[%s10492_s3 + $0x5d0] sm:$0xf0] }
 0x63f   :  { %7310 = vmatmul.msk.bf16.vlgmr.msrb.gmra.mxu3 %vm204_vm2, %v9735_v60  ;;  %v3958_v6 = vpop.f32.mrf.mxu3 }
 0x640   :  { %v3959_v12 = vadd.f32 %v9397_v38, %v3958_v6  ;;  %4486 = vmatpush.bf16.msrb.mxu3 %v7346_v7  ;;  %v7968_v7 = vld [vmem:[%s10492_s3 + $0x5d4] sm:$0xf0]  ;;  %v7358_v6 = vor.u32 %v7965_v57, %v7355_v53 }
 0x642   :  { %v3980_v63 = vmul.f32 0.2, %v3959_v12  ;;  %vm3972_vm4 = vcmp.gt.f32.partialorder %v3959_v12, 0.0 }
 0x644   :  { %v3988_v39 = vsel %vm3972_vm4, %v3959_v12, %v3980_v63  ;;  %v7374_v63 = vor.u32 %v7971_v26, %v7373_v15 }
 0x645   :  { %v9767_v22 = vpack.c.bf16 %v3988_v39, %v3988_v39  ;;  %v9885_v39 = vld [vmem:[%s10489_s1 + $0x20] sm:$0xff] }
 0x647   :  { %7269 = vmatmul.msk.bf16.vlgmr.msra.gmra.mxu0 %vm204_vm2, %v4076_v49  ;;  %7270 = vmatmul.msk.bf16.vlgmr.msra.gmra.mxu1 %vm204_vm2, %v4076_v49  ;;  %v3960_v27 = vpop.f32.mrf.mxu3  ;;  %v7338_v49 = vor.u32 %v7961_v47, %v7335_v4 }
 0x648   :  { %7287 = vmatmul.msk.bf16.vlgmr.msrb.gmra.mxu2 %vm204_vm2, %v4160_v0  ;;  %4279 = vmatpush.bf16.msra.mxu0 %v7294_v2  ;;  %v3961_v36 = vadd.f32 %v9397_v38, %v3960_v27  ;;  %v7378_v2 = vor.u32 %v7969_v28, %v7375_v30 }
 0x649   :  { %4292 = vmatpush.bf16.msra.mxu1 %v7298_v3  ;;  %4305 = vmatpush.bf16.msrb.mxu2 %v7302_v37  ;;  %v9879_v37 = vld [vmem:[%s10489_s1 + $0x28] sm:$0xff] }
 0x64a   :  { %v3981_v33 = vmul.f32 0.2, %v3961_v36  ;;  %vm3973_vm5 = vcmp.gt.f32.partialorder %v3961_v36, 0.0 }
 0x64c   :  { %v3989_v14 = vsel %vm3973_vm5, %v3961_v36, %v3981_v33 }
 0x64d   :  { %v4412_v44 = vpack.c.bf16 %v3989_v14, %v3989_v14 }
 0x64f   :  { %7330 = vmatmul.msk.bf16.vlgmr.msra.gmra.mxu3 %vm204_vm2, %v9767_v22  ;;  %v3963_v1 = vpop.f32.mrf.mxu3 }
 0x650   :  { %4570 = vmatpush.bf16.msra.mxu3 %v7366_v9  ;;  %v3964_v25 = vadd.f32 %v9397_v38, %v3963_v1  ;;  %v9897_v9 = vld [vmem:[%s10489_s1 + $0x10] sm:$0xff]  ;;  %v7974_v1 = vld [vmem:[%s10491_s0 + $0xc8] sm:$0xff] }
 0x652   :  { %v3982_v48 = vmul.f32 0.2, %v3964_v25  ;;  %vm3974_vm6 = vcmp.gt.f32.partialorder %v3964_v25, 0.0 }
 0x654   :  { %v3990_v51 = vsel %vm3974_vm6, %v3964_v25, %v3982_v48 }
 0x655   :  { %v4496_v52 = vpack.c.bf16 %v3990_v51, %v3990_v51 }
 0x657   :  { %7288 = vmatmul.msk.bf16.vlgmr.msrb.gmra.mxu0 %vm204_vm2, %v4160_v0  ;;  %7289 = vmatmul.msk.bf16.vlgmr.msrb.gmra.mxu1 %vm204_vm2, %v4160_v0  ;;  %v3965_v54 = vpop.f32.mrf.mxu3 }
 0x658   :  { %7290 = vmatmul.msk.bf16.vlgmr.msra.gmra.mxu2 %vm204_vm2, %v4160_v0  ;;  %4363 = vmatpush.bf16.msrb.mxu0 %v7314_v16  ;;  %v3966_v58 = vadd.f32 %v9397_v38, %v3965_v54  ;;  %v7361_v38 = vld [vmem:[%s10492_s3 + $0x5c8] sm:$0xf]  ;;  %v7972_v0 = vld [vmem:[%s10492_s3 + $0x5f4] sm:$0xf0] }
 0x659   :  { %4376 = vmatpush.bf16.msrb.mxu1 %v7318_v34  ;;  %4389 = vmatpush.bf16.msra.mxu2 %v7322_v24  ;;  %v7362_v12 = vor.u32 %v7968_v7, %v7361_v38  ;;  %v7382_v3 = vor.u32 %v7972_v0, %v7381_v35 }
 0x65a   :  { %v3983_v31 = vmul.f32 0.2, %v3966_v58  ;;  %vm3975_vm7 = vcmp.gt.f32.partialorder %v3966_v58, 0.0 }
 0x65c   :  { %v3991_v17 = vsel %vm3975_vm7, %v3966_v58, %v3983_v31 }
 0x65d   :  { %v4580_v18 = vpack.c.bf16 %v3991_v17, %v3991_v17  ;;  %v7976_v17 = vld [vmem:[%s10491_s0 + $0xd8] sm:$0xff] }
 0x65f   :  { %7350 = vmatmul.msk.bf16.vlgmr.msrb.gmra.mxu3 %vm204_vm2, %v4412_v44 }
 0x660   :  { %4654 = vmatpush.bf16.msrb.mxu3 %v7386_v45 }
 0x667   :  { %7307 = vmatmul.msk.bf16.vlgmr.msra.gmra.mxu0 %vm204_vm2, %v9735_v60  ;;  %7308 = vmatmul.msk.bf16.vlgmr.msra.gmra.mxu1 %vm204_vm2, %v9735_v60 }
 0x668   :  { %7309 = vmatmul.msk.bf16.vlgmr.msrb.gmra.mxu2 %vm204_vm2, %v9735_v60  ;;  %4447 = vmatpush.bf16.msra.mxu0 %v7334_v61  ;;  %v7354_v60 = vor.u32 %v7967_v56, %v7353_v55 }
 0x669   :  { %4460 = vmatpush.bf16.msra.mxu1 %v7338_v49  ;;  %4473 = vmatpush.bf16.msrb.mxu2 %v7342_v50  ;;  %v7975_v50 = vld [vmem:[%s10491_s0 + $0xd0] sm:$0xff] }
 0x66f   :  { %7370 = vmatmul.msk.bf16.vlgmr.msra.gmra.mxu3 %vm204_vm2, %v4496_v52 }
 0x677   :  { %7327 = vmatmul.msk.bf16.vlgmr.msrb.gmra.mxu0 %vm204_vm2, %v9767_v22  ;;  %7328 = vmatmul.msk.bf16.vlgmr.msrb.gmra.mxu1 %vm204_vm2, %v9767_v22 }
 0x678   :  { %7329 = vmatmul.msk.bf16.vlgmr.msra.gmra.mxu2 %vm204_vm2, %v9767_v22  ;;  %4531 = vmatpush.bf16.msrb.mxu0 %v7354_v60 }
 0x679   :  { %4544 = vmatpush.bf16.msrb.mxu1 %v7358_v6  ;;  %4557 = vmatpush.bf16.msra.mxu2 %v7362_v12 }
 0x67f   :  { %7390 = vmatmul.msk.bf16.vlgmr.msrb.gmra.mxu3 %vm204_vm2, %v4580_v18 }
 0x687   :  { %7347 = vmatmul.msk.bf16.vlgmr.msra.gmra.mxu0 %vm204_vm2, %v4412_v44  ;;  %7348 = vmatmul.msk.bf16.vlgmr.msra.gmra.mxu1 %vm204_vm2, %v4412_v44 }
 0x688   :  { %7349 = vmatmul.msk.bf16.vlgmr.msrb.gmra.mxu2 %vm204_vm2, %v4412_v44  ;;  %4615 = vmatpush.bf16.msra.mxu0 %v7374_v63 }
 0x689   :  { %4628 = vmatpush.bf16.msra.mxu1 %v7378_v2  ;;  %4641 = vmatpush.bf16.msrb.mxu2 %v7382_v3 }
 0x697   :  { %7367 = vmatmul.msk.bf16.vlgmr.msrb.gmra.mxu0 %vm204_vm2, %v4496_v52  ;;  %7368 = vmatmul.msk.bf16.vlgmr.msrb.gmra.mxu1 %vm204_vm2, %v4496_v52 }
 0x698   :  { %7369 = vmatmul.msk.bf16.vlgmr.msra.gmra.mxu2 %vm204_vm2, %v4496_v52  ;;  %4706 = vmatpush.bf16.msrb.mxu0 %v9879_v37 }
 0x69c   :  { %4707 = vmatpush.bf16.msrb.mxu0 %v9885_v39 }
 0x6a0   :  { %4708 = vmatpush.bf16.msrb.mxu0 %v9891_v20 }
 0x6a4   :  { %v4029_v21 = vpop.f32.mrf.mxu0  ;;  %v4042_v22 = vpop.f32.mrf.mxu1  ;;  %4709 = vmatpush.bf16.msrb.mxu0 %v9897_v9 }
 0x6a5   :  { %v4072_v27 = vadd.f32 %v4029_v21, %v9657_v23  ;;  %v4073_v36 = vadd.f32 %v4042_v22, %v9647_v62  ;;  %v9915_v62 = vld [vmem:[%s10489_s1] sm:$0xff] }
 0x6a7   :  { %7387 = vmatmul.msk.bf16.vlgmr.msra.gmra.mxu0 %vm204_vm2, %v4580_v18  ;;  %7388 = vmatmul.msk.bf16.vlgmr.msra.gmra.mxu1 %vm204_vm2, %v4580_v18 }
 0x6a8   :  { %7389 = vmatmul.msk.bf16.vlgmr.msrb.gmra.mxu2 %vm204_vm2, %v4580_v18  ;;  %4710 = vmatpush.bf16.msrb.mxu0 %v9908_v10 }
 0x6ab   :  { %v4055_v40 = vpop.f32.mrf.mxu2 }
 0x6ac   :  { %v4074_v41 = vadd.f32 %v4055_v40, %v9649_v8  ;;  %v4031_v42 = vpop.f32.mrf.mxu0  ;;  %v4044_v23 = vpop.f32.mrf.mxu1  ;;  %4711 = vmatpush.bf16.msrb.mxu0 %v9915_v62 }
 0x6b3   :  { %v4057_v29 = vpop.f32.mrf.mxu2 }
 0x6b4   :  { %v4068_v33 = vpop.f32.mrf.mxu0  ;;  %v4113_v16 = vpop.f32.mrf.mxu1 }
 0x6b5   :  { %v4075_v34 = vadd.f32 %v4068_v33, %v9627_v43  ;;  %v4156_v24 = vadd.f32 %v4113_v16, %v4072_v27 }
 0x6b7   :  { %7407 = vmatmul.msk.bf16.vlgmr.msrb.gmra.mxu0 %vm108_vm0, %v7973_v32 }
 0x6bb   :  { %v4126_v8 = vpop.f32.mrf.mxu2 }
 0x6bc   :  { %v4157_v14 = vadd.f32 %v4126_v8, %v4073_v36  ;;  %v4070_v5 = vpop.f32.mrf.mxu0  ;;  %v4115_v59 = vpop.f32.mrf.mxu1 }
 0x6c2   :  { %v4320_v44 = vpop.f32.mrf.mxu3 }
 0x6c3   :  { %v4128_v45 = vpop.f32.mrf.mxu2 }
 0x6c4   :  { %v4139_v25 = vpop.f32.mrf.mxu0  ;;  %v4152_v11 = vpop.f32.mrf.mxu1 }
 0x6c5   :  { %v4158_v46 = vadd.f32 %v4139_v25, %v4074_v41  ;;  %v4159_v47 = vadd.f32 %v4152_v11, %v4075_v34 }
 0x6c7   :  { %7408 = vmatmul.msk.bf16.gmra.mxu0 %vm108_vm0, %v7974_v1 }
 0x6ca   :  { %v4322_v43 = vpop.f32.mrf.mxu3 }
 0x6cb   :  { %v4197_v4 = vpop.f32.mrf.mxu2 }
 0x6cc   :  { %v4240_v19 = vadd.f32 %v4197_v4, %v4156_v24  ;;  %v4141_v13 = vpop.f32.mrf.mxu0  ;;  %v4154_v48 = vpop.f32.mrf.mxu1 }
 0x6d2   :  { %v4404_v61 = vpop.f32.mrf.mxu3 }
 0x6d3   :  { %v4199_v49 = vpop.f32.mrf.mxu2 }
 0x6d4   :  { %v4210_v51 = vpop.f32.mrf.mxu0  ;;  %v4223_v52 = vpop.f32.mrf.mxu1  ;;  %v7977_v49 = vld [vmem:[%s10492_s3 + $0x604] sm:$0xf] }
 0x6d5   :  { %v4241_v54 = vadd.f32 %v4210_v51, %v4157_v14  ;;  %v4242_v58 = vadd.f32 %v4223_v52, %v4158_v46  ;;  %v7413_v46 = vld [vmem:[%s10492_s3 + $0x600] sm:$0xf]  ;;  %v7421_v51 = vld [vmem:[%s10492_s3 + $0x608] sm:$0xf] }
 0x6d7   :  { %7409 = vmatmul.msk.bf16.gmra.mxu0 %vm108_vm0, %v7975_v50  ;;  %v7415_v50 = vld [vmem:[%s10492_s3 + $0x610] sm:$0xf0] }
 0x6d8   :  { %v7418_v52 = vor.u32 %v7977_v49, %v7415_v50  ;;  %v7988_v50 = vld [vmem:[%s10492_s3 + $0x654] sm:$0xf0] }
 0x6da   :  { %v4406_v55 = vpop.f32.mrf.mxu3  ;;  %4805 = vmatpush.bf16.msra.mxu2 %v7418_v52  ;;  %v7463_v52 = vld [vmem:[%s10492_s3 + $0x658] sm:$0xf0] }
 0x6db   :  { %v4236_v56 = vpop.f32.mrf.mxu2 }
 0x6dc   :  { %v4243_v57 = vadd.f32 %v4236_v56, %v4159_v47  ;;  %v4212_v53 = vpop.f32.mrf.mxu0  ;;  %v4225_v38 = vpop.f32.mrf.mxu1  ;;  %v7979_v47 = vld [vmem:[%s10492_s3 + $0x60c] sm:$0xf0] }
 0x6dd   :  { %v7414_v43 = vor.u32 %v7979_v47, %v7413_v46  ;;  %v7978_v38 = vld [vmem:[%s10492_s3 + $0x60c] sm:$0xf]  ;;  %v7503_v46 = vld [vmem:[%s10492_s3 + $0x698] sm:$0xf0] }
 0x6de   :  { %v4327_v7 = vadd.f32 %v4320_v44, %v4243_v57 }
 0x6df   :  { %4792 = vmatpush.bf16.msrb.mxu1 %v7414_v43 }
 0x6e0   :  { %v4411_v31 = vadd.f32 %v4404_v61, %v4327_v7  ;;  %v7423_v7 = vld [vmem:[%s10492_s3 + $0x618] sm:$0xf0] }
 0x6e2   :  { %v4488_v60 = vpop.f32.mrf.mxu3 }
 0x6e3   :  { %v4238_v6 = vpop.f32.mrf.mxu2  ;;  %v4495_v12 = vadd.f32 %v4488_v60, %v4411_v31  ;;  %v7426_v60 = vor.u32 %v7978_v38, %v7423_v7  ;;  %v7998_v7 = vld [vmem:[%s10492_s3 + $0x6ac] sm:$0xf] }
 0x6e4   :  { %v4281_v18 = vpop.f32.mrf.mxu0  ;;  %v4294_v15 = vpop.f32.mrf.mxu1 }
 0x6e5   :  { %v4324_v26 = vadd.f32 %v4281_v18, %v4240_v19  ;;  %v4325_v28 = vadd.f32 %v4294_v15, %v4241_v54  ;;  %v7980_v54 = vld [vmem:[%s10492_s3 + $0x614] sm:$0xf0]  ;;  %4831 = vmatpush.bf16.msra.mxu1 %v7426_v60  ;;  %v7433_v15 = vld [vmem:[%s10492_s3 + $0x620] sm:$0xf] }
 0x6e7   :  { %7410 = vmatmul.msk.bf16.gmra.mxu0 %vm108_vm0, %v7976_v17 }
 0x6ea   :  { %v4490_v30 = vpop.f32.mrf.mxu3 }
 0x6eb   :  { %v4307_v35 = vpop.f32.mrf.mxu2 }
 0x6ec   :  { %v4326_v0 = vadd.f32 %v4307_v35, %v4242_v58  ;;  %v4283_v63 = vpop.f32.mrf.mxu0  ;;  %v4296_v2 = vpop.f32.mrf.mxu1  ;;  %v7422_v58 = vor.u32 %v7980_v54, %v7421_v51  ;;  %v7435_v35 = vld [vmem:[%s10492_s3 + $0x630] sm:$0xf0]  ;;  %v7986_v51 = vld [vmem:[%s10492_s3 + $0x64c] sm:$0xf] }
 0x6ee   :  { %4818 = vmatpush.bf16.msra.mxu3 %v7422_v58 }
 0x6f2   :  { %v4572_v3 = vpop.f32.mrf.mxu3 }
 0x6f3   :  { %v4309_v21 = vpop.f32.mrf.mxu2  ;;  %v4579_v22 = vadd.f32 %v4572_v3, %v4495_v12 }
 0x6f4   :  { %v4365_v27 = vpop.f32.mrf.mxu0  ;;  %v4378_v36 = vpop.f32.mrf.mxu1 }
 0x6f5   :  { %v4408_v40 = vadd.f32 %v4365_v27, %v4324_v26  ;;  %v4409_v41 = vadd.f32 %v4378_v36, %v4325_v28  ;;  %v7983_v26 = vld [vmem:[%s10492_s3 + $0x62c] sm:$0xf0]  ;;  %v7981_v28 = vld [vmem:[%s10492_s3 + $0x624] sm:$0xf]  ;;  %v7483_v27 = vld [vmem:[%s10492_s3 + $0x678] sm:$0xf0] }
 0x6f6   :  { %v7434_v30 = vor.u32 %v7983_v26, %v7433_v15 }
 0x6f8   :  { %4876 = vmatpush.bf16.msrb.mxu2 %v7434_v30 }
 0x6fa   :  { %v4574_v42 = vpop.f32.mrf.mxu3 }
 0x6fb   :  { %v4391_v23 = vpop.f32.mrf.mxu2  ;;  %v9988_v42 = vld [vmem:[%s10490_s2] ss:$0 sm:$0xff] }
 0x6fc   :  { %v4410_v29 = vadd.f32 %v4391_v23, %v4326_v0  ;;  %v4367_v32 = vpop.f32.mrf.mxu0  ;;  %v4380_v33 = vpop.f32.mrf.mxu1  ;;  %v7438_v0 = vor.u32 %v7981_v28, %v7435_v35 }
 0x6fd   :  { %v7984_v32 = vld [vmem:[%s10492_s3 + $0x634] sm:$0xf0]  ;;  %v7982_v33 = vld [vmem:[%s10492_s3 + $0x62c] sm:$0xf] }
 0x6fe   :  { %4889 = vmatpush.bf16.msrb.mxu3 %v7438_v0  ;;  %v7473_v0 = vld [vmem:[%s10492_s3 + $0x660] sm:$0xf] }
 0x702   :  { %v4656_v16 = vpop.f32.mrf.mxu3 }
 0x703   :  { %v4393_v34 = vpop.f32.mrf.mxu2  ;;  %v9935_v24 = vadd.f32 %v4656_v16, %v4579_v22  ;;  %v7990_v22 = vld [vmem:[%s10492_s3 + $0x66c] sm:$0xf]  ;;  %v7443_v16 = vld [vmem:[%s10492_s3 + $0x638] sm:$0xf0] }
 0x704   :  { %v4449_v8 = vpop.f32.mrf.mxu0  ;;  %v4462_v14 = vpop.f32.mrf.mxu1  ;;  %v7486_v36 = vor.u32 %v7990_v22, %v7483_v27  ;;  %v7453_v34 = vld [vmem:[%s10492_s3 + $0x640] sm:$0xf]  ;;  %v7481_v22 = vld [vmem:[%s10492_s3 + $0x668] sm:$0xf]  ;;  %v7992_v27 = vld [vmem:[%s10492_s3 + $0x674] sm:$0xf0] }
 0x705   :  { %v4492_v5 = vadd.f32 %v4449_v8, %v4408_v40  ;;  %v4493_v59 = vadd.f32 %v4462_v14, %v4409_v41  ;;  %v7987_v14 = vld [vmem:[%s10492_s3 + $0x64c] sm:$0xf0] }
 0x706   :  { %5083 = vmatpush.bf16.msra.mxu0 %v7486_v36 }
 0x70a   :  { %v4658_v44 = vpop.f32.mrf.mxu3 }
 0x70b   :  { %v4475_v45 = vpop.f32.mrf.mxu2 }
 0x70c   :  { %v4494_v1 = vadd.f32 %v4475_v45, %v4410_v29  ;;  %v4451_v25 = vpop.f32.mrf.mxu0  ;;  %v4464_v11 = vpop.f32.mrf.mxu1  ;;  %v7441_v29 = vld [vmem:[%s10492_s3 + $0x628] sm:$0xf]  ;;  %v7446_v45 = vor.u32 %v7982_v33, %v7443_v16  ;;  %v8002_v33 = vld [vmem:[%s10492_s3 + $0x6cc] sm:$0xf]  ;;  %v7543_v16 = vld [vmem:[%s10492_s3 + $0x6d8] sm:$0xf0] }
 0x70d   :  { %v7994_v11 = vld [vmem:[%s10492_s3 + $0x68c] sm:$0xf] }
 0x70e   :  { %v7506_v43 = vor.u32 %v7994_v11, %v7503_v46  ;;  %v7996_v11 = vld [vmem:[%s10492_s3 + $0x694] sm:$0xf0] }
 0x710   :  { %5167 = vmatpush.bf16.msrb.mxu0 %v7506_v43 }
 0x713   :  { %v4477_v4 = vpop.f32.mrf.mxu2 }
 0x714   :  { %v4533_v19 = vpop.f32.mrf.mxu0  ;;  %v4546_v13 = vpop.f32.mrf.mxu1 }
 0x715   :  { %v4576_v48 = vadd.f32 %v4533_v19, %v4492_v5  ;;  %v4577_v61 = vadd.f32 %v4546_v13, %v4493_v59  ;;  %v7442_v59 = vor.u32 %v7984_v32, %v7441_v29  ;;  %v7985_v13 = vld [vmem:[%s10492_s3 + $0x644] sm:$0xf]  ;;  %v7482_v29 = vor.u32 %v7992_v27, %v7481_v22 }
 0x71b   :  { %v4559_v55 = vpop.f32.mrf.mxu2 }
 0x71c   :  { %v4578_v56 = vadd.f32 %v4559_v55, %v4494_v1  ;;  %v4535_v57 = vpop.f32.mrf.mxu0  ;;  %v4548_v53 = vpop.f32.mrf.mxu1  ;;  %v7454_v1 = vor.u32 %v7987_v14, %v7453_v34 }
 0x723   :  { %v4561_v31 = vpop.f32.mrf.mxu2 }
 0x724   :  { %v4617_v6 = vpop.f32.mrf.mxu0  ;;  %v4630_v12 = vpop.f32.mrf.mxu1  ;;  %v7523_v31 = vld [vmem:[%s10492_s3 + $0x6b8] sm:$0xf0] }
 0x725   :  { %v9961_v17 = vadd.f32 %v4617_v6, %v4576_v48  ;;  %v9963_v18 = vadd.f32 %v4630_v12, %v4577_v61  ;;  %v7455_v48 = vld [vmem:[%s10492_s3 + $0x650] sm:$0xf0]  ;;  %v7461_v61 = vld [vmem:[%s10492_s3 + $0x648] sm:$0xf]  ;;  %v7526_v12 = vor.u32 %v7998_v7, %v7523_v31 }
 0x726   :  { %v7458_v54 = vor.u32 %v7985_v13, %v7455_v48  ;;  %v7462_v55 = vor.u32 %v7988_v50, %v7461_v61  ;;  %v8006_v13 = vld [vmem:[%s10492_s3 + $0x6ec] sm:$0xf]  ;;  %v7563_v48 = vld [vmem:[%s10492_s3 + $0x6f8] sm:$0xf0] }
 0x72b   :  { %v4643_v63 = vpop.f32.mrf.mxu2 }
 0x72c   :  { %v9977_v2 = vadd.f32 %v4643_v63, %v4578_v56  ;;  %v4619_v3 = vpop.f32.mrf.mxu0  ;;  %v4632_v21 = vpop.f32.mrf.mxu1  ;;  %v7466_v56 = vor.u32 %v7986_v51, %v7463_v52  ;;  %v7991_v63 = vld [vmem:[%s10492_s3 + $0x66c] sm:$0xf0]  ;;  %v7513_v52 = vld [vmem:[%s10492_s3 + $0x6a0] sm:$0xf] }
 0x72d   :  { %v7989_v3 = vld [vmem:[%s10492_s3 + $0x664] sm:$0xf]  ;;  %v7475_v21 = vld [vmem:[%s10492_s3 + $0x670] sm:$0xf0] }
 0x733   :  { %v4645_v40 = vpop.f32.mrf.mxu2 }
 0x734   :  { %v4713_v41 = vpop.f32.mrf.mxu0 }
 0x735   :  { %v4714_v23 = vadd.f32 %v9988_v42, %v4713_v41  ;;  %v7474_v41 = vor.u32 %v7991_v63, %v7473_v0  ;;  %v7541_v0 = vld [vmem:[%s10492_s3 + $0x6c8] sm:$0xf]  ;;  %v8004_v63 = vld [vmem:[%s10492_s3 + $0x6d4] sm:$0xf0] }
 0x736   :  { %v7542_v27 = vor.u32 %v8004_v63, %v7541_v0  ;;  %v8012_v63 = vld [vmem:[%s10491_s0 + $0xf8] sm:$0xff] }
 0x737   :  { %vm4733_vm8 = vcmp.gt.f32.partialorder %v4714_v23, 0.0  ;;  %v4741_v8 = vmul.f32 0.2, %v4714_v23 }
 0x739   :  { %v4749_v5 = vsel %vm4733_vm8, %v4714_v23, %v4741_v8  ;;  %v7478_v23 = vor.u32 %v7989_v3, %v7475_v21  ;;  %v7546_v8 = vor.u32 %v8002_v33, %v7543_v16  ;;  %v7561_v33 = vld [vmem:[%s10492_s3 + $0x6e8] sm:$0xf]  ;;  %v8008_v16 = vld [vmem:[%s10492_s3 + $0x6f4] sm:$0xf0] }
 0x73a   :  { %v4757_v44 = vpack.c.bf16 %v4749_v5, %v4749_v5 }
 0x73c   :  { %v4715_v25 = vpop.f32.mrf.mxu0  ;;  %7427 = vmatmul.msk.bf16.vlgmr.msrb.gmra.mxu1 %vm204_vm2, %v4757_v44  ;;  %7428 = vmatmul.msk.bf16.vlgmr.msra.gmra.mxu2 %vm204_vm2, %v4757_v44 }
 0x73d   :  { %7429 = vmatmul.msk.bf16.vlgmr.msra.gmra.mxu3 %vm204_vm2, %v4757_v44  ;;  %4902 = vmatpush.bf16.msrb.mxu1 %v7442_v59  ;;  %v4716_v47 = vadd.f32 %v9988_v42, %v4715_v25  ;;  %v7493_v59 = vld [vmem:[%s10492_s3 + $0x680] sm:$0xf]  ;;  %v7501_v25 = vld [vmem:[%s10492_s3 + $0x688] sm:$0xf] }
 0x73e   :  { %4915 = vmatpush.bf16.msra.mxu2 %v7446_v45  ;;  %4960 = vmatpush.bf16.msra.mxu3 %v7454_v1  ;;  %v7993_v45 = vld [vmem:[%s10492_s3 + $0x684] sm:$0xf]  ;;  %v7495_v1 = vld [vmem:[%s10492_s3 + $0x690] sm:$0xf0] }
 0x73f   :  { %v4742_v4 = vmul.f32 0.2, %v4716_v47  ;;  %vm4734_vm9 = vcmp.gt.f32.partialorder %v4716_v47, 0.0  ;;  %v7498_v43 = vor.u32 %v7993_v45, %v7495_v1 }
 0x741   :  { %v4750_v49 = vsel %vm4734_vm9, %v4716_v47, %v4742_v4  ;;  %v7502_v4 = vor.u32 %v7996_v11, %v7501_v25 }
 0x742   :  { %v4841_v58 = vpack.c.bf16 %v4750_v49, %v4750_v49  ;;  %v7566_v49 = vor.u32 %v8006_v13, %v7563_v48 }
 0x744   :  { %v4718_v19 = vpop.f32.mrf.mxu0 }
 0x745   :  { %v4719_v38 = vadd.f32 %v9988_v42, %v4718_v19 }
 0x747   :  { %v4743_v15 = vmul.f32 0.2, %v4719_v38  ;;  %vm4735_vm11 = vcmp.gt.f32.partialorder %v4719_v38, 0.0 }
 0x749   :  { %v4751_v35 = vsel %vm4735_vm11, %v4719_v38, %v4743_v15 }
 0x74a   :  { %v4925_v36 = vpack.c.bf16 %v4751_v35, %v4751_v35  ;;  %v7535_v35 = vld [vmem:[%s10492_s3 + $0x6d0] sm:$0xf0] }
 0x74c   :  { %v4720_v57 = vpop.f32.mrf.mxu0  ;;  %7430 = vmatmul.msk.bf16.vlgmr.msra.gmra.mxu1 %vm204_vm2, %v4757_v44  ;;  %7447 = vmatmul.msk.bf16.vlgmr.msrb.gmra.mxu2 %vm204_vm2, %v4841_v58  ;;  %v7995_v44 = vld [vmem:[%s10492_s3 + $0x68c] sm:$0xf0] }
 0x74d   :  { %v4721_v53 = vadd.f32 %v9988_v42, %v4720_v57  ;;  %7448 = vmatmul.msk.bf16.vlgmr.msrb.gmra.mxu3 %vm204_vm2, %v4841_v58  ;;  %4973 = vmatpush.bf16.msra.mxu1 %v7458_v54  ;;  %v7494_v47 = vor.u32 %v7995_v44, %v7493_v59  ;;  %v7999_v54 = vld [vmem:[%s10492_s3 + $0x6ac] sm:$0xf0]  ;;  %v8000_v57 = vld [vmem:[%s10492_s3 + $0x6b4] sm:$0xf0] }
 0x74e   :  { %4986 = vmatpush.bf16.msrb.mxu2 %v7462_v55  ;;  %4999 = vmatpush.bf16.msrb.mxu3 %v7466_v56  ;;  %v7515_v55 = vld [vmem:[%s10492_s3 + $0x6b0] sm:$0xf0]  ;;  %v7521_v56 = vld [vmem:[%s10492_s3 + $0x6a8] sm:$0xf]  ;;  %v7514_v38 = vor.u32 %v7999_v54, %v7513_v52 }
 0x74f   :  { %vm4736_vm10 = vcmp.gt.f32.partialorder %v4721_v53, 0.0  ;;  %v4744_v60 = vmul.f32 0.2, %v4721_v53  ;;  %v7522_v31 = vor.u32 %v8000_v57, %v7521_v56  ;;  %v8011_v56 = vld [vmem:[%s10491_s0 + $0xf0] sm:$0xff] }
 0x751   :  { %v4752_v6 = vsel %vm4736_vm10, %v4721_v53, %v4744_v60 }
 0x752   :  { %v10048_v26 = vpack.c.bf16 %v4752_v6, %v4752_v6 }
 0x754   :  { %7490 = vmatmul.msk.bf16.vlgmr.msra.gmra.mxu0 %vm204_vm2, %v10048_v26  ;;  %v4723_v28 = vpop.f32.mrf.mxu0 }
 0x755   :  { %v4724_v30 = vadd.f32 %v9988_v42, %v4723_v28  ;;  %5251 = vmatpush.bf16.msra.mxu0 %v7526_v12  ;;  %v7533_v28 = vld [vmem:[%s10492_s3 + $0x6c0] sm:$0xf] }
 0x757   :  { %v4745_v40 = vmul.f32 0.2, %v4724_v30  ;;  %vm4737_vm12 = vcmp.gt.f32.partialorder %v4724_v30, 0.0 }
 0x759   :  { %v4753_v32 = vsel %vm4737_vm12, %v4724_v30, %v4745_v40  ;;  %v8003_v30 = vld [vmem:[%s10492_s3 + $0x6cc] sm:$0xf0]  ;;  %vm6240_vm12 = vcmask 1024  }
 0x75a   :  { %v10080_v34 = vpack.c.bf16 %v4753_v32, %v4753_v32  ;;  %v7534_v21 = vor.u32 %v8003_v30, %v7533_v28  ;;  %v7555_v32 = vld [vmem:[%s10492_s3 + $0x6f0] sm:$0xf0] }
 0x75c   :  { %7449 = vmatmul.msk.bf16.vlgmr.msrb.gmra.mxu1 %vm204_vm2, %v4841_v58  ;;  %7450 = vmatmul.msk.bf16.vlgmr.msra.gmra.mxu2 %vm204_vm2, %v4841_v58  ;;  %v4725_v14 = vpop.f32.mrf.mxu0  ;;  %v7997_v58 = vld [vmem:[%s10492_s3 + $0x6a4] sm:$0xf] }
 0x75d   :  { %7467 = vmatmul.msk.bf16.vlgmr.msra.gmra.mxu3 %vm204_vm2, %v4925_v36  ;;  %5044 = vmatpush.bf16.msrb.mxu1 %v7474_v41  ;;  %v4726_v5 = vadd.f32 %v9988_v42, %v4725_v14  ;;  %v7518_v7 = vor.u32 %v7997_v58, %v7515_v55  ;;  %v7553_v41 = vld [vmem:[%s10492_s3 + $0x6e0] sm:$0xf]  ;;  %v7562_v14 = vor.u32 %v8008_v16, %v7561_v33 }
 0x75e   :  { %5057 = vmatpush.bf16.msra.mxu2 %v7478_v23  ;;  %5070 = vmatpush.bf16.msra.mxu3 %v7482_v29  ;;  %v8007_v23 = vld [vmem:[%s10492_s3 + $0x6ec] sm:$0xf0]  ;;  %v8005_v29 = vld [vmem:[%s10492_s3 + $0x6e4] sm:$0xf] }
 0x75f   :  { %v4746_v46 = vmul.f32 0.2, %v4726_v5  ;;  %vm4738_vm13 = vcmp.gt.f32.partialorder %v4726_v5, 0.0 }
 0x761   :  { %v4754_v19 = vsel %vm4738_vm13, %v4726_v5, %v4746_v46 }
 0x762   :  { %v5177_v61 = vpack.c.bf16 %v4754_v19, %v4754_v19 }
 0x764   :  { %7510 = vmatmul.msk.bf16.vlgmr.msrb.gmra.mxu0 %vm204_vm2, %v10080_v34  ;;  %v4728_v50 = vpop.f32.mrf.mxu0 }
 0x765   :  { %5335 = vmatpush.bf16.msrb.mxu0 %v7546_v8  ;;  %v4729_v51 = vadd.f32 %v9988_v42, %v4728_v50  ;;  %v7558_v8 = vor.u32 %v8005_v29, %v7555_v32 }
 0x767   :  { %v4747_v53 = vmul.f32 0.2, %v4729_v51  ;;  %vm4739_vm14 = vcmp.gt.f32.partialorder %v4729_v51, 0.0 }
 0x769   :  { %v4755_v60 = vsel %vm4739_vm14, %v4729_v51, %v4747_v53 }
 0x76a   :  { %v5261_v6 = vpack.c.bf16 %v4755_v60, %v4755_v60 }
 0x76c   :  { %7468 = vmatmul.msk.bf16.vlgmr.msra.gmra.mxu1 %vm204_vm2, %v4925_v36  ;;  %7469 = vmatmul.msk.bf16.vlgmr.msrb.gmra.mxu2 %vm204_vm2, %v4925_v36  ;;  %v4730_v12 = vpop.f32.mrf.mxu0 }
 0x76d   :  { %7470 = vmatmul.msk.bf16.vlgmr.msrb.gmra.mxu3 %vm204_vm2, %v4925_v36  ;;  %5128 = vmatpush.bf16.msra.mxu1 %v7494_v47  ;;  %v4731_v15 = vadd.f32 %v9988_v42, %v4730_v12 }
 0x76e   :  { %5141 = vmatpush.bf16.msrb.mxu2 %v7498_v43  ;;  %5154 = vmatpush.bf16.msrb.mxu3 %v7502_v4 }
 0x76f   :  { %v4748_v3 = vmul.f32 0.2, %v4731_v15  ;;  %vm4740_vm15 = vcmp.gt.f32.partialorder %v4731_v15, 0.0 }
 0x771   :  { %v4756_v36 = vsel %vm4740_vm15, %v4731_v15, %v4748_v3 }
 0x772   :  { %v5345_v40 = vpack.c.bf16 %v4756_v36, %v4756_v36 }
 0x774   :  { %7530 = vmatmul.msk.bf16.vlgmr.msra.gmra.mxu0 %vm204_vm2, %v5177_v61 }
 0x775   :  { %5419 = vmatpush.bf16.msra.mxu0 %v7566_v49 }
 0x77c   :  { %7487 = vmatmul.msk.bf16.vlgmr.msrb.gmra.mxu1 %vm204_vm2, %v10048_v26  ;;  %7488 = vmatmul.msk.bf16.vlgmr.msra.gmra.mxu2 %vm204_vm2, %v10048_v26 }
 0x77d   :  { %7489 = vmatmul.msk.bf16.vlgmr.msra.gmra.mxu3 %vm204_vm2, %v10048_v26  ;;  %5212 = vmatpush.bf16.msrb.mxu1 %v7514_v38  ;;  %v8001_v26 = vld [vmem:[%s10492_s3 + $0x6c4] sm:$0xf] }
 0x77e   :  { %5225 = vmatpush.bf16.msra.mxu2 %v7518_v7  ;;  %5238 = vmatpush.bf16.msra.mxu3 %v7522_v31  ;;  %v7538_v22 = vor.u32 %v8001_v26, %v7535_v35 }
 0x784   :  { %7550 = vmatmul.msk.bf16.vlgmr.msrb.gmra.mxu0 %vm204_vm2, %v5261_v6 }
 0x78c   :  { %7507 = vmatmul.msk.bf16.vlgmr.msra.gmra.mxu1 %vm204_vm2, %v10080_v34  ;;  %7508 = vmatmul.msk.bf16.vlgmr.msrb.gmra.mxu2 %vm204_vm2, %v10080_v34 }
 0x78d   :  { %7509 = vmatmul.msk.bf16.vlgmr.msrb.gmra.mxu3 %vm204_vm2, %v10080_v34  ;;  %5296 = vmatpush.bf16.msra.mxu1 %v7534_v21  ;;  %v7554_v34 = vor.u32 %v8007_v23, %v7553_v41 }
 0x78e   :  { %5309 = vmatpush.bf16.msrb.mxu2 %v7538_v22  ;;  %5322 = vmatpush.bf16.msrb.mxu3 %v7542_v27 }
 0x794   :  { %7570 = vmatmul.msk.bf16.vlgmr.msra.gmra.mxu0 %vm204_vm2, %v5345_v40 }
 0x79c   :  { %7527 = vmatmul.msk.bf16.vlgmr.msrb.gmra.mxu1 %vm204_vm2, %v5177_v61  ;;  %7528 = vmatmul.msk.bf16.vlgmr.msra.gmra.mxu2 %vm204_vm2, %v5177_v61 }
 0x79d   :  { %7529 = vmatmul.msk.bf16.vlgmr.msra.gmra.mxu3 %vm204_vm2, %v5177_v61  ;;  %5380 = vmatpush.bf16.msrb.mxu1 %v7554_v34 }
 0x79e   :  { %5393 = vmatpush.bf16.msra.mxu2 %v7558_v8  ;;  %5406 = vmatpush.bf16.msra.mxu3 %v7562_v14 }
 0x7ac   :  { %7547 = vmatmul.msk.bf16.vlgmr.msra.gmra.mxu1 %vm204_vm2, %v5261_v6  ;;  %7548 = vmatmul.msk.bf16.vlgmr.msrb.gmra.mxu2 %vm204_vm2, %v5261_v6 }
 0x7ad   :  { %7549 = vmatmul.msk.bf16.vlgmr.msrb.gmra.mxu3 %vm204_vm2, %v5261_v6  ;;  %5471 = vmatpush.bf16.msra.mxu1 %v9879_v37 }
 0x7b1   :  { %5472 = vmatpush.bf16.msra.mxu1 %v9885_v39 }
 0x7b5   :  { %5473 = vmatpush.bf16.msra.mxu1 %v9891_v20 }
 0x7b9   :  { %v4794_v5 = vpop.f32.mrf.mxu1  ;;  %5474 = vmatpush.bf16.msra.mxu1 %v9897_v9 }
 0x7ba   :  { %v4837_v59 = vadd.f32 %v4794_v5, %v9961_v17  ;;  %v8009_v17 = vld [vmem:[%s10491_s0 + $0xe0] sm:$0xff] }
 0x7bc   :  { %7567 = vmatmul.msk.bf16.vlgmr.msrb.gmra.mxu1 %vm204_vm2, %v5345_v40  ;;  %7568 = vmatmul.msk.bf16.vlgmr.msra.gmra.mxu2 %vm204_vm2, %v5345_v40 }
 0x7bd   :  { %7569 = vmatmul.msk.bf16.vlgmr.msra.gmra.mxu3 %vm204_vm2, %v5345_v40  ;;  %5475 = vmatpush.bf16.msra.mxu1 %v9908_v10 }
 0x7bf   :  { %v4807_v44 = vpop.f32.mrf.mxu2 }
 0x7c0   :  { %v4838_v37 = vadd.f32 %v4807_v44, %v9963_v18  ;;  %v4820_v45 = vpop.f32.mrf.mxu3 }
 0x7c1   :  { %v4839_v39 = vadd.f32 %v4820_v45, %v9977_v2  ;;  %v4796_v20 = vpop.f32.mrf.mxu1  ;;  %5476 = vmatpush.bf16.msra.mxu1 %v9915_v62  ;;  %v8010_v62 = vld [vmem:[%s10491_s0 + $0xe8] sm:$0xff] }
 0x7c7   :  { %v4809_v9 = vpop.f32.mrf.mxu2 }
 0x7c8   :  { %v4822_v1 = vpop.f32.mrf.mxu3 }
 0x7c9   :  { %v4833_v25 = vpop.f32.mrf.mxu1 }
 0x7ca   :  { %v4840_v11 = vadd.f32 %v4833_v25, %v9935_v24 }
 0x7cc   :  { %7587 = vmatmul.msk.bf16.vlgmr.msra.gmra.mxu1 %vm108_vm0, %v8009_v17 }
 0x7cf   :  { %v4878_v10 = vpop.f32.mrf.mxu2 }
 0x7d0   :  { %v4921_v46 = vadd.f32 %v4878_v10, %v4837_v59  ;;  %v4891_v18 = vpop.f32.mrf.mxu3 }
 0x7d1   :  { %v4922_v47 = vadd.f32 %v4891_v18, %v4838_v37  ;;  %v4835_v43 = vpop.f32.mrf.mxu1  ;;  %v5085_v2 = vpop.f32.mrf.mxu0 }
 0x7d7   :  { %v4880_v4 = vpop.f32.mrf.mxu2 }
 0x7d8   :  { %v4893_v19 = vpop.f32.mrf.mxu3  ;;  %v8015_v4 = vld [vmem:[%s10492_s3 + $0x70c] sm:$0xf0] }
 0x7d9   :  { %v4904_v13 = vpop.f32.mrf.mxu1  ;;  %v5087_v48 = vpop.f32.mrf.mxu0  ;;  %v8013_v19 = vld [vmem:[%s10492_s3 + $0x704] sm:$0xf] }
 0x7da   :  { %v4923_v61 = vadd.f32 %v4904_v13, %v4839_v39  ;;  %v7595_v13 = vld [vmem:[%s10492_s3 + $0x710] sm:$0xf0] }
 0x7db   :  { %v7598_v48 = vor.u32 %v8013_v19, %v7595_v13  ;;  %v7641_v19 = vld [vmem:[%s10492_s3 + $0x748] sm:$0xf]  ;;  %v8024_v13 = vld [vmem:[%s10492_s3 + $0x754] sm:$0xf0] }
 0x7dc   :  { %7588 = vmatmul.msk.bf16.gmra.mxu1 %vm108_vm0, %v8010_v62 }
 0x7dd   :  { %5570 = vmatpush.bf16.msrb.mxu3 %v7598_v48  ;;  %v8022_v48 = vld [vmem:[%s10492_s3 + $0x74c] sm:$0xf] }
 0x7df   :  { %v4917_v24 = vpop.f32.mrf.mxu2 }
 0x7e0   :  { %v4924_v49 = vadd.f32 %v4917_v24, %v4840_v11  ;;  %v4962_v50 = vpop.f32.mrf.mxu3 }
 0x7e1   :  { %v5005_v51 = vadd.f32 %v4962_v50, %v4921_v46  ;;  %v4906_v52 = vpop.f32.mrf.mxu1  ;;  %v5169_v54 = vpop.f32.mrf.mxu0 }
 0x7e2   :  { %v8016_v52 = vld [vmem:[%s10492_s3 + $0x714] sm:$0xf0] }
 0x7e7   :  { %v4919_v58 = vpop.f32.mrf.mxu2 }
 0x7e8   :  { %v4964_v55 = vpop.f32.mrf.mxu3 }
 0x7e9   :  { %v4975_v57 = vpop.f32.mrf.mxu1  ;;  %v5171_v53 = vpop.f32.mrf.mxu0 }
 0x7ea   :  { %v5006_v38 = vadd.f32 %v4975_v57, %v4922_v47 }
 0x7ec   :  { %7589 = vmatmul.msk.bf16.gmra.mxu1 %vm108_vm0, %v8011_v56 }
 0x7ef   :  { %v4988_v7 = vpop.f32.mrf.mxu2 }
 0x7f0   :  { %v5007_v31 = vadd.f32 %v4988_v7, %v4923_v61  ;;  %v5001_v60 = vpop.f32.mrf.mxu3  ;;  %v8014_v7 = vld [vmem:[%s10492_s3 + $0x70c] sm:$0xf] }
 0x7f1   :  { %v5008_v6 = vadd.f32 %v5001_v60, %v4924_v49  ;;  %v4977_v12 = vpop.f32.mrf.mxu1  ;;  %v5253_v15 = vpop.f32.mrf.mxu0  ;;  %v7613_v60 = vld [vmem:[%s10492_s3 + $0x720] sm:$0xf] }
 0x7f3   :  { %v5092_v28 = vadd.f32 %v5085_v2, %v5008_v6  ;;  %v7593_v2 = vld [vmem:[%s10492_s3 + $0x700] sm:$0xf] }
 0x7f4   :  { %v7594_v62 = vor.u32 %v8015_v4, %v7593_v2  ;;  %v8021_v2 = vld [vmem:[%s10492_s3 + $0x744] sm:$0xf]  ;;  %v7635_v4 = vld [vmem:[%s10492_s3 + $0x750] sm:$0xf0] }
 0x7f5   :  { %v5176_v30 = vadd.f32 %v5169_v54, %v5092_v28 }
 0x7f6   :  { %5557 = vmatpush.bf16.msrb.mxu2 %v7594_v62 }
 0x7f7   :  { %v5260_v26 = vadd.f32 %v5253_v15, %v5176_v30  ;;  %v4990_v35 = vpop.f32.mrf.mxu2  ;;  %v8019_v15 = vld [vmem:[%s10492_s3 + $0x72c] sm:$0xf0] }
 0x7f8   :  { %v5003_v0 = vpop.f32.mrf.mxu3  ;;  %v7614_v30 = vor.u32 %v8019_v15, %v7613_v60  ;;  %v8017_v35 = vld [vmem:[%s10492_s3 + $0x724] sm:$0xf]  ;;  %v7653_v15 = vld [vmem:[%s10492_s3 + $0x760] sm:$0xf] }
 0x7f9   :  { %v5046_v3 = vpop.f32.mrf.mxu1  ;;  %v5255_v21 = vpop.f32.mrf.mxu0  ;;  %v7615_v0 = vld [vmem:[%s10492_s3 + $0x730] sm:$0xf0] }
 0x7fa   :  { %v5089_v22 = vadd.f32 %v5046_v3, %v5005_v51  ;;  %v7601_v51 = vld [vmem:[%s10492_s3 + $0x708] sm:$0xf]  ;;  %5641 = vmatpush.bf16.msra.mxu3 %v7614_v30  ;;  %v8026_v21 = vld [vmem:[%s10492_s3 + $0x76c] sm:$0xf]  ;;  %v8025_v30 = vld [vmem:[%s10492_s3 + $0x764] sm:$0xf] }
 0x7fb   :  { %v7602_v54 = vor.u32 %v8016_v52, %v7601_v51 }
 0x7fc   :  { %7590 = vmatmul.msk.bf16.gmra.mxu1 %vm108_vm0, %v8012_v63  ;;  %v7618_v63 = vor.u32 %v8017_v35, %v7615_v0  ;;  %v7655_v35 = vld [vmem:[%s10492_s3 + $0x770] sm:$0xf0]  ;;  %v7661_v0 = vld [vmem:[%s10492_s3 + $0x768] sm:$0xf] }
 0x7fd   :  { %5583 = vmatpush.bf16.msrb.mxu0 %v7602_v54 }
 0x7ff   :  { %v5059_v27 = vpop.f32.mrf.mxu2 }
 0x800   :  { %v5090_v36 = vadd.f32 %v5059_v27, %v5006_v38  ;;  %v5072_v40 = vpop.f32.mrf.mxu3 }
 0x801   :  { %v5091_v41 = vadd.f32 %v5072_v40, %v5007_v31  ;;  %v5048_v23 = vpop.f32.mrf.mxu1  ;;  %v5337_v29 = vpop.f32.mrf.mxu0  ;;  %v7603_v31 = vld [vmem:[%s10492_s3 + $0x718] sm:$0xf0]  ;;  %5654 = vmatpush.bf16.msra.mxu0 %v7618_v63  ;;  %v8028_v63 = vld [vmem:[%s10492_s3 + $0x774] sm:$0xf0] }
 0x802   :  { %v5344_v32 = vadd.f32 %v5337_v29, %v5260_v26  ;;  %v7606_v12 = vor.u32 %v8014_v7, %v7603_v31 }
 0x804   :  { %5596 = vmatpush.bf16.msra.mxu2 %v7606_v12 }
 0x807   :  { %v5061_v33 = vpop.f32.mrf.mxu2 }
 0x808   :  { %v5074_v16 = vpop.f32.mrf.mxu3 }
 0x809   :  { %v5130_v34 = vpop.f32.mrf.mxu1  ;;  %v5339_v8 = vpop.f32.mrf.mxu0 }
 0x80a   :  { %v5173_v14 = vadd.f32 %v5130_v34, %v5089_v22  ;;  %v7663_v22 = vld [vmem:[%s10492_s3 + $0x778] sm:$0xf0]  ;;  %v7621_v34 = vld [vmem:[%s10492_s3 + $0x728] sm:$0xf]  ;;  %v8020_v8 = vld [vmem:[%s10492_s3 + $0x734] sm:$0xf0] }
 0x80b   :  { %v7666_v40 = vor.u32 %v8026_v21, %v7663_v22 }
 0x80d   :  { %5848 = vmatpush.bf16.msrb.mxu1 %v7666_v40  ;;  %v7662_v40 = vor.u32 %v8028_v63, %v7661_v0  ;;  %v7735_v0 = vld [vmem:[%s10492_s3 + $0x7f0] sm:$0xf0]  ;;  %v7741_v63 = vld [vmem:[%s10492_s3 + $0x7e8] sm:$0xf] }
 0x80f   :  { %v5143_v5 = vpop.f32.mrf.mxu2 }
 0x810   :  { %v5174_v59 = vadd.f32 %v5143_v5, %v5090_v36  ;;  %v5156_v44 = vpop.f32.mrf.mxu3  ;;  %v7623_v5 = vld [vmem:[%s10492_s3 + $0x738] sm:$0xf0] }
 0x811   :  { %v5175_v37 = vadd.f32 %v5156_v44, %v5091_v41  ;;  %v5132_v45 = vpop.f32.mrf.mxu1  ;;  %v5421_v39 = vpop.f32.mrf.mxu0 }
 0x812   :  { %v10218_v20 = vadd.f32 %v5421_v39, %v5344_v32  ;;  %v7622_v39 = vor.u32 %v8020_v8, %v7621_v34 }
 0x817   :  { %v5145_v9 = vpop.f32.mrf.mxu2 }
 0x818   :  { %v5158_v1 = vpop.f32.mrf.mxu3 }
 0x819   :  { %v5214_v17 = vpop.f32.mrf.mxu1  ;;  %v5423_v25 = vpop.f32.mrf.mxu0 }
 0x81a   :  { %v5257_v11 = vadd.f32 %v5214_v17, %v5173_v14  ;;  %v8018_v14 = vld [vmem:[%s10492_s3 + $0x72c] sm:$0xf] }
 0x81b   :  { %v7626_v1 = vor.u32 %v8018_v14, %v7623_v5  ;;  %v7673_v14 = vld [vmem:[%s10492_s3 + $0x780] sm:$0xf]  ;;  %v8031_v5 = vld [vmem:[%s10492_s3 + $0x78c] sm:$0xf0] }
 0x81f   :  { %v5227_v10 = vpop.f32.mrf.mxu2 }
 0x820   :  { %v5258_v46 = vadd.f32 %v5227_v10, %v5174_v59  ;;  %v5240_v18 = vpop.f32.mrf.mxu3  ;;  %v7633_v59 = vld [vmem:[%s10492_s3 + $0x740] sm:$0xf]  ;;  %v7683_v10 = vld [vmem:[%s10492_s3 + $0x798] sm:$0xf0] }
 0x821   :  { %v5259_v47 = vadd.f32 %v5240_v18, %v5175_v37  ;;  %v5216_v43 = vpop.f32.mrf.mxu1  ;;  %v8023_v37 = vld [vmem:[%s10492_s3 + $0x74c] sm:$0xf0] }
 0x822   :  { %v7634_v17 = vor.u32 %v8023_v37, %v7633_v59  ;;  %v8029_v59 = vld [vmem:[%s10492_s3 + $0x784] sm:$0xf]  ;;  %v7681_v37 = vld [vmem:[%s10492_s3 + $0x788] sm:$0xf] }
 0x827   :  { %v5229_v61 = vpop.f32.mrf.mxu2 }
 0x828   :  { %v5242_v24 = vpop.f32.mrf.mxu3  ;;  %v7643_v61 = vld [vmem:[%s10492_s3 + $0x758] sm:$0xf0] }
 0x829   :  { %v5298_v49 = vpop.f32.mrf.mxu1  ;;  %v7638_v24 = vor.u32 %v8021_v2, %v7635_v4  ;;  %v7646_v51 = vor.u32 %v8022_v48, %v7643_v61  ;;  %v7693_v2 = vld [vmem:[%s10492_s3 + $0x7a0] sm:$0xf]  ;;  %v8035_v4 = vld [vmem:[%s10492_s3 + $0x7ac] sm:$0xf0]  ;;  %v8036_v48 = vld [vmem:[%s10492_s3 + $0x7b4] sm:$0xf0] }
 0x82a   :  { %v5341_v50 = vadd.f32 %v5298_v49, %v5257_v11  ;;  %v8030_v11 = vld [vmem:[%s10492_s3 + $0x78c] sm:$0xf] }
 0x82b   :  { %v7686_v18 = vor.u32 %v8030_v11, %v7683_v10  ;;  %v8042_v11 = vld [vmem:[%s10492_s3 + $0x7ec] sm:$0xf]  ;;  %v7743_v10 = vld [vmem:[%s10492_s3 + $0x7f8] sm:$0xf0] }
 0x82d   :  { %5932 = vmatpush.bf16.msra.mxu1 %v7686_v18  ;;  %v7746_v18 = vor.u32 %v8042_v11, %v7743_v10 }
 0x82f   :  { %v5311_v58 = vpop.f32.mrf.mxu2 }
 0x830   :  { %v5342_v55 = vadd.f32 %v5311_v58, %v5258_v46  ;;  %v5324_v56 = vpop.f32.mrf.mxu3 }
 0x831   :  { %v5343_v57 = vadd.f32 %v5324_v56, %v5259_v47  ;;  %v5300_v53 = vpop.f32.mrf.mxu1  ;;  %v7703_v56 = vld [vmem:[%s10492_s3 + $0x7b8] sm:$0xf0] }
 0x837   :  { %v5313_v38 = vpop.f32.mrf.mxu2 }
 0x838   :  { %v5326_v6 = vpop.f32.mrf.mxu3 }
 0x839   :  { %v5382_v28 = vpop.f32.mrf.mxu1 }
 0x83a   :  { %v10250_v26 = vadd.f32 %v5382_v28, %v5341_v50  ;;  %v7642_v50 = vor.u32 %v8024_v13, %v7641_v19  ;;  %v8027_v28 = vld [vmem:[%s10492_s3 + $0x76c] sm:$0xf0]  ;;  %v8033_v19 = vld [vmem:[%s10492_s3 + $0x7a4] sm:$0xf]  ;;  %v7701_v13 = vld [vmem:[%s10492_s3 + $0x7a8] sm:$0xf] }
 0x83b   :  { %v7654_v22 = vor.u32 %v8027_v28, %v7653_v15  ;;  %v7733_v28 = vld [vmem:[%s10492_s3 + $0x7e0] sm:$0xf] }
 0x83f   :  { %v5395_v3 = vpop.f32.mrf.mxu2 }
 0x840   :  { %v10264_v27 = vadd.f32 %v5395_v3, %v5342_v55  ;;  %v5408_v36 = vpop.f32.mrf.mxu3  ;;  %v8034_v55 = vld [vmem:[%s10492_s3 + $0x7ac] sm:$0xf] }
 0x841   :  { %v10266_v41 = vadd.f32 %v5408_v36, %v5343_v57  ;;  %v5384_v23 = vpop.f32.mrf.mxu1  ;;  %v7706_v38 = vor.u32 %v8034_v55, %v7703_v56  ;;  %v7658_v36 = vor.u32 %v8025_v30, %v7655_v35  ;;  %v7713_v55 = vld [vmem:[%s10492_s3 + $0x7c0] sm:$0xf]  ;;  %v8039_v56 = vld [vmem:[%s10492_s3 + $0x7cc] sm:$0xf0]  ;;  %v8041_v35 = vld [vmem:[%s10492_s3 + $0x7e4] sm:$0xf] }
 0x842   :  { %v8043_v30 = vld [vmem:[%s10492_s3 + $0x7ec] sm:$0xf0] }
 0x847   :  { %v5397_v29 = vpop.f32.mrf.mxu2 }
 0x848   :  { %v5410_v32 = vpop.f32.mrf.mxu3  ;;  %v8038_v29 = vld [vmem:[%s10492_s3 + $0x7cc] sm:$0xf] }
 0x849   :  { %v5478_v33 = vpop.f32.mrf.mxu1  ;;  %v7723_v32 = vld [vmem:[%s10492_s3 + $0x7d8] sm:$0xf0] }
 0x84a   :  { %v5479_v16 = vadd.f32 %v9988_v42, %v5478_v33 }
 0x84c   :  { %vm5498_vm0 = vcmp.gt.f32.partialorder %v5479_v16, 0.0  ;;  %v5506_v44 = vmul.f32 0.2, %v5479_v16 }
 0x84e   :  { %v5514_v45 = vsel %vm5498_vm0, %v5479_v16, %v5506_v44  ;;  %v7726_v16 = vor.u32 %v8038_v29, %v7723_v32  ;;  %v7675_v44 = vld [vmem:[%s10492_s3 + $0x790] sm:$0xf0] }
 0x84f   :  { %v5522_v9 = vpack.c.bf16 %v5514_v45, %v5514_v45  ;;  %v8032_v45 = vld [vmem:[%s10492_s3 + $0x794] sm:$0xf0] }
 0x851   :  { %v5480_v25 = vpop.f32.mrf.mxu1  ;;  %7607 = vmatmul.msk.bf16.vlgmr.msrb.gmra.mxu2 %vm204_vm2, %v5522_v9  ;;  %7608 = vmatmul.msk.bf16.vlgmr.msrb.gmra.mxu3 %vm204_vm2, %v5522_v9 }
 0x852   :  { %7609 = vmatmul.msk.bf16.vlgmr.msrb.gmra.mxu0 %vm204_vm2, %v5522_v9  ;;  %5667 = vmatpush.bf16.msrb.mxu2 %v7622_v39  ;;  %v5481_v46 = vadd.f32 %v9988_v42, %v5480_v25 }
 0x853   :  { %5680 = vmatpush.bf16.msrb.mxu3 %v7626_v1  ;;  %5725 = vmatpush.bf16.msrb.mxu0 %v7634_v17  ;;  %v7678_v1 = vor.u32 %v8029_v59, %v7675_v44  ;;  %v7682_v17 = vor.u32 %v8032_v45, %v7681_v37 }
 0x854   :  { %v5507_v47 = vmul.f32 0.2, %v5481_v46  ;;  %vm5499_vm1 = vcmp.gt.f32.partialorder %v5481_v46, 0.0 }
 0x856   :  { %v5515_v62 = vsel %vm5499_vm1, %v5481_v46, %v5507_v47 }
 0x857   :  { %v5606_v49 = vpack.c.bf16 %v5515_v62, %v5515_v62  ;;  %v7695_v62 = vld [vmem:[%s10492_s3 + $0x7b0] sm:$0xf0] }
 0x859   :  { %v5483_v43 = vpop.f32.mrf.mxu1 }
 0x85a   :  { %v5484_v58 = vadd.f32 %v9988_v42, %v5483_v43 }
 0x85c   :  { %v5508_v7 = vmul.f32 0.2, %v5484_v58  ;;  %vm5500_vm4 = vcmp.gt.f32.partialorder %v5484_v58, 0.0 }
 0x85e   :  { %v5516_v12 = vsel %vm5500_vm4, %v5484_v58, %v5508_v7 }
 0x85f   :  { %v5690_v3 = vpack.c.bf16 %v5516_v12, %v5516_v12 }
 0x861   :  { %v5485_v52 = vpop.f32.mrf.mxu1  ;;  %7610 = vmatmul.msk.bf16.vlgmr.msra.gmra.mxu2 %vm204_vm2, %v5522_v9  ;;  %7627 = vmatmul.msk.bf16.vlgmr.msra.gmra.mxu3 %vm204_vm2, %v5606_v49  ;;  %v7674_v9 = vor.u32 %v8031_v5, %v7673_v14 }
 0x862   :  { %v5486_v54 = vadd.f32 %v9988_v42, %v5485_v52  ;;  %7628 = vmatmul.msk.bf16.vlgmr.msra.gmra.mxu0 %vm204_vm2, %v5606_v49  ;;  %5738 = vmatpush.bf16.msra.mxu2 %v7638_v24  ;;  %v7694_v24 = vor.u32 %v8035_v4, %v7693_v2 }
 0x863   :  { %5751 = vmatpush.bf16.msra.mxu3 %v7642_v50  ;;  %5764 = vmatpush.bf16.msra.mxu0 %v7646_v51  ;;  %v7702_v50 = vor.u32 %v8036_v48, %v7701_v13 }
 0x864   :  { %vm5501_vm3 = vcmp.gt.f32.partialorder %v5486_v54, 0.0  ;;  %v5509_v57 = vmul.f32 0.2, %v5486_v54 }
 0x866   :  { %v5517_v53 = vsel %vm5501_vm3, %v5486_v54, %v5509_v57  ;;  %v8037_v57 = vld [vmem:[%s10492_s3 + $0x7c4] sm:$0xf] }
 0x867   :  { %v10326_v31 = vpack.c.bf16 %v5517_v53, %v5517_v53  ;;  %v7715_v53 = vld [vmem:[%s10492_s3 + $0x7d0] sm:$0xf0] }
 0x869   :  { %7670 = vmatmul.msk.bf16.vlgmr.msrb.gmra.mxu1 %vm204_vm2, %v10326_v31  ;;  %v5488_v60 = vpop.f32.mrf.mxu1 }
 0x86a   :  { %v5489_v6 = vadd.f32 %v9988_v42, %v5488_v60  ;;  %6016 = vmatpush.bf16.msrb.mxu1 %v7706_v38  ;;  %v8040_v38 = vld [vmem:[%s10492_s3 + $0x7d4] sm:$0xf0]  ;;  %v7718_v60 = vor.u32 %v8037_v57, %v7715_v53 }
 0x86c   :  { %v5510_v21 = vmul.f32 0.2, %v5489_v6  ;;  %vm5502_vm5 = vcmp.gt.f32.partialorder %v5489_v6, 0.0 }
 0x86e   :  { %v5518_v23 = vsel %vm5502_vm5, %v5489_v6, %v5510_v21  ;;  %v7734_v21 = vor.u32 %v8043_v30, %v7733_v28 }
 0x86f   :  { %v10358_v33 = vpack.c.bf16 %v5518_v23, %v5518_v23 }
 0x871   :  { %7629 = vmatmul.msk.bf16.vlgmr.msrb.gmra.mxu2 %vm204_vm2, %v5606_v49  ;;  %7630 = vmatmul.msk.bf16.vlgmr.msrb.gmra.mxu3 %vm204_vm2, %v5606_v49  ;;  %v5490_v34 = vpop.f32.mrf.mxu1  ;;  %v7698_v49 = vor.u32 %v8033_v19, %v7695_v62 }
 0x872   :  { %7647 = vmatmul.msk.bf16.vlgmr.msrb.gmra.mxu0 %vm204_vm2, %v5690_v3  ;;  %5809 = vmatpush.bf16.msrb.mxu2 %v7654_v22  ;;  %v5491_v8 = vadd.f32 %v9988_v42, %v5490_v34  ;;  %v7738_v22 = vor.u32 %v8041_v35, %v7735_v0 }
 0x873   :  { %5822 = vmatpush.bf16.msrb.mxu3 %v7658_v36  ;;  %5835 = vmatpush.bf16.msrb.mxu0 %v7662_v40 }
 0x874   :  { %v5511_v39 = vmul.f32 0.2, %v5491_v8  ;;  %vm5503_vm6 = vcmp.gt.f32.partialorder %v5491_v8, 0.0 }
 0x876   :  { %v5519_v25 = vsel %vm5503_vm6, %v5491_v8, %v5511_v39 }
 0x877   :  { %v5942_v46 = vpack.c.bf16 %v5519_v25, %v5519_v25 }
 0x879   :  { %7690 = vmatmul.msk.bf16.vlgmr.msra.gmra.mxu1 %vm204_vm2, %v10358_v33  ;;  %v5493_v47 = vpop.f32.mrf.mxu1 }
 0x87a   :  { %6100 = vmatpush.bf16.msra.mxu1 %v7726_v16  ;;  %v5494_v43 = vadd.f32 %v9988_v42, %v5493_v47 }
 0x87c   :  { %v5512_v61 = vmul.f32 0.2, %v5494_v43  ;;  %vm5504_vm7 = vcmp.gt.f32.partialorder %v5494_v43, 0.0 }
 0x87e   :  { %v5520_v51 = vsel %vm5504_vm7, %v5494_v43, %v5512_v61 }
 0x87f   :  { %v6026_v52 = vpack.c.bf16 %v5520_v51, %v5520_v51 }
 0x881   :  { %7648 = vmatmul.msk.bf16.vlgmr.msra.gmra.mxu2 %vm204_vm2, %v5690_v3  ;;  %7649 = vmatmul.msk.bf16.vlgmr.msra.gmra.mxu3 %vm204_vm2, %v5690_v3  ;;  %v5495_v54 = vpop.f32.mrf.mxu1 }
 0x882   :  { %7650 = vmatmul.msk.bf16.vlgmr.msra.gmra.mxu0 %vm204_vm2, %v5690_v3  ;;  %5893 = vmatpush.bf16.msra.mxu2 %v7674_v9  ;;  %v5496_v58 = vadd.f32 %v9988_v42, %v5495_v54  ;;  %v7721_v42 = vld [vmem:[%s10492_s3 + $0x7c8] sm:$0xf]  ;;  %v8044_v3 = vld [vmem:[%s10492_s3 + $0x7f4] sm:$0xf0] }
 0x883   :  { %5906 = vmatpush.bf16.msra.mxu3 %v7678_v1  ;;  %5919 = vmatpush.bf16.msra.mxu0 %v7682_v17  ;;  %v7722_v6 = vor.u32 %v8040_v38, %v7721_v42  ;;  %v7742_v36 = vor.u32 %v8044_v3, %v7741_v63 }
 0x884   :  { %v5513_v7 = vmul.f32 0.2, %v5496_v58  ;;  %vm5505_vm8 = vcmp.gt.f32.partialorder %v5496_v58, 0.0 }
 0x886   :  { %v5521_v12 = vsel %vm5505_vm8, %v5496_v58, %v5513_v7 }
 0x887   :  { %v6110_v15 = vpack.c.bf16 %v5521_v12, %v5521_v12 }
 0x889   :  { %7710 = vmatmul.msk.bf16.vlgmr.msrb.gmra.mxu1 %vm204_vm2, %v5942_v46 }
 0x88a   :  { %6184 = vmatpush.bf16.msrb.mxu1 %v7746_v18 }
 0x891   :  { %7667 = vmatmul.msk.bf16.vlgmr.msrb.gmra.mxu2 %vm204_vm2, %v10326_v31  ;;  %7668 = vmatmul.msk.bf16.vlgmr.msrb.gmra.mxu3 %vm204_vm2, %v10326_v31 }
 0x892   :  { %7669 = vmatmul.msk.bf16.vlgmr.msrb.gmra.mxu0 %vm204_vm2, %v10326_v31  ;;  %5977 = vmatpush.bf16.msrb.mxu2 %v7694_v24  ;;  %v7714_v31 = vor.u32 %v8039_v56, %v7713_v55 }
 0x893   :  { %5990 = vmatpush.bf16.msrb.mxu3 %v7698_v49  ;;  %6003 = vmatpush.bf16.msrb.mxu0 %v7702_v50 }
 0x899   :  { %7730 = vmatmul.msk.bf16.vlgmr.msra.gmra.mxu1 %vm204_vm2, %v6026_v52 }
 0x8a1   :  { %7687 = vmatmul.msk.bf16.vlgmr.msra.gmra.mxu2 %vm204_vm2, %v10358_v33  ;;  %7688 = vmatmul.msk.bf16.vlgmr.msra.gmra.mxu3 %vm204_vm2, %v10358_v33 }
 0x8a2   :  { %7689 = vmatmul.msk.bf16.vlgmr.msra.gmra.mxu0 %vm204_vm2, %v10358_v33  ;;  %6061 = vmatpush.bf16.msra.mxu2 %v7714_v31 }
 0x8a3   :  { %6074 = vmatpush.bf16.msra.mxu3 %v7718_v60  ;;  %6087 = vmatpush.bf16.msra.mxu0 %v7722_v6 }
 0x8a9   :  { %7750 = vmatmul.msk.bf16.vlgmr.msrb.gmra.mxu1 %vm204_vm2, %v6110_v15 }
 0x8b1   :  { %7707 = vmatmul.msk.bf16.vlgmr.msrb.gmra.mxu2 %vm204_vm2, %v5942_v46  ;;  %7708 = vmatmul.msk.bf16.vlgmr.msrb.gmra.mxu3 %vm204_vm2, %v5942_v46 }
 0x8b2   :  { %7709 = vmatmul.msk.bf16.vlgmr.msrb.gmra.mxu0 %vm204_vm2, %v5942_v46  ;;  %6145 = vmatpush.bf16.msrb.mxu2 %v7734_v21 }
 0x8b3   :  { %6158 = vmatpush.bf16.msrb.mxu3 %v7738_v22  ;;  %6171 = vmatpush.bf16.msrb.mxu0 %v7742_v36 }
 0x8c1   :  { %7727 = vmatmul.msk.bf16.vlgmr.msra.gmra.mxu2 %vm204_vm2, %v6026_v52  ;;  %7728 = vmatmul.msk.bf16.vlgmr.msra.gmra.mxu3 %vm204_vm2, %v6026_v52 }
 0x8c2   :  { %7729 = vmatmul.msk.bf16.vlgmr.msra.gmra.mxu0 %vm204_vm2, %v6026_v52 }
 0x8cf   :  { %v5585_v40 = vpop.f32.mrf.mxu0 }
 0x8d0   :  { %v5604_v23 = vadd.f32 %v5585_v40, %v10266_v41 }
 0x8d1   :  { %7747 = vmatmul.msk.bf16.vlgmr.msrb.gmra.mxu2 %vm204_vm2, %v6110_v15  ;;  %7748 = vmatmul.msk.bf16.vlgmr.msrb.gmra.mxu3 %vm204_vm2, %v6110_v15 }
 0x8d2   :  { %7749 = vmatmul.msk.bf16.vlgmr.msrb.gmra.mxu0 %vm204_vm2, %v6110_v15 }
 0x8d4   :  { %v5559_v29 = vpop.f32.mrf.mxu2  ;;  %v5572_v32 = vpop.f32.mrf.mxu3 }
 0x8d5   :  { %v5602_v33 = vadd.f32 %v5559_v29, %v10250_v26  ;;  %v5603_v16 = vadd.f32 %v5572_v32, %v10264_v27 }
 0x8d7   :  { %v5587_v34 = vpop.f32.mrf.mxu0 }
 0x8dc   :  { %v5561_v8 = vpop.f32.mrf.mxu2  ;;  %v5574_v14 = vpop.f32.mrf.mxu3 }
 0x8df   :  { %v5656_v5 = vpop.f32.mrf.mxu0 }
 0x8e0   :  { %v5687_v59 = vadd.f32 %v5656_v5, %v5603_v16 }
 0x8e4   :  { %v5598_v44 = vpop.f32.mrf.mxu2  ;;  %v5643_v37 = vpop.f32.mrf.mxu3 }
 0x8e5   :  { %v5605_v41 = vadd.f32 %v5598_v44, %v10218_v20  ;;  %v5686_v45 = vadd.f32 %v5643_v37, %v5602_v33 }
 0x8e6   :  { %v5850_v39 = vpop.f32.mrf.mxu1 }
 0x8e7   :  { %v5658_v9 = vpop.f32.mrf.mxu0 }
 0x8ec   :  { %v5600_v1 = vpop.f32.mrf.mxu2  ;;  %v5645_v17 = vpop.f32.mrf.mxu3 }
 0x8ee   :  { %v5852_v25 = vpop.f32.mrf.mxu1 }
 0x8ef   :  { %v5727_v11 = vpop.f32.mrf.mxu0 }
 0x8f0   :  { %v5770_v10 = vadd.f32 %v5727_v11, %v5686_v45 }
 0x8f4   :  { %v5669_v26 = vpop.f32.mrf.mxu2  ;;  %v5682_v46 = vpop.f32.mrf.mxu3 }
 0x8f5   :  { %v5688_v27 = vadd.f32 %v5669_v26, %v5604_v23  ;;  %v5689_v18 = vadd.f32 %v5682_v46, %v5605_v41 }
 0x8f6   :  { %v5934_v47 = vpop.f32.mrf.mxu1 }
 0x8f7   :  { %v5729_v43 = vpop.f32.mrf.mxu0 }
 0x8fc   :  { %v5671_v2 = vpop.f32.mrf.mxu2  ;;  %v5684_v4 = vpop.f32.mrf.mxu3 }
 0x8fe   :  { %v5936_v19 = vpop.f32.mrf.mxu1 }
 0x8ff   :  { %v5766_v62 = vpop.f32.mrf.mxu0 }
 0x900   :  { %v5773_v13 = vadd.f32 %v5766_v62, %v5689_v18 }
 0x902   :  { %v5857_v20 = vadd.f32 %v5850_v39, %v5773_v13  ;;  %v6194_v39 = vld [vmem:[%s10493_s4] sm:$0xf] }
 0x903   :  { %v6198_v11 = vperm.slane %v6194_v39, 2  ;;  %v6199_v46 = vperm.slane %v6194_v39, 3  ;;  %v6196_v43 = vperm.slane %v6194_v39, 0 }
 0x904   :  { %v5740_v48 = vpop.f32.mrf.mxu2  ;;  %v5753_v61 = vpop.f32.mrf.mxu3  ;;  %v5941_v24 = vadd.f32 %v5934_v47, %v5857_v20 }
 0x905   :  { %v5771_v49 = vadd.f32 %v5740_v48, %v5687_v59  ;;  %v5772_v50 = vadd.f32 %v5753_v61, %v5688_v27 }
 0x906   :  { %v6018_v51 = vpop.f32.mrf.mxu1 }
 0x907   :  { %v5768_v52 = vpop.f32.mrf.mxu0  ;;  %v6025_v54 = vadd.f32 %v6018_v51, %v5941_v24 }
 0x908   :  { %v6220_v52 = vld [vmem:[%s10494_s5] sm:$0xf] }
 0x90c   :  { %v5742_v58 = vpop.f32.mrf.mxu2  ;;  %v5755_v55 = vpop.f32.mrf.mxu3 }
 0x90d   :  { %v6222_v58 = vperm.slane %v6220_v52, 0  ;;  %v6223_v55 = vperm.slane %v6220_v52, 1 }
 0x90e   :  { %v6020_v56 = vpop.f32.mrf.mxu1 }
 0x90f   :  { %v5837_v57 = vpop.f32.mrf.mxu0 }
 0x910   :  { %v5856_v14 = vadd.f32 %v5837_v57, %v5772_v50 }
 0x914   :  { %v5811_v53 = vpop.f32.mrf.mxu2  ;;  %v5824_v42 = vpop.f32.mrf.mxu3 }
 0x915   :  { %v5854_v41 = vadd.f32 %v5811_v53, %v5770_v10  ;;  %v5855_v45 = vadd.f32 %v5824_v42, %v5771_v49  ;;  %v6197_v10 = vperm.slane %v6194_v39, 1  ;;  %v6224_v53 = vperm.slane %v6220_v52, 2 }
 0x916   :  { %v6102_v38 = vpop.f32.mrf.mxu1  ;;  %v6274_v39 = vlaneseq }
 0x917   :  { %v5839_v7 = vpop.f32.mrf.mxu0  ;;  %v6109_v31 = vadd.f32 %v6102_v38, %v6025_v54 }
 0x91c   :  { %v5813_v60 = vpop.f32.mrf.mxu2  ;;  %v5826_v6 = vpop.f32.mrf.mxu3 }
 0x91d   :  { %v6225_v6 = vperm.slane %v6220_v52, 3 }
 0x91e   :  { %v6104_v12 = vpop.f32.mrf.mxu1 }
 0x91f   :  { %v5921_v15 = vpop.f32.mrf.mxu0 }
 0x920   :  { %v5940_v5 = vadd.f32 %v5921_v15, %v5856_v14 }
 0x924   :  { %v5895_v28 = vpop.f32.mrf.mxu2  ;;  %v5908_v30 = vpop.f32.mrf.mxu3 }
 0x925   :  { %v5938_v1 = vadd.f32 %v5895_v28, %v5854_v41  ;;  %v5939_v17 = vadd.f32 %v5908_v30, %v5855_v45 }
 0x926   :  { %v6186_v35 = vpop.f32.mrf.mxu1 }
 0x927   :  { %v5923_v0 = vpop.f32.mrf.mxu0  ;;  %v6193_v26 = vadd.f32 %v6186_v35, %v6109_v31 }
 0x929   :  { %v6207_v62 = vadd.f32 %v6199_v46, %v6193_v26 }
 0x92b   :  { %v6215_v54 = vmul.f32 0.2, %v6207_v62  ;;  %vm6211_vm11 = vcmp.gt.f32.partialorder %v6207_v62, 0.0 }
 0x92c   :  { %v5897_v63 = vpop.f32.mrf.mxu2  ;;  %v5910_v3 = vpop.f32.mrf.mxu3 }
 0x92d   :  { %v6219_v28 = vsel %vm6211_vm11, %v6207_v62, %v6215_v54 }
 0x92e   :  { %v6188_v21 = vpop.f32.mrf.mxu1  ;;  %v6233_v0 = vmul.f32 %v6225_v6, %v6219_v28 }
 0x92f   :  { %v6005_v22 = vpop.f32.mrf.mxu0 }
 0x930   :  { %v6024_v59 = vadd.f32 %v6005_v22, %v5940_v5 }
 0x934   :  { %v5979_v36 = vpop.f32.mrf.mxu2  ;;  %v5992_v40 = vpop.f32.mrf.mxu3 }
 0x935   :  { %v6022_v18 = vadd.f32 %v5979_v36, %v5938_v1  ;;  %v6023_v47 = vadd.f32 %v5992_v40, %v5939_v17 }
 0x937   :  { %v6007_v23 = vpop.f32.mrf.mxu0 }
 0x93c   :  { %v5981_v29 = vpop.f32.mrf.mxu2  ;;  %v5994_v32 = vpop.f32.mrf.mxu3 }
 0x93f   :  { %v6089_v33 = vpop.f32.mrf.mxu0 }
 0x940   :  { %v6108_v9 = vadd.f32 %v6089_v33, %v6024_v59 }
 0x944   :  { %v6063_v16 = vpop.f32.mrf.mxu2  ;;  %v6076_v34 = vpop.f32.mrf.mxu3 }
 0x945   :  { %v6106_v2 = vadd.f32 %v6063_v16, %v6022_v18  ;;  %v6107_v4 = vadd.f32 %v6076_v34, %v6023_v47 }
 0x947   :  { %v6091_v8 = vpop.f32.mrf.mxu0 }
 0x94c   :  { %v6065_v44 = vpop.f32.mrf.mxu2  ;;  %v6078_v37 = vpop.f32.mrf.mxu3 }
 0x94f   :  { %v6173_v25 = vpop.f32.mrf.mxu0 }
 0x950   :  { %v6192_v27 = vadd.f32 %v6173_v25, %v6108_v9  ;;  %v6275_v9 = vand.u32 127, %v6274_v39 }
 0x952   :  { %v6206_v19 = vadd.f32 %v6198_v11, %v6192_v27  ;;  %vm6277_vm13 = vcmp.eq.s32.totalorder %v6275_v9, 1  ;;  %vm6276_vm14 = vcmp.eq.s32.totalorder %v6275_v9, 0 }
 0x954   :  { %v6147_v13 = vpop.f32.mrf.mxu2  ;;  %v6160_v20 = vpop.f32.mrf.mxu3  ;;  %v6214_v24 = vmul.f32 0.2, %v6206_v19  ;;  %vm6210_vm2 = vcmp.gt.f32.partialorder %v6206_v19, 0.0 }
 0x955   :  { %v6190_v48 = vadd.f32 %v6147_v13, %v6106_v2  ;;  %v6191_v61 = vadd.f32 %v6160_v20, %v6107_v4 }
 0x956   :  { %v6218_v7 = vsel %vm6210_vm2, %v6206_v19, %v6214_v24 }
 0x957   :  { %v6204_v49 = vadd.f32 %v6196_v43, %v6190_v48  ;;  %v6205_v50 = vadd.f32 %v6197_v10, %v6191_v61  ;;  %v6175_v51 = vpop.f32.mrf.mxu0  ;;  %v6232_v30 = vmul.f32 %v6224_v53, %v6218_v7 }
 0x959   :  { %vm6208_vm9 = vcmp.gt.f32.partialorder %v6204_v49, 0.0  ;;  %v6212_v56 = vmul.f32 0.2, %v6204_v49  ;;  %vm6209_vm10 = vcmp.gt.f32.partialorder %v6205_v50, 0.0  ;;  %v6213_v57 = vmul.f32 0.2, %v6205_v50 }
 0x95b   :  { %v6216_v42 = vsel %vm6208_vm9, %v6204_v49, %v6212_v56  ;;  %v6217_v38 = vsel %vm6209_vm10, %v6205_v50, %v6213_v57 }
 0x95c   :  { %v6149_v31 = vpop.f32.mrf.mxu2  ;;  %v6162_v60 = vpop.f32.mrf.mxu3  ;;  %v6230_v12 = vmul.f32 %v6222_v58, %v6216_v42  ;;  %v6231_v15 = vmul.f32 %v6223_v55, %v6217_v38 }
 0x95e   :  { %v6234_v35 = vadd.f32 %v6231_v15, %v6230_v12 }
 0x960   :  { %v6235_v63 = vadd.f32 %v6234_v35, %v6232_v30 }
 0x962   :  { %v6236_v3 = vadd.f32 %v6235_v63, %v6233_v0 }
 0x964   :  { %6237 = vadd.xlane.f32.xlu0 %v6236_v3 }
 0x9d7   :  { %v6238_v21 = vpop.xlane.xlu0 %6237 }
 0x9d8   :  { %v6241_v22 = vsel %vm6240_vm12, %v6238_v21, 0.0  ;;  %v6254_v36 = vrot.slane %v6238_v21, 2 }
 0x9d9   :  { %6242 = vadd.xlane.f32.xlu0 %v6241_v22 }
 0x9da   :  { %v6256_v40 = vsel %vm6240_vm12, %v6254_v36, 0.0 }
 0x9db   :  { %6257 = vadd.xlane.f32.xlu1 %v6256_v40 }
 0xa4c   :  { %v6243_v23 = vpop.xlane.xlu0 %6242 }
 0xa4d   :  { %v6244_v29 = vrot.slane %v6243_v23, 4 }
 0xa4e   :  { %v6258_v32 = vpop.xlane.xlu1 %6257 }
 0xa4f   :  { %v6245_v33 = vadd.f32 %v6244_v29, %v6243_v23  ;;  %v6259_v16 = vrot.slane %v6258_v32, 4 }
 0xa51   :  { %v6246_v34 = vrot.slane %v6245_v33, 2  ;;  %v6260_v8 = vadd.f32 %v6259_v16, %v6258_v32 }
 0xa53   :  { %v6261_v14 = vrot.slane %v6260_v8, 2  ;;  %v6247_v5 = vadd.f32 %v6246_v34, %v6245_v33 }
 0xa55   :  { %v6262_v59 = vadd.f32 %v6261_v14, %v6260_v8  ;;  %v6248_v44 = vrot.slane %v6247_v5, 1 }
 0xa57   :  { %v6249_v37 = vadd.f32 %v6248_v44, %v6247_v5  ;;  %v6263_v41 = vrot.slane %v6262_v59, 1 }
 0xa59   :  { %8045 = vpush %v6249_v37  ;;  %v6264_v45 = vadd.f32 %v6263_v41, %v6262_v59 }
 0xa5b   :  { %8047 = vpush %v6264_v45 }
 0xa8a   :  { %s8046_s5 = spop %8045 }
 0xa8b   :  { %s6251_s0 = smul.f32 0.5, %s8046_s5 }
 0xa8c   :  { %s8048_s2 = spop %8047 }
 0xa8d   :  { %s6252_s20 = sadd.f32 %s6251_s0, %s10495_s6  ;;  %s6266_s21 = smul.f32 0.5, %s8048_s2 }
 0xa8f   :  { %s6268_s1 = ssub.f32 1.0, %s6252_s20 }
 0xa90   :  { %s6267_s24 = sadd.f32 %s6266_s21, %s10495_s6 }
 0xa91   :  { %s6269_s28 = smax.f32 %s8072_s27, %s6268_s1 }
 0xa92   :  { %s6270_s25 = sadd.f32 1.0, %s6267_s24 }
 0xa93   :  { %s6273_s26 = ssub.f32 0.0, %s6267_s24 }
 0xa94   :  { %s6271_s29 = smax.f32 %s8072_s27, %s6270_s25 }
 0xa95   :  { %s6272_s30 = sadd.f32 %s6271_s29, %s6269_s28  ;;  %v6278_v1 = vstv %s6273_s26 }
 0xa96   :  { %v6279_v17 = vsel %vm6277_vm13, %v6278_v1, 0.0 }
 0xa97   :  { %v6280_v25 = vstv %s6272_s30 }
 0xa98   :  { %v6281_v11 = vsel %vm6276_vm14, %v6280_v25, %v6279_v17 }
 0xa99   :  { %6282 = vst [vmem:[%s10496_s7] sm:$0x1] %v6281_v11 }

</bundles_post_ra>
